<compile_context>
chip_gen: v5e
topology: v5e:2x2
jax: 0.10.0
libtpu: 0.0.40
codegen_flags: <defaults>
</compile_context>

<pallas_src>
import math

import jax
import jax.numpy as jnp
from jax.experimental import pallas as pl
from jax.experimental.pallas import tpu as pltpu

DIM = 4
HIDDEN = 64
BATCH = 8
N_STEPS = 10          # fixed RK4 steps over t in [0, 1]
MAX_BATCH_TILE = 256  # MXU height on v6e/v7x


def _ode_rk4_kernel(x_ref, wz_ref, zp_ref, yp_ref, o_ref):
    bt, dim = x_ref.shape
    hidden = wz_ref.shape[-1]

    # ---- loop-invariant loads / broadcasts, hoisted out of the RK4 loop ----
    w2 = wz_ref[0]                                                 # (H,H) bf16
    w31 = wz_ref[1]                                                # (H,H) bf16 (= W3 @ W1)
    w1 = zp_ref[0:dim, :]                                          # (dim,H) f32
    b1 = jnp.broadcast_to(zp_ref[dim:dim + 1, :], (bt, hidden))
    b2 = jnp.broadcast_to(zp_ref[dim + 1:dim + 2, :], (bt, hidden))
    b31 = jnp.broadcast_to(zp_ref[dim + 2:dim + 3, :], (bt, hidden))  # (= b3 @ W1)

    x = x_ref[...].astype(jnp.float32)

    h = 1.0 / N_STEPS
    half_h = 0.5 * h
    h6 = h / 6.0

    def field(z):
        """Hidden-space vector field: returns (h2, d) with d = f(y) @ W1."""
        h1 = jnp.maximum(z + b1, 0.0).astype(jnp.bfloat16)
        h2 = jnp.dot(h1, w2, preferred_element_type=jnp.float32) + b2
        h2 = jnp.maximum(h2, 0.0)
        d = jnp.dot(h2.astype(jnp.bfloat16), w31,
                    preferred_element_type=jnp.float32) + b31
        return h2, d

    def rk4_step(_, carry):
        z, p_sum = carry
        h2_1, d1 = field(z)
        h2_2, d2 = field(z + half_h * d1)
        h2_3, d3 = field(z + half_h * d2)
        h2_4, d4 = field(z + h * d3)
        p_sum = p_sum + (h2_1 + 2.0 * h2_2 + 2.0 * h2_3 + h2_4)
        z = z + h6 * (d1 + 2.0 * d2 + 2.0 * d3 + d4)
        return z, p_sum

    # Initial hidden-space projection: one tiny K=dim matmul, once per kernel.
    z0 = jnp.dot(x, w1, preferred_element_type=jnp.float32)
    p0 = jnp.zeros((bt, hidden), jnp.float32)

    # Static trip count, short body -> fully unroll for LLO scheduler visibility.
    _, p_sum = jax.lax.fori_loop(0, N_STEPS, rk4_step, (z0, p0), unroll=True)

    # Single DIM-space readout, off the serial chain:
    #   y(1) = x + (h/6) * p_sum @ W3 + (N_STEPS*h) * b3, with N_STEPS*h == 1.
    w3 = yp_ref[0:hidden, :]                                       # (H,dim) f32
    b3 = jnp.broadcast_to(yp_ref[hidden:hidden + 1, :], (bt, dim))
    y1 = x + h6 * jnp.dot(p_sum, w3, preferred_element_type=jnp.float32) + b3
    o_ref[...] = y1.astype(o_ref.dtype)


def _pack_params(params):
    """Fuse W3@W1 / b3@W1 and pack the 6 weight/bias tensors into 3 buffers."""
    w1, b1 = params["w1"], params["b1"]
    w2, b2 = params["w2"], params["b2"]
    w3, b3 = params["w3"], params["b3"]
    w31 = jnp.dot(w3, w1)                                          # (H, H)
    b31 = jnp.dot(b3, w1)                                          # (1, H)
    wz = jnp.stack([w2, w31], axis=0).astype(jnp.bfloat16)         # (2, H, H)
    zpack = jnp.concatenate([w1, b1, b2, b31], axis=0).astype(jnp.float32)  # (dim+3, H)
    ypack = jnp.concatenate([w3, b3], axis=0).astype(jnp.float32)           # (H+1, dim)
    return wz, zpack, ypack


def ode_forward(x, params):
    """x: (batch, dim) f32.  params: dict of (in,out) weights, (1,out) biases."""
    batch, dim = x.shape
    hidden = params["w1"].shape[1]
    wz, zpack, ypack = _pack_params(params)

    # Single VMEM-resident block for small batches; for large batches shard
    # batch tiles across a "parallel" grid axis (both TCs on v7x, harmless on
    # single-TC v5e/v6e).
    if batch > MAX_BATCH_TILE and batch % MAX_BATCH_TILE == 0:
        batch_tile = MAX_BATCH_TILE
    else:
        batch_tile = batch
    grid = (batch // batch_tile,)

    flops = (2 * batch * dim * hidden                          # x @ W1
             + N_STEPS * 4 * 2 * 2 * batch * hidden * hidden   # 80 hidden matmuls
             + 2 * batch * hidden * dim)                       # p_sum @ W3
    bytes_accessed = (x.size * 4 + wz.size * 2 + zpack.size * 4
                      + ypack.size * 4 + batch * dim * 4)

    return pl.pallas_call(
        _ode_rk4_kernel,
        out_shape=jax.ShapeDtypeStruct((batch, dim), x.dtype),
        grid=grid,
        in_specs=[
            pl.BlockSpec((batch_tile, dim), lambda i: (i, 0)),
            pl.BlockSpec((2, hidden, hidden), lambda i: (0, 0, 0)),
            pl.BlockSpec((dim + 3, hidden), lambda i: (0, 0)),
            pl.BlockSpec((hidden + 1, dim), lambda i: (0, 0)),
        ],
        out_specs=pl.BlockSpec((batch_tile, dim), lambda i: (i, 0)),
        compiler_params=pltpu.CompilerParams(
            dimension_semantics=("parallel",)),
        cost_estimate=pl.CostEstimate(
            flops=flops, transcendentals=0, bytes_accessed=bytes_accessed),
    )(x, wz, zpack, ypack)


def ode_forward_ref(x, params):
    """Pure-JAX f32 fixed-step RK4 reference (no fusion, no bf16)."""
    w1, b1 = params["w1"], params["b1"]
    w2, b2 = params["w2"], params["b2"]
    w3, b3 = params["w3"], params["b3"]

    def f(y):
        h1 = jax.nn.relu(y @ w1 + b1)
        h2 = jax.nn.relu(h1 @ w2 + b2)
        return h2 @ w3 + b3

    h = 1.0 / N_STEPS
    y = x
    for _ in range(N_STEPS):
        k1 = f(y)
        k2 = f(y + 0.5 * h * k1)
        k3 = f(y + 0.5 * h * k2)
        k4 = f(y + h * k3)
        y = y + (h / 6.0) * (k1 + 2.0 * k2 + 2.0 * k3 + k4)
    return y


def init_params(key, dim, hidden):
    """PyTorch nn.Linear-style init (uniform +-1/sqrt(fan_in)).

    Weights are stored as (in, out), i.e. the transpose of torch's (out, in).
    Biases are stored as (1, out).
    """
    ks = jax.random.split(key, 6)

    def linear(kw, kb, fan_in, fan_out):
        bound = 1.0 / math.sqrt(fan_in)
        w = jax.random.uniform(kw, (fan_in, fan_out), jnp.float32, -bound, bound)
        b = jax.random.uniform(kb, (1, fan_out), jnp.float32, -bound, bound)
        return w, b

    w1, b1 = linear(ks[0], ks[1], dim, hidden)
    w2, b2 = linear(ks[2], ks[3], hidden, hidden)
    w3, b3 = linear(ks[4], ks[5], hidden, dim)
    return {"w1": w1, "b1": b1, "w2": w2, "b2": b2, "w3": w3, "b3": b3}


if __name__ == "__main__":
    key = jax.random.PRNGKey(0)
    k_params, k_x = jax.random.split(key)

    params = init_params(k_params, DIM, HIDDEN)
    x = jax.random.normal(k_x, (BATCH, DIM), dtype=jnp.float32)

    out = jax.jit(ode_forward)(x, params)
    out = jax.block_until_ready(out)

    assert out.shape == (BATCH, DIM)
    assert out.dtype == jnp.float32
    assert bool(jnp.all(jnp.isfinite(out)))

    # Validate against the pure-JAX f32 RK4 reference; the bf16 MXU inputs on
    # the hidden-space chain introduce only small rounding differences.
    ref = ode_forward_ref(x, params)
    err = float(jnp.max(jnp.abs(out - ref)))
    assert err < 5e-2, f"max abs error vs f32 reference: {err}"

    print("KERNEL_OK")
</pallas_src>

<mosaic_0001>
module attributes {stable_mosaic.version = 11 : i64} {
  func.func @_ode_rk4_kernel(%arg0: i32, %arg1: memref<8x4xf32, #tpu.memory_space<vmem>>, %arg2: memref<2x64x64xbf16, #tpu.memory_space<vmem>>, %arg3: memref<7x64xf32, #tpu.memory_space<vmem>>, %arg4: memref<65x4xf32, #tpu.memory_space<vmem>>, %arg5: memref<8x4xf32, #tpu.memory_space<vmem>>) attributes {dimension_semantics = [#tpu.dimension_semantics<parallel>], iteration_bounds = array<i64: 1>, scalar_prefetch = 0 : i64, scratch_operands = 0 : i64, tpu.core_type = #tpu.core_type<tc>, window_params = [{transform_indices = @transform_0, window_bounds = array<i64: 8, 4>}, {pipeline_mode = #tpu.pipeline_mode<synchronous>, transform_indices = @transform_1, window_bounds = array<i64: 2, 64, 64>}, {pipeline_mode = #tpu.pipeline_mode<synchronous>, transform_indices = @transform_2, window_bounds = array<i64: 7, 64>}, {pipeline_mode = #tpu.pipeline_mode<synchronous>, transform_indices = @transform_3, window_bounds = array<i64: 65, 4>}, {transform_indices = @transform_4, window_bounds = array<i64: 8, 4>}]} {
    %c0 = arith.constant 0 : index
    %c0_0 = arith.constant 0 : index
    %c0_1 = arith.constant 0 : index
    %0 = vector.load %arg2[%c0, %c0_0, %c0_1] : memref<2x64x64xbf16, #tpu.memory_space<vmem>>, vector<1x64x64xbf16>
    %1 = vector.shape_cast %0 : vector<1x64x64xbf16> to vector<64x64xbf16>
    %c1 = arith.constant 1 : index
    %c0_2 = arith.constant 0 : index
    %c0_3 = arith.constant 0 : index
    %2 = vector.load %arg2[%c1, %c0_2, %c0_3] : memref<2x64x64xbf16, #tpu.memory_space<vmem>>, vector<1x64x64xbf16>
    %3 = vector.shape_cast %2 : vector<1x64x64xbf16> to vector<64x64xbf16>
    %c0_4 = arith.constant 0 : index
    %c0_5 = arith.constant 0 : index
    %4 = vector.load %arg3[%c0_4, %c0_5] : memref<7x64xf32, #tpu.memory_space<vmem>>, vector<4x64xf32>
    %c4 = arith.constant 4 : index
    %c0_6 = arith.constant 0 : index
    %5 = vector.load %arg3[%c4, %c0_6] : memref<7x64xf32, #tpu.memory_space<vmem>>, vector<1x64xf32>
    %6 = vector.shape_cast %5 : vector<1x64xf32> to vector<1x64xf32>
    %7 = vector.broadcast %6 : vector<1x64xf32> to vector<8x64xf32>
    %c5 = arith.constant 5 : index
    %c0_7 = arith.constant 0 : index
    %8 = vector.load %arg3[%c5, %c0_7] : memref<7x64xf32, #tpu.memory_space<vmem>>, vector<1x64xf32>
    %9 = vector.shape_cast %8 : vector<1x64xf32> to vector<1x64xf32>
    %10 = vector.broadcast %9 : vector<1x64xf32> to vector<8x64xf32>
    %c6 = arith.constant 6 : index
    %c0_8 = arith.constant 0 : index
    %11 = vector.load %arg3[%c6, %c0_8] : memref<7x64xf32, #tpu.memory_space<vmem>>, vector<1x64xf32>
    %12 = vector.shape_cast %11 : vector<1x64xf32> to vector<1x64xf32>
    %13 = vector.broadcast %12 : vector<1x64xf32> to vector<8x64xf32>
    %c0_9 = arith.constant 0 : index
    %c0_10 = arith.constant 0 : index
    %14 = vector.load %arg1[%c0_9, %c0_10] : memref<8x4xf32, #tpu.memory_space<vmem>>, vector<8x4xf32>
    %cst = arith.constant dense<0.000000e+00> : vector<8x64xf32>
    %15 = tpu.matmul %14, %4, %cst {dimension_numbers = #tpu.dot_dimension_numbers<[1], [0], [0], [1], [0, 0, 1, 1], [], []>} : vector<8x4xf32>, vector<4x64xf32>, vector<8x64xf32> -> vector<8x64xf32>
    %cst_11 = arith.constant 0.000000e+00 : f32
    %16 = vector.broadcast %cst_11 : f32 to vector<8x64xf32>
    %c0_i32 = arith.constant 0 : i32
    %17 = arith.addf %15, %7 : vector<8x64xf32>
    %cst_12 = arith.constant 0.000000e+00 : f32
    %18 = vector.broadcast %cst_12 : f32 to vector<8x64xf32>
    %19 = arith.maximumf %17, %18 : vector<8x64xf32>
    %20 = arith.truncf %19 : vector<8x64xf32> to vector<8x64xbf16>
    %cst_13 = arith.constant dense<0.000000e+00> : vector<8x64xf32>
    %21 = tpu.matmul %20, %1, %cst_13 {dimension_numbers = #tpu.dot_dimension_numbers<[1], [0], [0], [1], [0, 0, 1, 1], [], []>} : vector<8x64xbf16>, vector<64x64xbf16>, vector<8x64xf32> -> vector<8x64xf32>
    %22 = arith.addf %21, %10 : vector<8x64xf32>
    %cst_14 = arith.constant 0.000000e+00 : f32
    %23 = vector.broadcast %cst_14 : f32 to vector<8x64xf32>
    %24 = arith.maximumf %22, %23 : vector<8x64xf32>
    %25 = arith.truncf %24 : vector<8x64xf32> to vector<8x64xbf16>
    %cst_15 = arith.constant dense<0.000000e+00> : vector<8x64xf32>
    %26 = tpu.matmul %25, %3, %cst_15 {dimension_numbers = #tpu.dot_dimension_numbers<[1], [0], [0], [1], [0, 0, 1, 1], [], []>} : vector<8x64xbf16>, vector<64x64xbf16>, vector<8x64xf32> -> vector<8x64xf32>
    %27 = arith.addf %26, %13 : vector<8x64xf32>
    %cst_16 = arith.constant 5.000000e-02 : f32
    %28 = vector.broadcast %cst_16 : f32 to vector<8x64xf32>
    %29 = arith.mulf %28, %27 : vector<8x64xf32>
    %30 = arith.addf %15, %29 : vector<8x64xf32>
    %31 = arith.addf %30, %7 : vector<8x64xf32>
    %cst_17 = arith.constant 0.000000e+00 : f32
    %32 = vector.broadcast %cst_17 : f32 to vector<8x64xf32>
    %33 = arith.maximumf %31, %32 : vector<8x64xf32>
    %34 = arith.truncf %33 : vector<8x64xf32> to vector<8x64xbf16>
    %cst_18 = arith.constant dense<0.000000e+00> : vector<8x64xf32>
    %35 = tpu.matmul %34, %1, %cst_18 {dimension_numbers = #tpu.dot_dimension_numbers<[1], [0], [0], [1], [0, 0, 1, 1], [], []>} : vector<8x64xbf16>, vector<64x64xbf16>, vector<8x64xf32> -> vector<8x64xf32>
    %36 = arith.addf %35, %10 : vector<8x64xf32>
    %cst_19 = arith.constant 0.000000e+00 : f32
    %37 = vector.broadcast %cst_19 : f32 to vector<8x64xf32>
    %38 = arith.maximumf %36, %37 : vector<8x64xf32>
    %39 = arith.truncf %38 : vector<8x64xf32> to vector<8x64xbf16>
    %cst_20 = arith.constant dense<0.000000e+00> : vector<8x64xf32>
    %40 = tpu.matmul %39, %3, %cst_20 {dimension_numbers = #tpu.dot_dimension_numbers<[1], [0], [0], [1], [0, 0, 1, 1], [], []>} : vector<8x64xbf16>, vector<64x64xbf16>, vector<8x64xf32> -> vector<8x64xf32>
    %41 = arith.addf %40, %13 : vector<8x64xf32>
    %cst_21 = arith.constant 5.000000e-02 : f32
    %42 = vector.broadcast %cst_21 : f32 to vector<8x64xf32>
    %43 = arith.mulf %42, %41 : vector<8x64xf32>
    %44 = arith.addf %15, %43 : vector<8x64xf32>
    %45 = arith.addf %44, %7 : vector<8x64xf32>
    %cst_22 = arith.constant 0.000000e+00 : f32
    %46 = vector.broadcast %cst_22 : f32 to vector<8x64xf32>
    %47 = arith.maximumf %45, %46 : vector<8x64xf32>
    %48 = arith.truncf %47 : vector<8x64xf32> to vector<8x64xbf16>
    %cst_23 = arith.constant dense<0.000000e+00> : vector<8x64xf32>
    %49 = tpu.matmul %48, %1, %cst_23 {dimension_numbers = #tpu.dot_dimension_numbers<[1], [0], [0], [1], [0, 0, 1, 1], [], []>} : vector<8x64xbf16>, vector<64x64xbf16>, vector<8x64xf32> -> vector<8x64xf32>
    %50 = arith.addf %49, %10 : vector<8x64xf32>
    %cst_24 = arith.constant 0.000000e+00 : f32
    %51 = vector.broadcast %cst_24 : f32 to vector<8x64xf32>
    %52 = arith.maximumf %50, %51 : vector<8x64xf32>
    %53 = arith.truncf %52 : vector<8x64xf32> to vector<8x64xbf16>
    %cst_25 = arith.constant dense<0.000000e+00> : vector<8x64xf32>
    %54 = tpu.matmul %53, %3, %cst_25 {dimension_numbers = #tpu.dot_dimension_numbers<[1], [0], [0], [1], [0, 0, 1, 1], [], []>} : vector<8x64xbf16>, vector<64x64xbf16>, vector<8x64xf32> -> vector<8x64xf32>
    %55 = arith.addf %54, %13 : vector<8x64xf32>
    %cst_26 = arith.constant 1.000000e-01 : f32
    %56 = vector.broadcast %cst_26 : f32 to vector<8x64xf32>
    %57 = arith.mulf %56, %55 : vector<8x64xf32>
    %58 = arith.addf %15, %57 : vector<8x64xf32>
    %59 = arith.addf %58, %7 : vector<8x64xf32>
    %cst_27 = arith.constant 0.000000e+00 : f32
    %60 = vector.broadcast %cst_27 : f32 to vector<8x64xf32>
    %61 = arith.maximumf %59, %60 : vector<8x64xf32>
    %62 = arith.truncf %61 : vector<8x64xf32> to vector<8x64xbf16>
    %cst_28 = arith.constant dense<0.000000e+00> : vector<8x64xf32>
    %63 = tpu.matmul %62, %1, %cst_28 {dimension_numbers = #tpu.dot_dimension_numbers<[1], [0], [0], [1], [0, 0, 1, 1], [], []>} : vector<8x64xbf16>, vector<64x64xbf16>, vector<8x64xf32> -> vector<8x64xf32>
    %64 = arith.addf %63, %10 : vector<8x64xf32>
    %cst_29 = arith.constant 0.000000e+00 : f32
    %65 = vector.broadcast %cst_29 : f32 to vector<8x64xf32>
    %66 = arith.maximumf %64, %65 : vector<8x64xf32>
    %67 = arith.truncf %66 : vector<8x64xf32> to vector<8x64xbf16>
    %cst_30 = arith.constant dense<0.000000e+00> : vector<8x64xf32>
    %68 = tpu.matmul %67, %3, %cst_30 {dimension_numbers = #tpu.dot_dimension_numbers<[1], [0], [0], [1], [0, 0, 1, 1], [], []>} : vector<8x64xbf16>, vector<64x64xbf16>, vector<8x64xf32> -> vector<8x64xf32>
    %69 = arith.addf %68, %13 : vector<8x64xf32>
    %cst_31 = arith.constant 2.000000e+00 : f32
    %70 = vector.broadcast %cst_31 : f32 to vector<8x64xf32>
    %71 = arith.mulf %70, %38 : vector<8x64xf32>
    %72 = arith.addf %24, %71 : vector<8x64xf32>
    %cst_32 = arith.constant 2.000000e+00 : f32
    %73 = vector.broadcast %cst_32 : f32 to vector<8x64xf32>
    %74 = arith.mulf %73, %52 : vector<8x64xf32>
    %75 = arith.addf %72, %74 : vector<8x64xf32>
    %76 = arith.addf %75, %66 : vector<8x64xf32>
    %77 = arith.addf %16, %76 : vector<8x64xf32>
    %cst_33 = arith.constant 2.000000e+00 : f32
    %78 = vector.broadcast %cst_33 : f32 to vector<8x64xf32>
    %79 = arith.mulf %78, %41 : vector<8x64xf32>
    %80 = arith.addf %27, %79 : vector<8x64xf32>
    %cst_34 = arith.constant 2.000000e+00 : f32
    %81 = vector.broadcast %cst_34 : f32 to vector<8x64xf32>
    %82 = arith.mulf %81, %55 : vector<8x64xf32>
    %83 = arith.addf %80, %82 : vector<8x64xf32>
    %84 = arith.addf %83, %69 : vector<8x64xf32>
    %cst_35 = arith.constant 0.0166666675 : f32
    %85 = vector.broadcast %cst_35 : f32 to vector<8x64xf32>
    %86 = arith.mulf %85, %84 : vector<8x64xf32>
    %87 = arith.addf %15, %86 : vector<8x64xf32>
    %c1_i32 = arith.constant 1 : i32
    %88 = arith.addf %87, %7 : vector<8x64xf32>
    %cst_36 = arith.constant 0.000000e+00 : f32
    %89 = vector.broadcast %cst_36 : f32 to vector<8x64xf32>
    %90 = arith.maximumf %88, %89 : vector<8x64xf32>
    %91 = arith.truncf %90 : vector<8x64xf32> to vector<8x64xbf16>
    %cst_37 = arith.constant dense<0.000000e+00> : vector<8x64xf32>
    %92 = tpu.matmul %91, %1, %cst_37 {dimension_numbers = #tpu.dot_dimension_numbers<[1], [0], [0], [1], [0, 0, 1, 1], [], []>} : vector<8x64xbf16>, vector<64x64xbf16>, vector<8x64xf32> -> vector<8x64xf32>
    %93 = arith.addf %92, %10 : vector<8x64xf32>
    %cst_38 = arith.constant 0.000000e+00 : f32
    %94 = vector.broadcast %cst_38 : f32 to vector<8x64xf32>
    %95 = arith.maximumf %93, %94 : vector<8x64xf32>
    %96 = arith.truncf %95 : vector<8x64xf32> to vector<8x64xbf16>
    %cst_39 = arith.constant dense<0.000000e+00> : vector<8x64xf32>
    %97 = tpu.matmul %96, %3, %cst_39 {dimension_numbers = #tpu.dot_dimension_numbers<[1], [0], [0], [1], [0, 0, 1, 1], [], []>} : vector<8x64xbf16>, vector<64x64xbf16>, vector<8x64xf32> -> vector<8x64xf32>
    %98 = arith.addf %97, %13 : vector<8x64xf32>
    %cst_40 = arith.constant 5.000000e-02 : f32
    %99 = vector.broadcast %cst_40 : f32 to vector<8x64xf32>
    %100 = arith.mulf %99, %98 : vector<8x64xf32>
    %101 = arith.addf %87, %100 : vector<8x64xf32>
    %102 = arith.addf %101, %7 : vector<8x64xf32>
    %cst_41 = arith.constant 0.000000e+00 : f32
    %103 = vector.broadcast %cst_41 : f32 to vector<8x64xf32>
    %104 = arith.maximumf %102, %103 : vector<8x64xf32>
    %105 = arith.truncf %104 : vector<8x64xf32> to vector<8x64xbf16>
    %cst_42 = arith.constant dense<0.000000e+00> : vector<8x64xf32>
    %106 = tpu.matmul %105, %1, %cst_42 {dimension_numbers = #tpu.dot_dimension_numbers<[1], [0], [0], [1], [0, 0, 1, 1], [], []>} : vector<8x64xbf16>, vector<64x64xbf16>, vector<8x64xf32> -> vector<8x64xf32>
    %107 = arith.addf %106, %10 : vector<8x64xf32>
    %cst_43 = arith.constant 0.000000e+00 : f32
    %108 = vector.broadcast %cst_43 : f32 to vector<8x64xf32>
    %109 = arith.maximumf %107, %108 : vector<8x64xf32>
    %110 = arith.truncf %109 : vector<8x64xf32> to vector<8x64xbf16>
    %cst_44 = arith.constant dense<0.000000e+00> : vector<8x64xf32>
    %111 = tpu.matmul %110, %3, %cst_44 {dimension_numbers = #tpu.dot_dimension_numbers<[1], [0], [0], [1], [0, 0, 1, 1], [], []>} : vector<8x64xbf16>, vector<64x64xbf16>, vector<8x64xf32> -> vector<8x64xf32>
    %112 = arith.addf %111, %13 : vector<8x64xf32>
    %cst_45 = arith.constant 5.000000e-02 : f32
    %113 = vector.broadcast %cst_45 : f32 to vector<8x64xf32>
    %114 = arith.mulf %113, %112 : vector<8x64xf32>
    %115 = arith.addf %87, %114 : vector<8x64xf32>
    %116 = arith.addf %115, %7 : vector<8x64xf32>
    %cst_46 = arith.constant 0.000000e+00 : f32
    %117 = vector.broadcast %cst_46 : f32 to vector<8x64xf32>
    %118 = arith.maximumf %116, %117 : vector<8x64xf32>
    %119 = arith.truncf %118 : vector<8x64xf32> to vector<8x64xbf16>
    %cst_47 = arith.constant dense<0.000000e+00> : vector<8x64xf32>
    %120 = tpu.matmul %119, %1, %cst_47 {dimension_numbers = #tpu.dot_dimension_numbers<[1], [0], [0], [1], [0, 0, 1, 1], [], []>} : vector<8x64xbf16>, vector<64x64xbf16>, vector<8x64xf32> -> vector<8x64xf32>
    %121 = arith.addf %120, %10 : vector<8x64xf32>
    %cst_48 = arith.constant 0.000000e+00 : f32
    %122 = vector.broadcast %cst_48 : f32 to vector<8x64xf32>
    %123 = arith.maximumf %121, %122 : vector<8x64xf32>
    %124 = arith.truncf %123 : vector<8x64xf32> to vector<8x64xbf16>
    %cst_49 = arith.constant dense<0.000000e+00> : vector<8x64xf32>
    %125 = tpu.matmul %124, %3, %cst_49 {dimension_numbers = #tpu.dot_dimension_numbers<[1], [0], [0], [1], [0, 0, 1, 1], [], []>} : vector<8x64xbf16>, vector<64x64xbf16>, vector<8x64xf32> -> vector<8x64xf32>
    %126 = arith.addf %125, %13 : vector<8x64xf32>
    %cst_50 = arith.constant 1.000000e-01 : f32
    %127 = vector.broadcast %cst_50 : f32 to vector<8x64xf32>
    %128 = arith.mulf %127, %126 : vector<8x64xf32>
    %129 = arith.addf %87, %128 : vector<8x64xf32>
    %130 = arith.addf %129, %7 : vector<8x64xf32>
    %cst_51 = arith.constant 0.000000e+00 : f32
    %131 = vector.broadcast %cst_51 : f32 to vector<8x64xf32>
    %132 = arith.maximumf %130, %131 : vector<8x64xf32>
    %133 = arith.truncf %132 : vector<8x64xf32> to vector<8x64xbf16>
    %cst_52 = arith.constant dense<0.000000e+00> : vector<8x64xf32>
    %134 = tpu.matmul %133, %1, %cst_52 {dimension_numbers = #tpu.dot_dimension_numbers<[1], [0], [0], [1], [0, 0, 1, 1], [], []>} : vector<8x64xbf16>, vector<64x64xbf16>, vector<8x64xf32> -> vector<8x64xf32>
    %135 = arith.addf %134, %10 : vector<8x64xf32>
    %cst_53 = arith.constant 0.000000e+00 : f32
    %136 = vector.broadcast %cst_53 : f32 to vector<8x64xf32>
    %137 = arith.maximumf %135, %136 : vector<8x64xf32>
    %138 = arith.truncf %137 : vector<8x64xf32> to vector<8x64xbf16>
    %cst_54 = arith.constant dense<0.000000e+00> : vector<8x64xf32>
    %139 = tpu.matmul %138, %3, %cst_54 {dimension_numbers = #tpu.dot_dimension_numbers<[1], [0], [0], [1], [0, 0, 1, 1], [], []>} : vector<8x64xbf16>, vector<64x64xbf16>, vector<8x64xf32> -> vector<8x64xf32>
    %140 = arith.addf %139, %13 : vector<8x64xf32>
    %cst_55 = arith.constant 2.000000e+00 : f32
    %141 = vector.broadcast %cst_55 : f32 to vector<8x64xf32>
    %142 = arith.mulf %141, %109 : vector<8x64xf32>
    %143 = arith.addf %95, %142 : vector<8x64xf32>
    %cst_56 = arith.constant 2.000000e+00 : f32
    %144 = vector.broadcast %cst_56 : f32 to vector<8x64xf32>
    %145 = arith.mulf %144, %123 : vector<8x64xf32>
    %146 = arith.addf %143, %145 : vector<8x64xf32>
    %147 = arith.addf %146, %137 : vector<8x64xf32>
    %148 = arith.addf %77, %147 : vector<8x64xf32>
    %cst_57 = arith.constant 2.000000e+00 : f32
    %149 = vector.broadcast %cst_57 : f32 to vector<8x64xf32>
    %150 = arith.mulf %149, %112 : vector<8x64xf32>
    %151 = arith.addf %98, %150 : vector<8x64xf32>
    %cst_58 = arith.constant 2.000000e+00 : f32
    %152 = vector.broadcast %cst_58 : f32 to vector<8x64xf32>
    %153 = arith.mulf %152, %126 : vector<8x64xf32>
    %154 = arith.addf %151, %153 : vector<8x64xf32>
    %155 = arith.addf %154, %140 : vector<8x64xf32>
    %cst_59 = arith.constant 0.0166666675 : f32
    %156 = vector.broadcast %cst_59 : f32 to vector<8x64xf32>
    %157 = arith.mulf %156, %155 : vector<8x64xf32>
    %158 = arith.addf %87, %157 : vector<8x64xf32>
    %c2_i32 = arith.constant 2 : i32
    %159 = arith.addf %158, %7 : vector<8x64xf32>
    %cst_60 = arith.constant 0.000000e+00 : f32
    %160 = vector.broadcast %cst_60 : f32 to vector<8x64xf32>
    %161 = arith.maximumf %159, %160 : vector<8x64xf32>
    %162 = arith.truncf %161 : vector<8x64xf32> to vector<8x64xbf16>
    %cst_61 = arith.constant dense<0.000000e+00> : vector<8x64xf32>
    %163 = tpu.matmul %162, %1, %cst_61 {dimension_numbers = #tpu.dot_dimension_numbers<[1], [0], [0], [1], [0, 0, 1, 1], [], []>} : vector<8x64xbf16>, vector<64x64xbf16>, vector<8x64xf32> -> vector<8x64xf32>
    %164 = arith.addf %163, %10 : vector<8x64xf32>
    %cst_62 = arith.constant 0.000000e+00 : f32
    %165 = vector.broadcast %cst_62 : f32 to vector<8x64xf32>
    %166 = arith.maximumf %164, %165 : vector<8x64xf32>
    %167 = arith.truncf %166 : vector<8x64xf32> to vector<8x64xbf16>
    %cst_63 = arith.constant dense<0.000000e+00> : vector<8x64xf32>
    %168 = tpu.matmul %167, %3, %cst_63 {dimension_numbers = #tpu.dot_dimension_numbers<[1], [0], [0], [1], [0, 0, 1, 1], [], []>} : vector<8x64xbf16>, vector<64x64xbf16>, vector<8x64xf32> -> vector<8x64xf32>
    %169 = arith.addf %168, %13 : vector<8x64xf32>
    %cst_64 = arith.constant 5.000000e-02 : f32
    %170 = vector.broadcast %cst_64 : f32 to vector<8x64xf32>
    %171 = arith.mulf %170, %169 : vector<8x64xf32>
    %172 = arith.addf %158, %171 : vector<8x64xf32>
    %173 = arith.addf %172, %7 : vector<8x64xf32>
    %cst_65 = arith.constant 0.000000e+00 : f32
    %174 = vector.broadcast %cst_65 : f32 to vector<8x64xf32>
    %175 = arith.maximumf %173, %174 : vector<8x64xf32>
    %176 = arith.truncf %175 : vector<8x64xf32> to vector<8x64xbf16>
    %cst_66 = arith.constant dense<0.000000e+00> : vector<8x64xf32>
    %177 = tpu.matmul %176, %1, %cst_66 {dimension_numbers = #tpu.dot_dimension_numbers<[1], [0], [0], [1], [0, 0, 1, 1], [], []>} : vector<8x64xbf16>, vector<64x64xbf16>, vector<8x64xf32> -> vector<8x64xf32>
    %178 = arith.addf %177, %10 : vector<8x64xf32>
    %cst_67 = arith.constant 0.000000e+00 : f32
    %179 = vector.broadcast %cst_67 : f32 to vector<8x64xf32>
    %180 = arith.maximumf %178, %179 : vector<8x64xf32>
    %181 = arith.truncf %180 : vector<8x64xf32> to vector<8x64xbf16>
    %cst_68 = arith.constant dense<0.000000e+00> : vector<8x64xf32>
    %182 = tpu.matmul %181, %3, %cst_68 {dimension_numbers = #tpu.dot_dimension_numbers<[1], [0], [0], [1], [0, 0, 1, 1], [], []>} : vector<8x64xbf16>, vector<64x64xbf16>, vector<8x64xf32> -> vector<8x64xf32>
    %183 = arith.addf %182, %13 : vector<8x64xf32>
    %cst_69 = arith.constant 5.000000e-02 : f32
    %184 = vector.broadcast %cst_69 : f32 to vector<8x64xf32>
    %185 = arith.mulf %184, %183 : vector<8x64xf32>
    %186 = arith.addf %158, %185 : vector<8x64xf32>
    %187 = arith.addf %186, %7 : vector<8x64xf32>
    %cst_70 = arith.constant 0.000000e+00 : f32
    %188 = vector.broadcast %cst_70 : f32 to vector<8x64xf32>
    %189 = arith.maximumf %187, %188 : vector<8x64xf32>
    %190 = arith.truncf %189 : vector<8x64xf32> to vector<8x64xbf16>
    %cst_71 = arith.constant dense<0.000000e+00> : vector<8x64xf32>
    %191 = tpu.matmul %190, %1, %cst_71 {dimension_numbers = #tpu.dot_dimension_numbers<[1], [0], [0], [1], [0, 0, 1, 1], [], []>} : vector<8x64xbf16>, vector<64x64xbf16>, vector<8x64xf32> -> vector<8x64xf32>
    %192 = arith.addf %191, %10 : vector<8x64xf32>
    %cst_72 = arith.constant 0.000000e+00 : f32
    %193 = vector.broadcast %cst_72 : f32 to vector<8x64xf32>
    %194 = arith.maximumf %192, %193 : vector<8x64xf32>
    %195 = arith.truncf %194 : vector<8x64xf32> to vector<8x64xbf16>
    %cst_73 = arith.constant dense<0.000000e+00> : vector<8x64xf32>
    %196 = tpu.matmul %195, %3, %cst_73 {dimension_numbers = #tpu.dot_dimension_numbers<[1], [0], [0], [1], [0, 0, 1, 1], [], []>} : vector<8x64xbf16>, vector<64x64xbf16>, vector<8x64xf32> -> vector<8x64xf32>
    %197 = arith.addf %196, %13 : vector<8x64xf32>
    %cst_74 = arith.constant 1.000000e-01 : f32
    %198 = vector.broadcast %cst_74 : f32 to vector<8x64xf32>
    %199 = arith.mulf %198, %197 : vector<8x64xf32>
    %200 = arith.addf %158, %199 : vector<8x64xf32>
    %201 = arith.addf %200, %7 : vector<8x64xf32>
    %cst_75 = arith.constant 0.000000e+00 : f32
    %202 = vector.broadcast %cst_75 : f32 to vector<8x64xf32>
    %203 = arith.maximumf %201, %202 : vector<8x64xf32>
    %204 = arith.truncf %203 : vector<8x64xf32> to vector<8x64xbf16>
    %cst_76 = arith.constant dense<0.000000e+00> : vector<8x64xf32>
    %205 = tpu.matmul %204, %1, %cst_76 {dimension_numbers = #tpu.dot_dimension_numbers<[1], [0], [0], [1], [0, 0, 1, 1], [], []>} : vector<8x64xbf16>, vector<64x64xbf16>, vector<8x64xf32> -> vector<8x64xf32>
    %206 = arith.addf %205, %10 : vector<8x64xf32>
    %cst_77 = arith.constant 0.000000e+00 : f32
    %207 = vector.broadcast %cst_77 : f32 to vector<8x64xf32>
    %208 = arith.maximumf %206, %207 : vector<8x64xf32>
    %209 = arith.truncf %208 : vector<8x64xf32> to vector<8x64xbf16>
    %cst_78 = arith.constant dense<0.000000e+00> : vector<8x64xf32>
    %210 = tpu.matmul %209, %3, %cst_78 {dimension_numbers = #tpu.dot_dimension_numbers<[1], [0], [0], [1], [0, 0, 1, 1], [], []>} : vector<8x64xbf16>, vector<64x64xbf16>, vector<8x64xf32> -> vector<8x64xf32>
    %211 = arith.addf %210, %13 : vector<8x64xf32>
    %cst_79 = arith.constant 2.000000e+00 : f32
    %212 = vector.broadcast %cst_79 : f32 to vector<8x64xf32>
    %213 = arith.mulf %212, %180 : vector<8x64xf32>
    %214 = arith.addf %166, %213 : vector<8x64xf32>
    %cst_80 = arith.constant 2.000000e+00 : f32
    %215 = vector.broadcast %cst_80 : f32 to vector<8x64xf32>
    %216 = arith.mulf %215, %194 : vector<8x64xf32>
    %217 = arith.addf %214, %216 : vector<8x64xf32>
    %218 = arith.addf %217, %208 : vector<8x64xf32>
    %219 = arith.addf %148, %218 : vector<8x64xf32>
    %cst_81 = arith.constant 2.000000e+00 : f32
    %220 = vector.broadcast %cst_81 : f32 to vector<8x64xf32>
    %221 = arith.mulf %220, %183 : vector<8x64xf32>
    %222 = arith.addf %169, %221 : vector<8x64xf32>
    %cst_82 = arith.constant 2.000000e+00 : f32
    %223 = vector.broadcast %cst_82 : f32 to vector<8x64xf32>
    %224 = arith.mulf %223, %197 : vector<8x64xf32>
    %225 = arith.addf %222, %224 : vector<8x64xf32>
    %226 = arith.addf %225, %211 : vector<8x64xf32>
    %cst_83 = arith.constant 0.0166666675 : f32
    %227 = vector.broadcast %cst_83 : f32 to vector<8x64xf32>
    %228 = arith.mulf %227, %226 : vector<8x64xf32>
    %229 = arith.addf %158, %228 : vector<8x64xf32>
    %c3_i32 = arith.constant 3 : i32
    %230 = arith.addf %229, %7 : vector<8x64xf32>
    %cst_84 = arith.constant 0.000000e+00 : f32
    %231 = vector.broadcast %cst_84 : f32 to vector<8x64xf32>
    %232 = arith.maximumf %230, %231 : vector<8x64xf32>
    %233 = arith.truncf %232 : vector<8x64xf32> to vector<8x64xbf16>
    %cst_85 = arith.constant dense<0.000000e+00> : vector<8x64xf32>
    %234 = tpu.matmul %233, %1, %cst_85 {dimension_numbers = #tpu.dot_dimension_numbers<[1], [0], [0], [1], [0, 0, 1, 1], [], []>} : vector<8x64xbf16>, vector<64x64xbf16>, vector<8x64xf32> -> vector<8x64xf32>
    %235 = arith.addf %234, %10 : vector<8x64xf32>
    %cst_86 = arith.constant 0.000000e+00 : f32
    %236 = vector.broadcast %cst_86 : f32 to vector<8x64xf32>
    %237 = arith.maximumf %235, %236 : vector<8x64xf32>
    %238 = arith.truncf %237 : vector<8x64xf32> to vector<8x64xbf16>
    %cst_87 = arith.constant dense<0.000000e+00> : vector<8x64xf32>
    %239 = tpu.matmul %238, %3, %cst_87 {dimension_numbers = #tpu.dot_dimension_numbers<[1], [0], [0], [1], [0, 0, 1, 1], [], []>} : vector<8x64xbf16>, vector<64x64xbf16>, vector<8x64xf32> -> vector<8x64xf32>
    %240 = arith.addf %239, %13 : vector<8x64xf32>
    %cst_88 = arith.constant 5.000000e-02 : f32
    %241 = vector.broadcast %cst_88 : f32 to vector<8x64xf32>
    %242 = arith.mulf %241, %240 : vector<8x64xf32>
    %243 = arith.addf %229, %242 : vector<8x64xf32>
    %244 = arith.addf %243, %7 : vector<8x64xf32>
    %cst_89 = arith.constant 0.000000e+00 : f32
    %245 = vector.broadcast %cst_89 : f32 to vector<8x64xf32>
    %246 = arith.maximumf %244, %245 : vector<8x64xf32>
    %247 = arith.truncf %246 : vector<8x64xf32> to vector<8x64xbf16>
    %cst_90 = arith.constant dense<0.000000e+00> : vector<8x64xf32>
    %248 = tpu.matmul %247, %1, %cst_90 {dimension_numbers = #tpu.dot_dimension_numbers<[1], [0], [0], [1], [0, 0, 1, 1], [], []>} : vector<8x64xbf16>, vector<64x64xbf16>, vector<8x64xf32> -> vector<8x64xf32>
    %249 = arith.addf %248, %10 : vector<8x64xf32>
    %cst_91 = arith.constant 0.000000e+00 : f32
    %250 = vector.broadcast %cst_91 : f32 to vector<8x64xf32>
    %251 = arith.maximumf %249, %250 : vector<8x64xf32>
    %252 = arith.truncf %251 : vector<8x64xf32> to vector<8x64xbf16>
    %cst_92 = arith.constant dense<0.000000e+00> : vector<8x64xf32>
    %253 = tpu.matmul %252, %3, %cst_92 {dimension_numbers = #tpu.dot_dimension_numbers<[1], [0], [0], [1], [0, 0, 1, 1], [], []>} : vector<8x64xbf16>, vector<64x64xbf16>, vector<8x64xf32> -> vector<8x64xf32>
    %254 = arith.addf %253, %13 : vector<8x64xf32>
    %cst_93 = arith.constant 5.000000e-02 : f32
    %255 = vector.broadcast %cst_93 : f32 to vector<8x64xf32>
    %256 = arith.mulf %255, %254 : vector<8x64xf32>
    %257 = arith.addf %229, %256 : vector<8x64xf32>
    %258 = arith.addf %257, %7 : vector<8x64xf32>
    %cst_94 = arith.constant 0.000000e+00 : f32
    %259 = vector.broadcast %cst_94 : f32 to vector<8x64xf32>
    %260 = arith.maximumf %258, %259 : vector<8x64xf32>
    %261 = arith.truncf %260 : vector<8x64xf32> to vector<8x64xbf16>
    %cst_95 = arith.constant dense<0.000000e+00> : vector<8x64xf32>
    %262 = tpu.matmul %261, %1, %cst_95 {dimension_numbers = #tpu.dot_dimension_numbers<[1], [0], [0], [1], [0, 0, 1, 1], [], []>} : vector<8x64xbf16>, vector<64x64xbf16>, vector<8x64xf32> -> vector<8x64xf32>
    %263 = arith.addf %262, %10 : vector<8x64xf32>
    %cst_96 = arith.constant 0.000000e+00 : f32
    %264 = vector.broadcast %cst_96 : f32 to vector<8x64xf32>
    %265 = arith.maximumf %263, %264 : vector<8x64xf32>
    %266 = arith.truncf %265 : vector<8x64xf32> to vector<8x64xbf16>
    %cst_97 = arith.constant dense<0.000000e+00> : vector<8x64xf32>
    %267 = tpu.matmul %266, %3, %cst_97 {dimension_numbers = #tpu.dot_dimension_numbers<[1], [0], [0], [1], [0, 0, 1, 1], [], []>} : vector<8x64xbf16>, vector<64x64xbf16>, vector<8x64xf32> -> vector<8x64xf32>
    %268 = arith.addf %267, %13 : vector<8x64xf32>
    %cst_98 = arith.constant 1.000000e-01 : f32
    %269 = vector.broadcast %cst_98 : f32 to vector<8x64xf32>
    %270 = arith.mulf %269, %268 : vector<8x64xf32>
    %271 = arith.addf %229, %270 : vector<8x64xf32>
    %272 = arith.addf %271, %7 : vector<8x64xf32>
    %cst_99 = arith.constant 0.000000e+00 : f32
    %273 = vector.broadcast %cst_99 : f32 to vector<8x64xf32>
    %274 = arith.maximumf %272, %273 : vector<8x64xf32>
    %275 = arith.truncf %274 : vector<8x64xf32> to vector<8x64xbf16>
    %cst_100 = arith.constant dense<0.000000e+00> : vector<8x64xf32>
    %276 = tpu.matmul %275, %1, %cst_100 {dimension_numbers = #tpu.dot_dimension_numbers<[1], [0], [0], [1], [0, 0, 1, 1], [], []>} : vector<8x64xbf16>, vector<64x64xbf16>, vector<8x64xf32> -> vector<8x64xf32>
    %277 = arith.addf %276, %10 : vector<8x64xf32>
    %cst_101 = arith.constant 0.000000e+00 : f32
    %278 = vector.broadcast %cst_101 : f32 to vector<8x64xf32>
    %279 = arith.maximumf %277, %278 : vector<8x64xf32>
    %280 = arith.truncf %279 : vector<8x64xf32> to vector<8x64xbf16>
    %cst_102 = arith.constant dense<0.000000e+00> : vector<8x64xf32>
    %281 = tpu.matmul %280, %3, %cst_102 {dimension_numbers = #tpu.dot_dimension_numbers<[1], [0], [0], [1], [0, 0, 1, 1], [], []>} : vector<8x64xbf16>, vector<64x64xbf16>, vector<8x64xf32> -> vector<8x64xf32>
    %282 = arith.addf %281, %13 : vector<8x64xf32>
    %cst_103 = arith.constant 2.000000e+00 : f32
    %283 = vector.broadcast %cst_103 : f32 to vector<8x64xf32>
    %284 = arith.mulf %283, %251 : vector<8x64xf32>
    %285 = arith.addf %237, %284 : vector<8x64xf32>
    %cst_104 = arith.constant 2.000000e+00 : f32
    %286 = vector.broadcast %cst_104 : f32 to vector<8x64xf32>
    %287 = arith.mulf %286, %265 : vector<8x64xf32>
    %288 = arith.addf %285, %287 : vector<8x64xf32>
    %289 = arith.addf %288, %279 : vector<8x64xf32>
    %290 = arith.addf %219, %289 : vector<8x64xf32>
    %cst_105 = arith.constant 2.000000e+00 : f32
    %291 = vector.broadcast %cst_105 : f32 to vector<8x64xf32>
    %292 = arith.mulf %291, %254 : vector<8x64xf32>
    %293 = arith.addf %240, %292 : vector<8x64xf32>
    %cst_106 = arith.constant 2.000000e+00 : f32
    %294 = vector.broadcast %cst_106 : f32 to vector<8x64xf32>
    %295 = arith.mulf %294, %268 : vector<8x64xf32>
    %296 = arith.addf %293, %295 : vector<8x64xf32>
    %297 = arith.addf %296, %282 : vector<8x64xf32>
    %cst_107 = arith.constant 0.0166666675 : f32
    %298 = vector.broadcast %cst_107 : f32 to vector<8x64xf32>
    %299 = arith.mulf %298, %297 : vector<8x64xf32>
    %300 = arith.addf %229, %299 : vector<8x64xf32>
    %c4_i32 = arith.constant 4 : i32
    %301 = arith.addf %300, %7 : vector<8x64xf32>
    %cst_108 = arith.constant 0.000000e+00 : f32
    %302 = vector.broadcast %cst_108 : f32 to vector<8x64xf32>
    %303 = arith.maximumf %301, %302 : vector<8x64xf32>
    %304 = arith.truncf %303 : vector<8x64xf32> to vector<8x64xbf16>
    %cst_109 = arith.constant dense<0.000000e+00> : vector<8x64xf32>
    %305 = tpu.matmul %304, %1, %cst_109 {dimension_numbers = #tpu.dot_dimension_numbers<[1], [0], [0], [1], [0, 0, 1, 1], [], []>} : vector<8x64xbf16>, vector<64x64xbf16>, vector<8x64xf32> -> vector<8x64xf32>
    %306 = arith.addf %305, %10 : vector<8x64xf32>
    %cst_110 = arith.constant 0.000000e+00 : f32
    %307 = vector.broadcast %cst_110 : f32 to vector<8x64xf32>
    %308 = arith.maximumf %306, %307 : vector<8x64xf32>
    %309 = arith.truncf %308 : vector<8x64xf32> to vector<8x64xbf16>
    %cst_111 = arith.constant dense<0.000000e+00> : vector<8x64xf32>
    %310 = tpu.matmul %309, %3, %cst_111 {dimension_numbers = #tpu.dot_dimension_numbers<[1], [0], [0], [1], [0, 0, 1, 1], [], []>} : vector<8x64xbf16>, vector<64x64xbf16>, vector<8x64xf32> -> vector<8x64xf32>
    %311 = arith.addf %310, %13 : vector<8x64xf32>
    %cst_112 = arith.constant 5.000000e-02 : f32
    %312 = vector.broadcast %cst_112 : f32 to vector<8x64xf32>
    %313 = arith.mulf %312, %311 : vector<8x64xf32>
    %314 = arith.addf %300, %313 : vector<8x64xf32>
    %315 = arith.addf %314, %7 : vector<8x64xf32>
    %cst_113 = arith.constant 0.000000e+00 : f32
    %316 = vector.broadcast %cst_113 : f32 to vector<8x64xf32>
    %317 = arith.maximumf %315, %316 : vector<8x64xf32>
    %318 = arith.truncf %317 : vector<8x64xf32> to vector<8x64xbf16>
    %cst_114 = arith.constant dense<0.000000e+00> : vector<8x64xf32>
    %319 = tpu.matmul %318, %1, %cst_114 {dimension_numbers = #tpu.dot_dimension_numbers<[1], [0], [0], [1], [0, 0, 1, 1], [], []>} : vector<8x64xbf16>, vector<64x64xbf16>, vector<8x64xf32> -> vector<8x64xf32>
    %320 = arith.addf %319, %10 : vector<8x64xf32>
    %cst_115 = arith.constant 0.000000e+00 : f32
    %321 = vector.broadcast %cst_115 : f32 to vector<8x64xf32>
    %322 = arith.maximumf %320, %321 : vector<8x64xf32>
    %323 = arith.truncf %322 : vector<8x64xf32> to vector<8x64xbf16>
    %cst_116 = arith.constant dense<0.000000e+00> : vector<8x64xf32>
    %324 = tpu.matmul %323, %3, %cst_116 {dimension_numbers = #tpu.dot_dimension_numbers<[1], [0], [0], [1], [0, 0, 1, 1], [], []>} : vector<8x64xbf16>, vector<64x64xbf16>, vector<8x64xf32> -> vector<8x64xf32>
    %325 = arith.addf %324, %13 : vector<8x64xf32>
    %cst_117 = arith.constant 5.000000e-02 : f32
    %326 = vector.broadcast %cst_117 : f32 to vector<8x64xf32>
    %327 = arith.mulf %326, %325 : vector<8x64xf32>
    %328 = arith.addf %300, %327 : vector<8x64xf32>
    %329 = arith.addf %328, %7 : vector<8x64xf32>
    %cst_118 = arith.constant 0.000000e+00 : f32
    %330 = vector.broadcast %cst_118 : f32 to vector<8x64xf32>
    %331 = arith.maximumf %329, %330 : vector<8x64xf32>
    %332 = arith.truncf %331 : vector<8x64xf32> to vector<8x64xbf16>
    %cst_119 = arith.constant dense<0.000000e+00> : vector<8x64xf32>
    %333 = tpu.matmul %332, %1, %cst_119 {dimension_numbers = #tpu.dot_dimension_numbers<[1], [0], [0], [1], [0, 0, 1, 1], [], []>} : vector<8x64xbf16>, vector<64x64xbf16>, vector<8x64xf32> -> vector<8x64xf32>
    %334 = arith.addf %333, %10 : vector<8x64xf32>
    %cst_120 = arith.constant 0.000000e+00 : f32
    %335 = vector.broadcast %cst_120 : f32 to vector<8x64xf32>
    %336 = arith.maximumf %334, %335 : vector<8x64xf32>
    %337 = arith.truncf %336 : vector<8x64xf32> to vector<8x64xbf16>
    %cst_121 = arith.constant dense<0.000000e+00> : vector<8x64xf32>
    %338 = tpu.matmul %337, %3, %cst_121 {dimension_numbers = #tpu.dot_dimension_numbers<[1], [0], [0], [1], [0, 0, 1, 1], [], []>} : vector<8x64xbf16>, vector<64x64xbf16>, vector<8x64xf32> -> vector<8x64xf32>
    %339 = arith.addf %338, %13 : vector<8x64xf32>
    %cst_122 = arith.constant 1.000000e-01 : f32
    %340 = vector.broadcast %cst_122 : f32 to vector<8x64xf32>
    %341 = arith.mulf %340, %339 : vector<8x64xf32>
    %342 = arith.addf %300, %341 : vector<8x64xf32>
    %343 = arith.addf %342, %7 : vector<8x64xf32>
    %cst_123 = arith.constant 0.000000e+00 : f32
    %344 = vector.broadcast %cst_123 : f32 to vector<8x64xf32>
    %345 = arith.maximumf %343, %344 : vector<8x64xf32>
    %346 = arith.truncf %345 : vector<8x64xf32> to vector<8x64xbf16>
    %cst_124 = arith.constant dense<0.000000e+00> : vector<8x64xf32>
    %347 = tpu.matmul %346, %1, %cst_124 {dimension_numbers = #tpu.dot_dimension_numbers<[1], [0], [0], [1], [0, 0, 1, 1], [], []>} : vector<8x64xbf16>, vector<64x64xbf16>, vector<8x64xf32> -> vector<8x64xf32>
    %348 = arith.addf %347, %10 : vector<8x64xf32>
    %cst_125 = arith.constant 0.000000e+00 : f32
    %349 = vector.broadcast %cst_125 : f32 to vector<8x64xf32>
    %350 = arith.maximumf %348, %349 : vector<8x64xf32>
    %351 = arith.truncf %350 : vector<8x64xf32> to vector<8x64xbf16>
    %cst_126 = arith.constant dense<0.000000e+00> : vector<8x64xf32>
    %352 = tpu.matmul %351, %3, %cst_126 {dimension_numbers = #tpu.dot_dimension_numbers<[1], [0], [0], [1], [0, 0, 1, 1], [], []>} : vector<8x64xbf16>, vector<64x64xbf16>, vector<8x64xf32> -> vector<8x64xf32>
    %353 = arith.addf %352, %13 : vector<8x64xf32>
    %cst_127 = arith.constant 2.000000e+00 : f32
    %354 = vector.broadcast %cst_127 : f32 to vector<8x64xf32>
    %355 = arith.mulf %354, %322 : vector<8x64xf32>
    %356 = arith.addf %308, %355 : vector<8x64xf32>
    %cst_128 = arith.constant 2.000000e+00 : f32
    %357 = vector.broadcast %cst_128 : f32 to vector<8x64xf32>
    %358 = arith.mulf %357, %336 : vector<8x64xf32>
    %359 = arith.addf %356, %358 : vector<8x64xf32>
    %360 = arith.addf %359, %350 : vector<8x64xf32>
    %361 = arith.addf %290, %360 : vector<8x64xf32>
    %cst_129 = arith.constant 2.000000e+00 : f32
    %362 = vector.broadcast %cst_129 : f32 to vector<8x64xf32>
    %363 = arith.mulf %362, %325 : vector<8x64xf32>
    %364 = arith.addf %311, %363 : vector<8x64xf32>
    %cst_130 = arith.constant 2.000000e+00 : f32
    %365 = vector.broadcast %cst_130 : f32 to vector<8x64xf32>
    %366 = arith.mulf %365, %339 : vector<8x64xf32>
    %367 = arith.addf %364, %366 : vector<8x64xf32>
    %368 = arith.addf %367, %353 : vector<8x64xf32>
    %cst_131 = arith.constant 0.0166666675 : f32
    %369 = vector.broadcast %cst_131 : f32 to vector<8x64xf32>
    %370 = arith.mulf %369, %368 : vector<8x64xf32>
    %371 = arith.addf %300, %370 : vector<8x64xf32>
    %c5_i32 = arith.constant 5 : i32
    %372 = arith.addf %371, %7 : vector<8x64xf32>
    %cst_132 = arith.constant 0.000000e+00 : f32
    %373 = vector.broadcast %cst_132 : f32 to vector<8x64xf32>
    %374 = arith.maximumf %372, %373 : vector<8x64xf32>
    %375 = arith.truncf %374 : vector<8x64xf32> to vector<8x64xbf16>
    %cst_133 = arith.constant dense<0.000000e+00> : vector<8x64xf32>
    %376 = tpu.matmul %375, %1, %cst_133 {dimension_numbers = #tpu.dot_dimension_numbers<[1], [0], [0], [1], [0, 0, 1, 1], [], []>} : vector<8x64xbf16>, vector<64x64xbf16>, vector<8x64xf32> -> vector<8x64xf32>
    %377 = arith.addf %376, %10 : vector<8x64xf32>
    %cst_134 = arith.constant 0.000000e+00 : f32
    %378 = vector.broadcast %cst_134 : f32 to vector<8x64xf32>
    %379 = arith.maximumf %377, %378 : vector<8x64xf32>
    %380 = arith.truncf %379 : vector<8x64xf32> to vector<8x64xbf16>
    %cst_135 = arith.constant dense<0.000000e+00> : vector<8x64xf32>
    %381 = tpu.matmul %380, %3, %cst_135 {dimension_numbers = #tpu.dot_dimension_numbers<[1], [0], [0], [1], [0, 0, 1, 1], [], []>} : vector<8x64xbf16>, vector<64x64xbf16>, vector<8x64xf32> -> vector<8x64xf32>
    %382 = arith.addf %381, %13 : vector<8x64xf32>
    %cst_136 = arith.constant 5.000000e-02 : f32
    %383 = vector.broadcast %cst_136 : f32 to vector<8x64xf32>
    %384 = arith.mulf %383, %382 : vector<8x64xf32>
    %385 = arith.addf %371, %384 : vector<8x64xf32>
    %386 = arith.addf %385, %7 : vector<8x64xf32>
    %cst_137 = arith.constant 0.000000e+00 : f32
    %387 = vector.broadcast %cst_137 : f32 to vector<8x64xf32>
    %388 = arith.maximumf %386, %387 : vector<8x64xf32>
    %389 = arith.truncf %388 : vector<8x64xf32> to vector<8x64xbf16>
    %cst_138 = arith.constant dense<0.000000e+00> : vector<8x64xf32>
    %390 = tpu.matmul %389, %1, %cst_138 {dimension_numbers = #tpu.dot_dimension_numbers<[1], [0], [0], [1], [0, 0, 1, 1], [], []>} : vector<8x64xbf16>, vector<64x64xbf16>, vector<8x64xf32> -> vector<8x64xf32>
    %391 = arith.addf %390, %10 : vector<8x64xf32>
    %cst_139 = arith.constant 0.000000e+00 : f32
    %392 = vector.broadcast %cst_139 : f32 to vector<8x64xf32>
    %393 = arith.maximumf %391, %392 : vector<8x64xf32>
    %394 = arith.truncf %393 : vector<8x64xf32> to vector<8x64xbf16>
    %cst_140 = arith.constant dense<0.000000e+00> : vector<8x64xf32>
    %395 = tpu.matmul %394, %3, %cst_140 {dimension_numbers = #tpu.dot_dimension_numbers<[1], [0], [0], [1], [0, 0, 1, 1], [], []>} : vector<8x64xbf16>, vector<64x64xbf16>, vector<8x64xf32> -> vector<8x64xf32>
    %396 = arith.addf %395, %13 : vector<8x64xf32>
    %cst_141 = arith.constant 5.000000e-02 : f32
    %397 = vector.broadcast %cst_141 : f32 to vector<8x64xf32>
    %398 = arith.mulf %397, %396 : vector<8x64xf32>
    %399 = arith.addf %371, %398 : vector<8x64xf32>
    %400 = arith.addf %399, %7 : vector<8x64xf32>
    %cst_142 = arith.constant 0.000000e+00 : f32
    %401 = vector.broadcast %cst_142 : f32 to vector<8x64xf32>
    %402 = arith.maximumf %400, %401 : vector<8x64xf32>
    %403 = arith.truncf %402 : vector<8x64xf32> to vector<8x64xbf16>
    %cst_143 = arith.constant dense<0.000000e+00> : vector<8x64xf32>
    %404 = tpu.matmul %403, %1, %cst_143 {dimension_numbers = #tpu.dot_dimension_numbers<[1], [0], [0], [1], [0, 0, 1, 1], [], []>} : vector<8x64xbf16>, vector<64x64xbf16>, vector<8x64xf32> -> vector<8x64xf32>
    %405 = arith.addf %404, %10 : vector<8x64xf32>
    %cst_144 = arith.constant 0.000000e+00 : f32
    %406 = vector.broadcast %cst_144 : f32 to vector<8x64xf32>
    %407 = arith.maximumf %405, %406 : vector<8x64xf32>
    %408 = arith.truncf %407 : vector<8x64xf32> to vector<8x64xbf16>
    %cst_145 = arith.constant dense<0.000000e+00> : vector<8x64xf32>
    %409 = tpu.matmul %408, %3, %cst_145 {dimension_numbers = #tpu.dot_dimension_numbers<[1], [0], [0], [1], [0, 0, 1, 1], [], []>} : vector<8x64xbf16>, vector<64x64xbf16>, vector<8x64xf32> -> vector<8x64xf32>
    %410 = arith.addf %409, %13 : vector<8x64xf32>
    %cst_146 = arith.constant 1.000000e-01 : f32
    %411 = vector.broadcast %cst_146 : f32 to vector<8x64xf32>
    %412 = arith.mulf %411, %410 : vector<8x64xf32>
    %413 = arith.addf %371, %412 : vector<8x64xf32>
    %414 = arith.addf %413, %7 : vector<8x64xf32>
    %cst_147 = arith.constant 0.000000e+00 : f32
    %415 = vector.broadcast %cst_147 : f32 to vector<8x64xf32>
    %416 = arith.maximumf %414, %415 : vector<8x64xf32>
    %417 = arith.truncf %416 : vector<8x64xf32> to vector<8x64xbf16>
    %cst_148 = arith.constant dense<0.000000e+00> : vector<8x64xf32>
    %418 = tpu.matmul %417, %1, %cst_148 {dimension_numbers = #tpu.dot_dimension_numbers<[1], [0], [0], [1], [0, 0, 1, 1], [], []>} : vector<8x64xbf16>, vector<64x64xbf16>, vector<8x64xf32> -> vector<8x64xf32>
    %419 = arith.addf %418, %10 : vector<8x64xf32>
    %cst_149 = arith.constant 0.000000e+00 : f32
    %420 = vector.broadcast %cst_149 : f32 to vector<8x64xf32>
    %421 = arith.maximumf %419, %420 : vector<8x64xf32>
    %422 = arith.truncf %421 : vector<8x64xf32> to vector<8x64xbf16>
    %cst_150 = arith.constant dense<0.000000e+00> : vector<8x64xf32>
    %423 = tpu.matmul %422, %3, %cst_150 {dimension_numbers = #tpu.dot_dimension_numbers<[1], [0], [0], [1], [0, 0, 1, 1], [], []>} : vector<8x64xbf16>, vector<64x64xbf16>, vector<8x64xf32> -> vector<8x64xf32>
    %424 = arith.addf %423, %13 : vector<8x64xf32>
    %cst_151 = arith.constant 2.000000e+00 : f32
    %425 = vector.broadcast %cst_151 : f32 to vector<8x64xf32>
    %426 = arith.mulf %425, %393 : vector<8x64xf32>
    %427 = arith.addf %379, %426 : vector<8x64xf32>
    %cst_152 = arith.constant 2.000000e+00 : f32
    %428 = vector.broadcast %cst_152 : f32 to vector<8x64xf32>
    %429 = arith.mulf %428, %407 : vector<8x64xf32>
    %430 = arith.addf %427, %429 : vector<8x64xf32>
    %431 = arith.addf %430, %421 : vector<8x64xf32>
    %432 = arith.addf %361, %431 : vector<8x64xf32>
    %cst_153 = arith.constant 2.000000e+00 : f32
    %433 = vector.broadcast %cst_153 : f32 to vector<8x64xf32>
    %434 = arith.mulf %433, %396 : vector<8x64xf32>
    %435 = arith.addf %382, %434 : vector<8x64xf32>
    %cst_154 = arith.constant 2.000000e+00 : f32
    %436 = vector.broadcast %cst_154 : f32 to vector<8x64xf32>
    %437 = arith.mulf %436, %410 : vector<8x64xf32>
    %438 = arith.addf %435, %437 : vector<8x64xf32>
    %439 = arith.addf %438, %424 : vector<8x64xf32>
    %cst_155 = arith.constant 0.0166666675 : f32
    %440 = vector.broadcast %cst_155 : f32 to vector<8x64xf32>
    %441 = arith.mulf %440, %439 : vector<8x64xf32>
    %442 = arith.addf %371, %441 : vector<8x64xf32>
    %c6_i32 = arith.constant 6 : i32
    %443 = arith.addf %442, %7 : vector<8x64xf32>
    %cst_156 = arith.constant 0.000000e+00 : f32
    %444 = vector.broadcast %cst_156 : f32 to vector<8x64xf32>
    %445 = arith.maximumf %443, %444 : vector<8x64xf32>
    %446 = arith.truncf %445 : vector<8x64xf32> to vector<8x64xbf16>
    %cst_157 = arith.constant dense<0.000000e+00> : vector<8x64xf32>
    %447 = tpu.matmul %446, %1, %cst_157 {dimension_numbers = #tpu.dot_dimension_numbers<[1], [0], [0], [1], [0, 0, 1, 1], [], []>} : vector<8x64xbf16>, vector<64x64xbf16>, vector<8x64xf32> -> vector<8x64xf32>
    %448 = arith.addf %447, %10 : vector<8x64xf32>
    %cst_158 = arith.constant 0.000000e+00 : f32
    %449 = vector.broadcast %cst_158 : f32 to vector<8x64xf32>
    %450 = arith.maximumf %448, %449 : vector<8x64xf32>
    %451 = arith.truncf %450 : vector<8x64xf32> to vector<8x64xbf16>
    %cst_159 = arith.constant dense<0.000000e+00> : vector<8x64xf32>
    %452 = tpu.matmul %451, %3, %cst_159 {dimension_numbers = #tpu.dot_dimension_numbers<[1], [0], [0], [1], [0, 0, 1, 1], [], []>} : vector<8x64xbf16>, vector<64x64xbf16>, vector<8x64xf32> -> vector<8x64xf32>
    %453 = arith.addf %452, %13 : vector<8x64xf32>
    %cst_160 = arith.constant 5.000000e-02 : f32
    %454 = vector.broadcast %cst_160 : f32 to vector<8x64xf32>
    %455 = arith.mulf %454, %453 : vector<8x64xf32>
    %456 = arith.addf %442, %455 : vector<8x64xf32>
    %457 = arith.addf %456, %7 : vector<8x64xf32>
    %cst_161 = arith.constant 0.000000e+00 : f32
    %458 = vector.broadcast %cst_161 : f32 to vector<8x64xf32>
    %459 = arith.maximumf %457, %458 : vector<8x64xf32>
    %460 = arith.truncf %459 : vector<8x64xf32> to vector<8x64xbf16>
    %cst_162 = arith.constant dense<0.000000e+00> : vector<8x64xf32>
    %461 = tpu.matmul %460, %1, %cst_162 {dimension_numbers = #tpu.dot_dimension_numbers<[1], [0], [0], [1], [0, 0, 1, 1], [], []>} : vector<8x64xbf16>, vector<64x64xbf16>, vector<8x64xf32> -> vector<8x64xf32>
    %462 = arith.addf %461, %10 : vector<8x64xf32>
    %cst_163 = arith.constant 0.000000e+00 : f32
    %463 = vector.broadcast %cst_163 : f32 to vector<8x64xf32>
    %464 = arith.maximumf %462, %463 : vector<8x64xf32>
    %465 = arith.truncf %464 : vector<8x64xf32> to vector<8x64xbf16>
    %cst_164 = arith.constant dense<0.000000e+00> : vector<8x64xf32>
    %466 = tpu.matmul %465, %3, %cst_164 {dimension_numbers = #tpu.dot_dimension_numbers<[1], [0], [0], [1], [0, 0, 1, 1], [], []>} : vector<8x64xbf16>, vector<64x64xbf16>, vector<8x64xf32> -> vector<8x64xf32>
    %467 = arith.addf %466, %13 : vector<8x64xf32>
    %cst_165 = arith.constant 5.000000e-02 : f32
    %468 = vector.broadcast %cst_165 : f32 to vector<8x64xf32>
    %469 = arith.mulf %468, %467 : vector<8x64xf32>
    %470 = arith.addf %442, %469 : vector<8x64xf32>
    %471 = arith.addf %470, %7 : vector<8x64xf32>
    %cst_166 = arith.constant 0.000000e+00 : f32
    %472 = vector.broadcast %cst_166 : f32 to vector<8x64xf32>
    %473 = arith.maximumf %471, %472 : vector<8x64xf32>
    %474 = arith.truncf %473 : vector<8x64xf32> to vector<8x64xbf16>
    %cst_167 = arith.constant dense<0.000000e+00> : vector<8x64xf32>
    %475 = tpu.matmul %474, %1, %cst_167 {dimension_numbers = #tpu.dot_dimension_numbers<[1], [0], [0], [1], [0, 0, 1, 1], [], []>} : vector<8x64xbf16>, vector<64x64xbf16>, vector<8x64xf32> -> vector<8x64xf32>
    %476 = arith.addf %475, %10 : vector<8x64xf32>
    %cst_168 = arith.constant 0.000000e+00 : f32
    %477 = vector.broadcast %cst_168 : f32 to vector<8x64xf32>
    %478 = arith.maximumf %476, %477 : vector<8x64xf32>
    %479 = arith.truncf %478 : vector<8x64xf32> to vector<8x64xbf16>
    %cst_169 = arith.constant dense<0.000000e+00> : vector<8x64xf32>
    %480 = tpu.matmul %479, %3, %cst_169 {dimension_numbers = #tpu.dot_dimension_numbers<[1], [0], [0], [1], [0, 0, 1, 1], [], []>} : vector<8x64xbf16>, vector<64x64xbf16>, vector<8x64xf32> -> vector<8x64xf32>
    %481 = arith.addf %480, %13 : vector<8x64xf32>
    %cst_170 = arith.constant 1.000000e-01 : f32
    %482 = vector.broadcast %cst_170 : f32 to vector<8x64xf32>
    %483 = arith.mulf %482, %481 : vector<8x64xf32>
    %484 = arith.addf %442, %483 : vector<8x64xf32>
    %485 = arith.addf %484, %7 : vector<8x64xf32>
    %cst_171 = arith.constant 0.000000e+00 : f32
    %486 = vector.broadcast %cst_171 : f32 to vector<8x64xf32>
    %487 = arith.maximumf %485, %486 : vector<8x64xf32>
    %488 = arith.truncf %487 : vector<8x64xf32> to vector<8x64xbf16>
    %cst_172 = arith.constant dense<0.000000e+00> : vector<8x64xf32>
    %489 = tpu.matmul %488, %1, %cst_172 {dimension_numbers = #tpu.dot_dimension_numbers<[1], [0], [0], [1], [0, 0, 1, 1], [], []>} : vector<8x64xbf16>, vector<64x64xbf16>, vector<8x64xf32> -> vector<8x64xf32>
    %490 = arith.addf %489, %10 : vector<8x64xf32>
    %cst_173 = arith.constant 0.000000e+00 : f32
    %491 = vector.broadcast %cst_173 : f32 to vector<8x64xf32>
    %492 = arith.maximumf %490, %491 : vector<8x64xf32>
    %493 = arith.truncf %492 : vector<8x64xf32> to vector<8x64xbf16>
    %cst_174 = arith.constant dense<0.000000e+00> : vector<8x64xf32>
    %494 = tpu.matmul %493, %3, %cst_174 {dimension_numbers = #tpu.dot_dimension_numbers<[1], [0], [0], [1], [0, 0, 1, 1], [], []>} : vector<8x64xbf16>, vector<64x64xbf16>, vector<8x64xf32> -> vector<8x64xf32>
    %495 = arith.addf %494, %13 : vector<8x64xf32>
    %cst_175 = arith.constant 2.000000e+00 : f32
    %496 = vector.broadcast %cst_175 : f32 to vector<8x64xf32>
    %497 = arith.mulf %496, %464 : vector<8x64xf32>
    %498 = arith.addf %450, %497 : vector<8x64xf32>
    %cst_176 = arith.constant 2.000000e+00 : f32
    %499 = vector.broadcast %cst_176 : f32 to vector<8x64xf32>
    %500 = arith.mulf %499, %478 : vector<8x64xf32>
    %501 = arith.addf %498, %500 : vector<8x64xf32>
    %502 = arith.addf %501, %492 : vector<8x64xf32>
    %503 = arith.addf %432, %502 : vector<8x64xf32>
    %cst_177 = arith.constant 2.000000e+00 : f32
    %504 = vector.broadcast %cst_177 : f32 to vector<8x64xf32>
    %505 = arith.mulf %504, %467 : vector<8x64xf32>
    %506 = arith.addf %453, %505 : vector<8x64xf32>
    %cst_178 = arith.constant 2.000000e+00 : f32
    %507 = vector.broadcast %cst_178 : f32 to vector<8x64xf32>
    %508 = arith.mulf %507, %481 : vector<8x64xf32>
    %509 = arith.addf %506, %508 : vector<8x64xf32>
    %510 = arith.addf %509, %495 : vector<8x64xf32>
    %cst_179 = arith.constant 0.0166666675 : f32
    %511 = vector.broadcast %cst_179 : f32 to vector<8x64xf32>
    %512 = arith.mulf %511, %510 : vector<8x64xf32>
    %513 = arith.addf %442, %512 : vector<8x64xf32>
    %c7_i32 = arith.constant 7 : i32
    %514 = arith.addf %513, %7 : vector<8x64xf32>
    %cst_180 = arith.constant 0.000000e+00 : f32
    %515 = vector.broadcast %cst_180 : f32 to vector<8x64xf32>
    %516 = arith.maximumf %514, %515 : vector<8x64xf32>
    %517 = arith.truncf %516 : vector<8x64xf32> to vector<8x64xbf16>
    %cst_181 = arith.constant dense<0.000000e+00> : vector<8x64xf32>
    %518 = tpu.matmul %517, %1, %cst_181 {dimension_numbers = #tpu.dot_dimension_numbers<[1], [0], [0], [1], [0, 0, 1, 1], [], []>} : vector<8x64xbf16>, vector<64x64xbf16>, vector<8x64xf32> -> vector<8x64xf32>
    %519 = arith.addf %518, %10 : vector<8x64xf32>
    %cst_182 = arith.constant 0.000000e+00 : f32
    %520 = vector.broadcast %cst_182 : f32 to vector<8x64xf32>
    %521 = arith.maximumf %519, %520 : vector<8x64xf32>
    %522 = arith.truncf %521 : vector<8x64xf32> to vector<8x64xbf16>
    %cst_183 = arith.constant dense<0.000000e+00> : vector<8x64xf32>
    %523 = tpu.matmul %522, %3, %cst_183 {dimension_numbers = #tpu.dot_dimension_numbers<[1], [0], [0], [1], [0, 0, 1, 1], [], []>} : vector<8x64xbf16>, vector<64x64xbf16>, vector<8x64xf32> -> vector<8x64xf32>
    %524 = arith.addf %523, %13 : vector<8x64xf32>
    %cst_184 = arith.constant 5.000000e-02 : f32
    %525 = vector.broadcast %cst_184 : f32 to vector<8x64xf32>
    %526 = arith.mulf %525, %524 : vector<8x64xf32>
    %527 = arith.addf %513, %526 : vector<8x64xf32>
    %528 = arith.addf %527, %7 : vector<8x64xf32>
    %cst_185 = arith.constant 0.000000e+00 : f32
    %529 = vector.broadcast %cst_185 : f32 to vector<8x64xf32>
    %530 = arith.maximumf %528, %529 : vector<8x64xf32>
    %531 = arith.truncf %530 : vector<8x64xf32> to vector<8x64xbf16>
    %cst_186 = arith.constant dense<0.000000e+00> : vector<8x64xf32>
    %532 = tpu.matmul %531, %1, %cst_186 {dimension_numbers = #tpu.dot_dimension_numbers<[1], [0], [0], [1], [0, 0, 1, 1], [], []>} : vector<8x64xbf16>, vector<64x64xbf16>, vector<8x64xf32> -> vector<8x64xf32>
    %533 = arith.addf %532, %10 : vector<8x64xf32>
    %cst_187 = arith.constant 0.000000e+00 : f32
    %534 = vector.broadcast %cst_187 : f32 to vector<8x64xf32>
    %535 = arith.maximumf %533, %534 : vector<8x64xf32>
    %536 = arith.truncf %535 : vector<8x64xf32> to vector<8x64xbf16>
    %cst_188 = arith.constant dense<0.000000e+00> : vector<8x64xf32>
    %537 = tpu.matmul %536, %3, %cst_188 {dimension_numbers = #tpu.dot_dimension_numbers<[1], [0], [0], [1], [0, 0, 1, 1], [], []>} : vector<8x64xbf16>, vector<64x64xbf16>, vector<8x64xf32> -> vector<8x64xf32>
    %538 = arith.addf %537, %13 : vector<8x64xf32>
    %cst_189 = arith.constant 5.000000e-02 : f32
    %539 = vector.broadcast %cst_189 : f32 to vector<8x64xf32>
    %540 = arith.mulf %539, %538 : vector<8x64xf32>
    %541 = arith.addf %513, %540 : vector<8x64xf32>
    %542 = arith.addf %541, %7 : vector<8x64xf32>
    %cst_190 = arith.constant 0.000000e+00 : f32
    %543 = vector.broadcast %cst_190 : f32 to vector<8x64xf32>
    %544 = arith.maximumf %542, %543 : vector<8x64xf32>
    %545 = arith.truncf %544 : vector<8x64xf32> to vector<8x64xbf16>
    %cst_191 = arith.constant dense<0.000000e+00> : vector<8x64xf32>
    %546 = tpu.matmul %545, %1, %cst_191 {dimension_numbers = #tpu.dot_dimension_numbers<[1], [0], [0], [1], [0, 0, 1, 1], [], []>} : vector<8x64xbf16>, vector<64x64xbf16>, vector<8x64xf32> -> vector<8x64xf32>
    %547 = arith.addf %546, %10 : vector<8x64xf32>
    %cst_192 = arith.constant 0.000000e+00 : f32
    %548 = vector.broadcast %cst_192 : f32 to vector<8x64xf32>
    %549 = arith.maximumf %547, %548 : vector<8x64xf32>
    %550 = arith.truncf %549 : vector<8x64xf32> to vector<8x64xbf16>
    %cst_193 = arith.constant dense<0.000000e+00> : vector<8x64xf32>
    %551 = tpu.matmul %550, %3, %cst_193 {dimension_numbers = #tpu.dot_dimension_numbers<[1], [0], [0], [1], [0, 0, 1, 1], [], []>} : vector<8x64xbf16>, vector<64x64xbf16>, vector<8x64xf32> -> vector<8x64xf32>
    %552 = arith.addf %551, %13 : vector<8x64xf32>
    %cst_194 = arith.constant 1.000000e-01 : f32
    %553 = vector.broadcast %cst_194 : f32 to vector<8x64xf32>
    %554 = arith.mulf %553, %552 : vector<8x64xf32>
    %555 = arith.addf %513, %554 : vector<8x64xf32>
    %556 = arith.addf %555, %7 : vector<8x64xf32>
    %cst_195 = arith.constant 0.000000e+00 : f32
    %557 = vector.broadcast %cst_195 : f32 to vector<8x64xf32>
    %558 = arith.maximumf %556, %557 : vector<8x64xf32>
    %559 = arith.truncf %558 : vector<8x64xf32> to vector<8x64xbf16>
    %cst_196 = arith.constant dense<0.000000e+00> : vector<8x64xf32>
    %560 = tpu.matmul %559, %1, %cst_196 {dimension_numbers = #tpu.dot_dimension_numbers<[1], [0], [0], [1], [0, 0, 1, 1], [], []>} : vector<8x64xbf16>, vector<64x64xbf16>, vector<8x64xf32> -> vector<8x64xf32>
    %561 = arith.addf %560, %10 : vector<8x64xf32>
    %cst_197 = arith.constant 0.000000e+00 : f32
    %562 = vector.broadcast %cst_197 : f32 to vector<8x64xf32>
    %563 = arith.maximumf %561, %562 : vector<8x64xf32>
    %564 = arith.truncf %563 : vector<8x64xf32> to vector<8x64xbf16>
    %cst_198 = arith.constant dense<0.000000e+00> : vector<8x64xf32>
    %565 = tpu.matmul %564, %3, %cst_198 {dimension_numbers = #tpu.dot_dimension_numbers<[1], [0], [0], [1], [0, 0, 1, 1], [], []>} : vector<8x64xbf16>, vector<64x64xbf16>, vector<8x64xf32> -> vector<8x64xf32>
    %566 = arith.addf %565, %13 : vector<8x64xf32>
    %cst_199 = arith.constant 2.000000e+00 : f32
    %567 = vector.broadcast %cst_199 : f32 to vector<8x64xf32>
    %568 = arith.mulf %567, %535 : vector<8x64xf32>
    %569 = arith.addf %521, %568 : vector<8x64xf32>
    %cst_200 = arith.constant 2.000000e+00 : f32
    %570 = vector.broadcast %cst_200 : f32 to vector<8x64xf32>
    %571 = arith.mulf %570, %549 : vector<8x64xf32>
    %572 = arith.addf %569, %571 : vector<8x64xf32>
    %573 = arith.addf %572, %563 : vector<8x64xf32>
    %574 = arith.addf %503, %573 : vector<8x64xf32>
    %cst_201 = arith.constant 2.000000e+00 : f32
    %575 = vector.broadcast %cst_201 : f32 to vector<8x64xf32>
    %576 = arith.mulf %575, %538 : vector<8x64xf32>
    %577 = arith.addf %524, %576 : vector<8x64xf32>
    %cst_202 = arith.constant 2.000000e+00 : f32
    %578 = vector.broadcast %cst_202 : f32 to vector<8x64xf32>
    %579 = arith.mulf %578, %552 : vector<8x64xf32>
    %580 = arith.addf %577, %579 : vector<8x64xf32>
    %581 = arith.addf %580, %566 : vector<8x64xf32>
    %cst_203 = arith.constant 0.0166666675 : f32
    %582 = vector.broadcast %cst_203 : f32 to vector<8x64xf32>
    %583 = arith.mulf %582, %581 : vector<8x64xf32>
    %584 = arith.addf %513, %583 : vector<8x64xf32>
    %c8_i32 = arith.constant 8 : i32
    %585 = arith.addf %584, %7 : vector<8x64xf32>
    %cst_204 = arith.constant 0.000000e+00 : f32
    %586 = vector.broadcast %cst_204 : f32 to vector<8x64xf32>
    %587 = arith.maximumf %585, %586 : vector<8x64xf32>
    %588 = arith.truncf %587 : vector<8x64xf32> to vector<8x64xbf16>
    %cst_205 = arith.constant dense<0.000000e+00> : vector<8x64xf32>
    %589 = tpu.matmul %588, %1, %cst_205 {dimension_numbers = #tpu.dot_dimension_numbers<[1], [0], [0], [1], [0, 0, 1, 1], [], []>} : vector<8x64xbf16>, vector<64x64xbf16>, vector<8x64xf32> -> vector<8x64xf32>
    %590 = arith.addf %589, %10 : vector<8x64xf32>
    %cst_206 = arith.constant 0.000000e+00 : f32
    %591 = vector.broadcast %cst_206 : f32 to vector<8x64xf32>
    %592 = arith.maximumf %590, %591 : vector<8x64xf32>
    %593 = arith.truncf %592 : vector<8x64xf32> to vector<8x64xbf16>
    %cst_207 = arith.constant dense<0.000000e+00> : vector<8x64xf32>
    %594 = tpu.matmul %593, %3, %cst_207 {dimension_numbers = #tpu.dot_dimension_numbers<[1], [0], [0], [1], [0, 0, 1, 1], [], []>} : vector<8x64xbf16>, vector<64x64xbf16>, vector<8x64xf32> -> vector<8x64xf32>
    %595 = arith.addf %594, %13 : vector<8x64xf32>
    %cst_208 = arith.constant 5.000000e-02 : f32
    %596 = vector.broadcast %cst_208 : f32 to vector<8x64xf32>
    %597 = arith.mulf %596, %595 : vector<8x64xf32>
    %598 = arith.addf %584, %597 : vector<8x64xf32>
    %599 = arith.addf %598, %7 : vector<8x64xf32>
    %cst_209 = arith.constant 0.000000e+00 : f32
    %600 = vector.broadcast %cst_209 : f32 to vector<8x64xf32>
    %601 = arith.maximumf %599, %600 : vector<8x64xf32>
    %602 = arith.truncf %601 : vector<8x64xf32> to vector<8x64xbf16>
    %cst_210 = arith.constant dense<0.000000e+00> : vector<8x64xf32>
    %603 = tpu.matmul %602, %1, %cst_210 {dimension_numbers = #tpu.dot_dimension_numbers<[1], [0], [0], [1], [0, 0, 1, 1], [], []>} : vector<8x64xbf16>, vector<64x64xbf16>, vector<8x64xf32> -> vector<8x64xf32>
    %604 = arith.addf %603, %10 : vector<8x64xf32>
    %cst_211 = arith.constant 0.000000e+00 : f32
    %605 = vector.broadcast %cst_211 : f32 to vector<8x64xf32>
    %606 = arith.maximumf %604, %605 : vector<8x64xf32>
    %607 = arith.truncf %606 : vector<8x64xf32> to vector<8x64xbf16>
    %cst_212 = arith.constant dense<0.000000e+00> : vector<8x64xf32>
    %608 = tpu.matmul %607, %3, %cst_212 {dimension_numbers = #tpu.dot_dimension_numbers<[1], [0], [0], [1], [0, 0, 1, 1], [], []>} : vector<8x64xbf16>, vector<64x64xbf16>, vector<8x64xf32> -> vector<8x64xf32>
    %609 = arith.addf %608, %13 : vector<8x64xf32>
    %cst_213 = arith.constant 5.000000e-02 : f32
    %610 = vector.broadcast %cst_213 : f32 to vector<8x64xf32>
    %611 = arith.mulf %610, %609 : vector<8x64xf32>
    %612 = arith.addf %584, %611 : vector<8x64xf32>
    %613 = arith.addf %612, %7 : vector<8x64xf32>
    %cst_214 = arith.constant 0.000000e+00 : f32
    %614 = vector.broadcast %cst_214 : f32 to vector<8x64xf32>
    %615 = arith.maximumf %613, %614 : vector<8x64xf32>
    %616 = arith.truncf %615 : vector<8x64xf32> to vector<8x64xbf16>
    %cst_215 = arith.constant dense<0.000000e+00> : vector<8x64xf32>
    %617 = tpu.matmul %616, %1, %cst_215 {dimension_numbers = #tpu.dot_dimension_numbers<[1], [0], [0], [1], [0, 0, 1, 1], [], []>} : vector<8x64xbf16>, vector<64x64xbf16>, vector<8x64xf32> -> vector<8x64xf32>
    %618 = arith.addf %617, %10 : vector<8x64xf32>
    %cst_216 = arith.constant 0.000000e+00 : f32
    %619 = vector.broadcast %cst_216 : f32 to vector<8x64xf32>
    %620 = arith.maximumf %618, %619 : vector<8x64xf32>
    %621 = arith.truncf %620 : vector<8x64xf32> to vector<8x64xbf16>
    %cst_217 = arith.constant dense<0.000000e+00> : vector<8x64xf32>
    %622 = tpu.matmul %621, %3, %cst_217 {dimension_numbers = #tpu.dot_dimension_numbers<[1], [0], [0], [1], [0, 0, 1, 1], [], []>} : vector<8x64xbf16>, vector<64x64xbf16>, vector<8x64xf32> -> vector<8x64xf32>
    %623 = arith.addf %622, %13 : vector<8x64xf32>
    %cst_218 = arith.constant 1.000000e-01 : f32
    %624 = vector.broadcast %cst_218 : f32 to vector<8x64xf32>
    %625 = arith.mulf %624, %623 : vector<8x64xf32>
    %626 = arith.addf %584, %625 : vector<8x64xf32>
    %627 = arith.addf %626, %7 : vector<8x64xf32>
    %cst_219 = arith.constant 0.000000e+00 : f32
    %628 = vector.broadcast %cst_219 : f32 to vector<8x64xf32>
    %629 = arith.maximumf %627, %628 : vector<8x64xf32>
    %630 = arith.truncf %629 : vector<8x64xf32> to vector<8x64xbf16>
    %cst_220 = arith.constant dense<0.000000e+00> : vector<8x64xf32>
    %631 = tpu.matmul %630, %1, %cst_220 {dimension_numbers = #tpu.dot_dimension_numbers<[1], [0], [0], [1], [0, 0, 1, 1], [], []>} : vector<8x64xbf16>, vector<64x64xbf16>, vector<8x64xf32> -> vector<8x64xf32>
    %632 = arith.addf %631, %10 : vector<8x64xf32>
    %cst_221 = arith.constant 0.000000e+00 : f32
    %633 = vector.broadcast %cst_221 : f32 to vector<8x64xf32>
    %634 = arith.maximumf %632, %633 : vector<8x64xf32>
    %635 = arith.truncf %634 : vector<8x64xf32> to vector<8x64xbf16>
    %cst_222 = arith.constant dense<0.000000e+00> : vector<8x64xf32>
    %636 = tpu.matmul %635, %3, %cst_222 {dimension_numbers = #tpu.dot_dimension_numbers<[1], [0], [0], [1], [0, 0, 1, 1], [], []>} : vector<8x64xbf16>, vector<64x64xbf16>, vector<8x64xf32> -> vector<8x64xf32>
    %637 = arith.addf %636, %13 : vector<8x64xf32>
    %cst_223 = arith.constant 2.000000e+00 : f32
    %638 = vector.broadcast %cst_223 : f32 to vector<8x64xf32>
    %639 = arith.mulf %638, %606 : vector<8x64xf32>
    %640 = arith.addf %592, %639 : vector<8x64xf32>
    %cst_224 = arith.constant 2.000000e+00 : f32
    %641 = vector.broadcast %cst_224 : f32 to vector<8x64xf32>
    %642 = arith.mulf %641, %620 : vector<8x64xf32>
    %643 = arith.addf %640, %642 : vector<8x64xf32>
    %644 = arith.addf %643, %634 : vector<8x64xf32>
    %645 = arith.addf %574, %644 : vector<8x64xf32>
    %cst_225 = arith.constant 2.000000e+00 : f32
    %646 = vector.broadcast %cst_225 : f32 to vector<8x64xf32>
    %647 = arith.mulf %646, %609 : vector<8x64xf32>
    %648 = arith.addf %595, %647 : vector<8x64xf32>
    %cst_226 = arith.constant 2.000000e+00 : f32
    %649 = vector.broadcast %cst_226 : f32 to vector<8x64xf32>
    %650 = arith.mulf %649, %623 : vector<8x64xf32>
    %651 = arith.addf %648, %650 : vector<8x64xf32>
    %652 = arith.addf %651, %637 : vector<8x64xf32>
    %cst_227 = arith.constant 0.0166666675 : f32
    %653 = vector.broadcast %cst_227 : f32 to vector<8x64xf32>
    %654 = arith.mulf %653, %652 : vector<8x64xf32>
    %655 = arith.addf %584, %654 : vector<8x64xf32>
    %c9_i32 = arith.constant 9 : i32
    %656 = arith.addf %655, %7 : vector<8x64xf32>
    %cst_228 = arith.constant 0.000000e+00 : f32
    %657 = vector.broadcast %cst_228 : f32 to vector<8x64xf32>
    %658 = arith.maximumf %656, %657 : vector<8x64xf32>
    %659 = arith.truncf %658 : vector<8x64xf32> to vector<8x64xbf16>
    %cst_229 = arith.constant dense<0.000000e+00> : vector<8x64xf32>
    %660 = tpu.matmul %659, %1, %cst_229 {dimension_numbers = #tpu.dot_dimension_numbers<[1], [0], [0], [1], [0, 0, 1, 1], [], []>} : vector<8x64xbf16>, vector<64x64xbf16>, vector<8x64xf32> -> vector<8x64xf32>
    %661 = arith.addf %660, %10 : vector<8x64xf32>
    %cst_230 = arith.constant 0.000000e+00 : f32
    %662 = vector.broadcast %cst_230 : f32 to vector<8x64xf32>
    %663 = arith.maximumf %661, %662 : vector<8x64xf32>
    %664 = arith.truncf %663 : vector<8x64xf32> to vector<8x64xbf16>
    %cst_231 = arith.constant dense<0.000000e+00> : vector<8x64xf32>
    %665 = tpu.matmul %664, %3, %cst_231 {dimension_numbers = #tpu.dot_dimension_numbers<[1], [0], [0], [1], [0, 0, 1, 1], [], []>} : vector<8x64xbf16>, vector<64x64xbf16>, vector<8x64xf32> -> vector<8x64xf32>
    %666 = arith.addf %665, %13 : vector<8x64xf32>
    %cst_232 = arith.constant 5.000000e-02 : f32
    %667 = vector.broadcast %cst_232 : f32 to vector<8x64xf32>
    %668 = arith.mulf %667, %666 : vector<8x64xf32>
    %669 = arith.addf %655, %668 : vector<8x64xf32>
    %670 = arith.addf %669, %7 : vector<8x64xf32>
    %cst_233 = arith.constant 0.000000e+00 : f32
    %671 = vector.broadcast %cst_233 : f32 to vector<8x64xf32>
    %672 = arith.maximumf %670, %671 : vector<8x64xf32>
    %673 = arith.truncf %672 : vector<8x64xf32> to vector<8x64xbf16>
    %cst_234 = arith.constant dense<0.000000e+00> : vector<8x64xf32>
    %674 = tpu.matmul %673, %1, %cst_234 {dimension_numbers = #tpu.dot_dimension_numbers<[1], [0], [0], [1], [0, 0, 1, 1], [], []>} : vector<8x64xbf16>, vector<64x64xbf16>, vector<8x64xf32> -> vector<8x64xf32>
    %675 = arith.addf %674, %10 : vector<8x64xf32>
    %cst_235 = arith.constant 0.000000e+00 : f32
    %676 = vector.broadcast %cst_235 : f32 to vector<8x64xf32>
    %677 = arith.maximumf %675, %676 : vector<8x64xf32>
    %678 = arith.truncf %677 : vector<8x64xf32> to vector<8x64xbf16>
    %cst_236 = arith.constant dense<0.000000e+00> : vector<8x64xf32>
    %679 = tpu.matmul %678, %3, %cst_236 {dimension_numbers = #tpu.dot_dimension_numbers<[1], [0], [0], [1], [0, 0, 1, 1], [], []>} : vector<8x64xbf16>, vector<64x64xbf16>, vector<8x64xf32> -> vector<8x64xf32>
    %680 = arith.addf %679, %13 : vector<8x64xf32>
    %cst_237 = arith.constant 5.000000e-02 : f32
    %681 = vector.broadcast %cst_237 : f32 to vector<8x64xf32>
    %682 = arith.mulf %681, %680 : vector<8x64xf32>
    %683 = arith.addf %655, %682 : vector<8x64xf32>
    %684 = arith.addf %683, %7 : vector<8x64xf32>
    %cst_238 = arith.constant 0.000000e+00 : f32
    %685 = vector.broadcast %cst_238 : f32 to vector<8x64xf32>
    %686 = arith.maximumf %684, %685 : vector<8x64xf32>
    %687 = arith.truncf %686 : vector<8x64xf32> to vector<8x64xbf16>
    %cst_239 = arith.constant dense<0.000000e+00> : vector<8x64xf32>
    %688 = tpu.matmul %687, %1, %cst_239 {dimension_numbers = #tpu.dot_dimension_numbers<[1], [0], [0], [1], [0, 0, 1, 1], [], []>} : vector<8x64xbf16>, vector<64x64xbf16>, vector<8x64xf32> -> vector<8x64xf32>
    %689 = arith.addf %688, %10 : vector<8x64xf32>
    %cst_240 = arith.constant 0.000000e+00 : f32
    %690 = vector.broadcast %cst_240 : f32 to vector<8x64xf32>
    %691 = arith.maximumf %689, %690 : vector<8x64xf32>
    %692 = arith.truncf %691 : vector<8x64xf32> to vector<8x64xbf16>
    %cst_241 = arith.constant dense<0.000000e+00> : vector<8x64xf32>
    %693 = tpu.matmul %692, %3, %cst_241 {dimension_numbers = #tpu.dot_dimension_numbers<[1], [0], [0], [1], [0, 0, 1, 1], [], []>} : vector<8x64xbf16>, vector<64x64xbf16>, vector<8x64xf32> -> vector<8x64xf32>
    %694 = arith.addf %693, %13 : vector<8x64xf32>
    %cst_242 = arith.constant 1.000000e-01 : f32
    %695 = vector.broadcast %cst_242 : f32 to vector<8x64xf32>
    %696 = arith.mulf %695, %694 : vector<8x64xf32>
    %697 = arith.addf %655, %696 : vector<8x64xf32>
    %698 = arith.addf %697, %7 : vector<8x64xf32>
    %cst_243 = arith.constant 0.000000e+00 : f32
    %699 = vector.broadcast %cst_243 : f32 to vector<8x64xf32>
    %700 = arith.maximumf %698, %699 : vector<8x64xf32>
    %701 = arith.truncf %700 : vector<8x64xf32> to vector<8x64xbf16>
    %cst_244 = arith.constant dense<0.000000e+00> : vector<8x64xf32>
    %702 = tpu.matmul %701, %1, %cst_244 {dimension_numbers = #tpu.dot_dimension_numbers<[1], [0], [0], [1], [0, 0, 1, 1], [], []>} : vector<8x64xbf16>, vector<64x64xbf16>, vector<8x64xf32> -> vector<8x64xf32>
    %703 = arith.addf %702, %10 : vector<8x64xf32>
    %cst_245 = arith.constant 0.000000e+00 : f32
    %704 = vector.broadcast %cst_245 : f32 to vector<8x64xf32>
    %705 = arith.maximumf %703, %704 : vector<8x64xf32>
    %706 = arith.truncf %705 : vector<8x64xf32> to vector<8x64xbf16>
    %cst_246 = arith.constant dense<0.000000e+00> : vector<8x64xf32>
    %707 = tpu.matmul %706, %3, %cst_246 {dimension_numbers = #tpu.dot_dimension_numbers<[1], [0], [0], [1], [0, 0, 1, 1], [], []>} : vector<8x64xbf16>, vector<64x64xbf16>, vector<8x64xf32> -> vector<8x64xf32>
    %708 = arith.addf %707, %13 : vector<8x64xf32>
    %cst_247 = arith.constant 2.000000e+00 : f32
    %709 = vector.broadcast %cst_247 : f32 to vector<8x64xf32>
    %710 = arith.mulf %709, %677 : vector<8x64xf32>
    %711 = arith.addf %663, %710 : vector<8x64xf32>
    %cst_248 = arith.constant 2.000000e+00 : f32
    %712 = vector.broadcast %cst_248 : f32 to vector<8x64xf32>
    %713 = arith.mulf %712, %691 : vector<8x64xf32>
    %714 = arith.addf %711, %713 : vector<8x64xf32>
    %715 = arith.addf %714, %705 : vector<8x64xf32>
    %716 = arith.addf %645, %715 : vector<8x64xf32>
    %cst_249 = arith.constant 2.000000e+00 : f32
    %717 = vector.broadcast %cst_249 : f32 to vector<8x64xf32>
    %718 = arith.mulf %717, %680 : vector<8x64xf32>
    %719 = arith.addf %666, %718 : vector<8x64xf32>
    %cst_250 = arith.constant 2.000000e+00 : f32
    %720 = vector.broadcast %cst_250 : f32 to vector<8x64xf32>
    %721 = arith.mulf %720, %694 : vector<8x64xf32>
    %722 = arith.addf %719, %721 : vector<8x64xf32>
    %723 = arith.addf %722, %708 : vector<8x64xf32>
    %cst_251 = arith.constant 0.0166666675 : f32
    %724 = vector.broadcast %cst_251 : f32 to vector<8x64xf32>
    %725 = arith.mulf %724, %723 : vector<8x64xf32>
    %726 = arith.addf %655, %725 : vector<8x64xf32>
    %c0_252 = arith.constant 0 : index
    %c0_253 = arith.constant 0 : index
    %727 = vector.load %arg4[%c0_252, %c0_253] : memref<65x4xf32, #tpu.memory_space<vmem>>, vector<64x4xf32>
    %c64 = arith.constant 64 : index
    %c0_254 = arith.constant 0 : index
    %728 = vector.load %arg4[%c64, %c0_254] : memref<65x4xf32, #tpu.memory_space<vmem>>, vector<1x4xf32>
    %729 = vector.shape_cast %728 : vector<1x4xf32> to vector<1x4xf32>
    %730 = vector.broadcast %729 : vector<1x4xf32> to vector<8x4xf32>
    %cst_255 = arith.constant dense<0.000000e+00> : vector<8x4xf32>
    %731 = tpu.matmul %716, %727, %cst_255 {dimension_numbers = #tpu.dot_dimension_numbers<[1], [0], [0], [1], [0, 0, 1, 1], [], []>} : vector<8x64xf32>, vector<64x4xf32>, vector<8x4xf32> -> vector<8x4xf32>
    %cst_256 = arith.constant 0.0166666675 : f32
    %732 = vector.broadcast %cst_256 : f32 to vector<8x4xf32>
    %733 = arith.mulf %732, %731 : vector<8x4xf32>
    %734 = arith.addf %14, %733 : vector<8x4xf32>
    %735 = arith.addf %734, %730 : vector<8x4xf32>
    %c0_257 = arith.constant 0 : index
    %c0_258 = arith.constant 0 : index
    %736 = vector.load %arg5[%c0_257, %c0_258] : memref<8x4xf32, #tpu.memory_space<vmem>>, vector<8x4xf32>
    tpu.vector_store %arg5[%c0_257, %c0_258], %735 {strides = array<i32>} : memref<8x4xf32, #tpu.memory_space<vmem>>, vector<8x4xf32>,
    return
  }
  func.func @transform_0(%arg0: i32) -> (i32, i32) {
    %c0_i32 = arith.constant 0 : i32
    %c0_i32_0 = arith.constant 0 : i32
    return %arg0, %c0_i32 : i32, i32
  }
  func.func @transform_1(%arg0: i32) -> (i32, i32, i32) {
    %c0_i32 = arith.constant 0 : i32
    %c0_i32_0 = arith.constant 0 : i32
    %c0_i32_1 = arith.constant 0 : i32
    %c0_i32_2 = arith.constant 0 : i32
    return %c0_i32, %c0_i32_0, %c0_i32_1 : i32, i32, i32
  }
  func.func @transform_2(%arg0: i32) -> (i32, i32) {
    %c0_i32 = arith.constant 0 : i32
    %c0_i32_0 = arith.constant 0 : i32
    %c0_i32_1 = arith.constant 0 : i32
    return %c0_i32, %c0_i32_0 : i32, i32
  }
  func.func @transform_3(%arg0: i32) -> (i32, i32) {
    %c0_i32 = arith.constant 0 : i32
    %c0_i32_0 = arith.constant 0 : i32
    %c0_i32_1 = arith.constant 0 : i32
    return %c0_i32, %c0_i32_0 : i32, i32
  }
  func.func @transform_4(%arg0: i32) -> (i32, i32) {
    %c0_i32 = arith.constant 0 : i32
    %c0_i32_0 = arith.constant 0 : i32
    return %arg0, %c0_i32 : i32, i32
  }
}

</mosaic_0001>

<bundles_post_ra>
// kernel: ode_forward.1
= control target key start
LH: loop header
LB: loop body
LE: loop exit
PB: predicated region body
PF: predicated region fallthrough
CT: control target
= control target key end

     0   :  { %vm47_vm0 = vcmask 1043456   ;;  %vm43_vm1 = vcmask 31744   ;;  %vm98_vm2 = vcmask 523264   ;;  %s2734_s2 = inlined_call_operand.vmem [shape: f32[7,64], index: 2, kind: input, shape index: {}]   ;;  %s2735_s0 = inlined_call_operand.vmem [shape: f32[8,4], index: 0, kind: input, shape index: {}]   ;;  %s2736_s1 = inlined_call_operand.vmem [shape: bf16[2,64,64], index: 1, kind: input, shape index: {}]   ;;  %s2737_s3 = inlined_call_operand.vmem [shape: f32[65,4], index: 3, kind: input, shape index: {}]   ;;  %s2738_s4 = inlined_call_operand.vmem [shape: f32[8,4], index: 4, kind: output, shape index: {}]  }
   0x1   :  { %v35_v0 = vld [vmem:[%s2734_s2] sm:$0xf]  ;;  %v1987_v2 = vld [vmem:[%s2736_s1 + $0x18] sm:$0xff]  ;;  %v1994_v3 = vld [vmem:[%s2736_s1 + $0x10] sm:$0xff] }
   0x2   :  { %1815 = vmatpush.msk.msra.mxu0 %vm47_vm0, %v35_v0  ;;  %v42_v1 = vld [vmem:[%s2735_s0] sm:$0xff]  ;;  %106 = vmatpush.bf16.msra.mxu1 %v1987_v2  ;;  %v2002_v4 = vld [vmem:[%s2736_s1 + $0x8] sm:$0xff]  ;;  %v2018_v6 = vld [vmem:[%s2736_s1 + $0x38] sm:$0xff] }
   0x3   :  { %1816 = vmatmul.msk.f32.vlgmr.msra.gmra.mxu0 %vm43_vm1, %v42_v1  ;;  %169 = vmatpush.bf16.msra.mxu3 %v1987_v2  ;;  %v2008_v5 = vld [vmem:[%s2736_s1] sm:$0xff]  ;;  %v2024_v7 = vld [vmem:[%s2736_s1 + $0x30] sm:$0xff]  ;;  %v2052_v13 = vld [vmem:[%s2736_s1 + $0x28] sm:$0xff] }
   0x4   :  { %148 = vmatpush.bf16.msra.mxu2 %v2018_v6  ;;  %187 = vmatpush.bf16.msrb.mxu0 %v2018_v6  ;;  %v2038_v8 = vld [vmem:[%s2734_s2 + $0x4] ss:$0 sm:$0xff]  ;;  %v2074_v15 = vld [vmem:[%s2734_s2 + $0x5] ss:$0 sm:$0xff]  ;;  %v2085_v21 = vld [vmem:[%s2734_s2 + $0x6] ss:$0 sm:$0xff] }
   0x5   :  { %v2059_v14 = vld [vmem:[%s2736_s1 + $0x20] sm:$0xff] }
   0x6   :  { %107 = vmatpush.bf16.msra.mxu1 %v1994_v3 }
   0x7   :  { %170 = vmatpush.bf16.msra.mxu3 %v1994_v3 }
   0x8   :  { %149 = vmatpush.bf16.msra.mxu2 %v2024_v7  ;;  %188 = vmatpush.bf16.msrb.mxu0 %v2024_v7 }
   0xa   :  { %108 = vmatpush.bf16.msra.mxu1 %v2002_v4 }
   0xb   :  { %171 = vmatpush.bf16.msra.mxu3 %v2002_v4 }
   0xc   :  { %150 = vmatpush.bf16.msra.mxu2 %v2052_v13  ;;  %189 = vmatpush.bf16.msrb.mxu0 %v2052_v13 }
   0xe   :  { %109 = vmatpush.bf16.msra.mxu1 %v2008_v5 }
   0xf   :  { %172 = vmatpush.bf16.msra.mxu3 %v2008_v5 }
  0x10   :  { %151 = vmatpush.bf16.msra.mxu2 %v2059_v14  ;;  %190 = vmatpush.bf16.msrb.mxu0 %v2059_v14 }
  0x12   :  { %208 = vmatpush.bf16.msrb.mxu1 %v1987_v2 }
  0x13   :  { %247 = vmatpush.bf16.msrb.mxu3 %v1987_v2 }
  0x14   :  { %226 = vmatpush.bf16.msrb.mxu2 %v2018_v6  ;;  %265 = vmatpush.bf16.msra.mxu0 %v2018_v6 }
  0x16   :  { %209 = vmatpush.bf16.msrb.mxu1 %v1994_v3 }
  0x17   :  { %248 = vmatpush.bf16.msrb.mxu3 %v1994_v3 }
  0x18   :  { %227 = vmatpush.bf16.msrb.mxu2 %v2024_v7  ;;  %266 = vmatpush.bf16.msra.mxu0 %v2024_v7 }
  0x1a   :  { %210 = vmatpush.bf16.msrb.mxu1 %v2002_v4 }
  0x1b   :  { %249 = vmatpush.bf16.msrb.mxu3 %v2002_v4 }
  0x1c   :  { %228 = vmatpush.bf16.msrb.mxu2 %v2052_v13  ;;  %267 = vmatpush.bf16.msra.mxu0 %v2052_v13 }
  0x1e   :  { %211 = vmatpush.bf16.msrb.mxu1 %v2008_v5 }
  0x1f   :  { %250 = vmatpush.bf16.msrb.mxu3 %v2008_v5 }
  0x20   :  { %229 = vmatpush.bf16.msrb.mxu2 %v2059_v14  ;;  %268 = vmatpush.bf16.msra.mxu0 %v2059_v14 }
  0x80   :  { %v2040_v9 = vpop.f32.mrf.mxu0 }
  0x81   :  { %v71_v10 = vadd.f32 %v2038_v8, %v2040_v9 }
  0x83   :  { %v72_v11 = vmax.f32 %v71_v10, 0.0 }
  0x85   :  { %v73_v12 = vpack.c.bf16 %v72_v11, %v72_v11 }
  0x87   :  { %1833 = vmatmul.msk.bf16.vlgmr.msra.gmra.mxu1 %vm98_vm2, %v73_v12 }
  0x88   :  { %297 = vmatpush.bf16.msra.mxu1 %v1987_v2 }
  0x8c   :  { %298 = vmatpush.bf16.msra.mxu1 %v1994_v3 }
  0x90   :  { %299 = vmatpush.bf16.msra.mxu1 %v2002_v4 }
  0x94   :  { %300 = vmatpush.bf16.msra.mxu1 %v2008_v5 }
 0x104   :  { %v111_v16 = vpop.f32.mrf.mxu1 }
 0x105   :  { %v112_v17 = vadd.f32 %v2074_v15, %v111_v16 }
 0x107   :  { %v115_v18 = vmax.f32 %v112_v17, 0.0 }
 0x109   :  { %v116_v19 = vpack.c.bf16 %v115_v18, %v115_v18 }
 0x10b   :  { %1850 = vmatmul.msk.bf16.vlgmr.msra.gmra.mxu2 %vm98_vm2, %v116_v19 }
 0x10c   :  { %v113_v20 = vpop.f32.mrf.mxu1  ;;  %315 = vmatpush.bf16.msra.mxu2 %v2018_v6 }
 0x110   :  { %316 = vmatpush.bf16.msra.mxu2 %v2024_v7 }
 0x114   :  { %317 = vmatpush.bf16.msra.mxu2 %v2052_v13 }
 0x118   :  { %318 = vmatpush.bf16.msra.mxu2 %v2059_v14 }
 0x18e   :  { %v153_v22 = vpop.f32.mrf.mxu2 }
 0x18f   :  { %v154_v23 = vadd.f32 %v2085_v21, %v153_v22 }
 0x191   :  { %v157_v24 = vmul.f32 0.05, %v154_v23 }
 0x193   :  { %v158_v25 = vadd.f32 %v157_v24, %v2040_v9 }
 0x195   :  { %v159_v26 = vadd.f32 %v2038_v8, %v158_v25 }
 0x196   :  { %v155_v27 = vpop.f32.mrf.mxu2 }
 0x197   :  { %v160_v28 = vmax.f32 %v159_v26, 0.0 }
 0x199   :  { %v161_v29 = vpack.c.bf16 %v160_v28, %v160_v28 }
 0x19b   :  { %1851 = vmatmul.msk.bf16.vlgmr.msra.gmra.mxu3 %vm98_vm2, %v161_v29 }
 0x19c   :  { %336 = vmatpush.bf16.msra.mxu3 %v1987_v2 }
 0x1a0   :  { %337 = vmatpush.bf16.msra.mxu3 %v1994_v3 }
 0x1a4   :  { %338 = vmatpush.bf16.msra.mxu3 %v2002_v4 }
 0x1a8   :  { %339 = vmatpush.bf16.msra.mxu3 %v2008_v5 }
 0x21e   :  { %v174_v30 = vpop.f32.mrf.mxu3 }
 0x21f   :  { %v175_v31 = vadd.f32 %v2074_v15, %v174_v30 }
 0x221   :  { %v178_v32 = vmax.f32 %v175_v31, 0.0 }
 0x223   :  { %v179_v33 = vpack.c.bf16 %v178_v32, %v178_v32  ;;  %v274_v44 = vmul.f32 2.0, %v178_v32 }
 0x225   :  { %1852 = vmatmul.msk.bf16.vlgmr.msrb.gmra.mxu0 %vm98_vm2, %v179_v33  ;;  %v275_v47 = vadd.f32 %v274_v44, %v115_v18 }
 0x226   :  { %v176_v34 = vpop.f32.mrf.mxu3  ;;  %354 = vmatpush.bf16.msrb.mxu0 %v2018_v6 }
 0x22a   :  { %355 = vmatpush.bf16.msrb.mxu0 %v2024_v7 }
 0x22e   :  { %356 = vmatpush.bf16.msrb.mxu0 %v2052_v13 }
 0x232   :  { %357 = vmatpush.bf16.msrb.mxu0 %v2059_v14 }
 0x2a2   :  { %v192_v35 = vpop.f32.mrf.mxu0 }
 0x2a3   :  { %v193_v36 = vadd.f32 %v2085_v21, %v192_v35 }
 0x2a5   :  { %v196_v37 = vmul.f32 0.05, %v193_v36  ;;  %v280_v52 = vmul.f32 2.0, %v193_v36 }
 0x2a7   :  { %v197_v38 = vadd.f32 %v196_v37, %v2040_v9  ;;  %v281_v55 = vadd.f32 %v280_v52, %v154_v23 }
 0x2a9   :  { %v198_v39 = vadd.f32 %v2038_v8, %v197_v38 }
 0x2aa   :  { %v194_v40 = vpop.f32.mrf.mxu0 }
 0x2ab   :  { %v199_v41 = vmax.f32 %v198_v39, 0.0 }
 0x2ad   :  { %v200_v42 = vpack.c.bf16 %v199_v41, %v199_v41 }
 0x2af   :  { %1853 = vmatmul.msk.bf16.vlgmr.msrb.gmra.mxu1 %vm98_vm2, %v200_v42 }
 0x2b0   :  { %375 = vmatpush.bf16.msrb.mxu1 %v1987_v2 }
 0x2b4   :  { %376 = vmatpush.bf16.msrb.mxu1 %v1994_v3 }
 0x2b8   :  { %377 = vmatpush.bf16.msrb.mxu1 %v2002_v4 }
 0x2bc   :  { %378 = vmatpush.bf16.msrb.mxu1 %v2008_v5 }
 0x32c   :  { %v213_v43 = vpop.f32.mrf.mxu1 }
 0x32d   :  { %v214_v45 = vadd.f32 %v2074_v15, %v213_v43 }
 0x32f   :  { %v217_v46 = vmax.f32 %v214_v45, 0.0 }
 0x331   :  { %v218_v48 = vpack.c.bf16 %v217_v46, %v217_v46  ;;  %v276_v49 = vmul.f32 2.0, %v217_v46 }
 0x333   :  { %1854 = vmatmul.msk.bf16.vlgmr.msrb.gmra.mxu2 %vm98_vm2, %v218_v48  ;;  %v277_v50 = vadd.f32 %v276_v49, %v275_v47 }
 0x334   :  { %v215_v51 = vpop.f32.mrf.mxu1  ;;  %393 = vmatpush.bf16.msrb.mxu2 %v2018_v6 }
 0x338   :  { %394 = vmatpush.bf16.msrb.mxu2 %v2024_v7 }
 0x33c   :  { %395 = vmatpush.bf16.msrb.mxu2 %v2052_v13 }
 0x340   :  { %396 = vmatpush.bf16.msrb.mxu2 %v2059_v14 }
 0x3b6   :  { %v231_v53 = vpop.f32.mrf.mxu2 }
 0x3b7   :  { %v232_v54 = vadd.f32 %v2085_v21, %v231_v53 }
 0x3b9   :  { %v235_v56 = vmul.f32 0.1, %v232_v54  ;;  %v282_v57 = vmul.f32 2.0, %v232_v54 }
 0x3bb   :  { %v236_v58 = vadd.f32 %v235_v56, %v2040_v9  ;;  %v283_v59 = vadd.f32 %v282_v57, %v281_v55 }
 0x3bd   :  { %v237_v60 = vadd.f32 %v2038_v8, %v236_v58 }
 0x3be   :  { %v233_v61 = vpop.f32.mrf.mxu2 }
 0x3bf   :  { %v238_v62 = vmax.f32 %v237_v60, 0.0 }
 0x3c1   :  { %v239_v63 = vpack.c.bf16 %v238_v62, %v238_v62 }
 0x3c3   :  { %1855 = vmatmul.msk.bf16.vlgmr.msrb.gmra.mxu3 %vm98_vm2, %v239_v63 }
 0x3c4   :  { %414 = vmatpush.bf16.msrb.mxu3 %v1987_v2 }
 0x3c8   :  { %415 = vmatpush.bf16.msrb.mxu3 %v1994_v3 }
 0x3cc   :  { %416 = vmatpush.bf16.msrb.mxu3 %v2002_v4 }
 0x3d0   :  { %417 = vmatpush.bf16.msrb.mxu3 %v2008_v5 }
 0x446   :  { %v252_v0 = vpop.f32.mrf.mxu3 }
 0x447   :  { %v253_v1 = vadd.f32 %v2074_v15, %v252_v0 }
 0x449   :  { %v256_v10 = vmax.f32 %v253_v1, 0.0 }
 0x44b   :  { %v257_v11 = vpack.c.bf16 %v256_v10, %v256_v10  ;;  %v2124_v12 = vadd.f32 %v277_v50, %v256_v10 }
 0x44d   :  { %1856 = vmatmul.msk.bf16.vlgmr.msra.gmra.mxu0 %vm98_vm2, %v257_v11 }
 0x44e   :  { %v254_v16 = vpop.f32.mrf.mxu3  ;;  %432 = vmatpush.bf16.msra.mxu0 %v2018_v6 }
 0x452   :  { %433 = vmatpush.bf16.msra.mxu0 %v2024_v7 }
 0x456   :  { %434 = vmatpush.bf16.msra.mxu0 %v2052_v13 }
 0x45a   :  { %435 = vmatpush.bf16.msra.mxu0 %v2059_v14 }
 0x4ca   :  { %v270_v17 = vpop.f32.mrf.mxu0 }
 0x4cb   :  { %v271_v18 = vadd.f32 %v2085_v21, %v270_v17 }
 0x4cd   :  { %v284_v19 = vadd.f32 %v283_v59, %v271_v18 }
 0x4cf   :  { %v285_v20 = vmul.f32 0.016666668, %v284_v19 }
 0x4d1   :  { %v2133_v22 = vadd.f32 %v285_v20, %v2040_v9 }
 0x4d2   :  { %v272_v23 = vpop.f32.mrf.mxu0 }
 0x4d3   :  { %v287_v24 = vadd.f32 %v2038_v8, %v2133_v22 }
 0x4d5   :  { %v288_v25 = vmax.f32 %v287_v24, 0.0 }
 0x4d7   :  { %v289_v26 = vpack.c.bf16 %v288_v25, %v288_v25 }
 0x4d9   :  { %1857 = vmatmul.msk.bf16.vlgmr.msra.gmra.mxu1 %vm98_vm2, %v289_v26 }
 0x4da   :  { %464 = vmatpush.bf16.msra.mxu1 %v1987_v2 }
 0x4de   :  { %465 = vmatpush.bf16.msra.mxu1 %v1994_v3 }
 0x4e2   :  { %466 = vmatpush.bf16.msra.mxu1 %v2002_v4 }
 0x4e6   :  { %467 = vmatpush.bf16.msra.mxu1 %v2008_v5 }
 0x556   :  { %v302_v27 = vpop.f32.mrf.mxu1 }
 0x557   :  { %v303_v9 = vadd.f32 %v2074_v15, %v302_v27 }
 0x559   :  { %v306_v28 = vmax.f32 %v303_v9, 0.0 }
 0x55b   :  { %v307_v29 = vpack.c.bf16 %v306_v28, %v306_v28 }
 0x55d   :  { %1858 = vmatmul.msk.bf16.vlgmr.msra.gmra.mxu2 %vm98_vm2, %v307_v29 }
 0x55e   :  { %v304_v30 = vpop.f32.mrf.mxu1  ;;  %482 = vmatpush.bf16.msra.mxu2 %v2018_v6 }
 0x562   :  { %483 = vmatpush.bf16.msra.mxu2 %v2024_v7 }
 0x566   :  { %484 = vmatpush.bf16.msra.mxu2 %v2052_v13 }
 0x56a   :  { %485 = vmatpush.bf16.msra.mxu2 %v2059_v14 }
 0x5e0   :  { %v320_v31 = vpop.f32.mrf.mxu2 }
 0x5e1   :  { %v321_v32 = vadd.f32 %v2085_v21, %v320_v31 }
 0x5e3   :  { %v324_v33 = vmul.f32 0.05, %v321_v32 }
 0x5e5   :  { %v325_v34 = vadd.f32 %v324_v33, %v2133_v22 }
 0x5e7   :  { %v326_v35 = vadd.f32 %v2038_v8, %v325_v34 }
 0x5e8   :  { %v322_v36 = vpop.f32.mrf.mxu2 }
 0x5e9   :  { %v327_v37 = vmax.f32 %v326_v35, 0.0 }
 0x5eb   :  { %v328_v38 = vpack.c.bf16 %v327_v37, %v327_v37 }
 0x5ed   :  { %1859 = vmatmul.msk.bf16.vlgmr.msra.gmra.mxu3 %vm98_vm2, %v328_v38 }
 0x5ee   :  { %503 = vmatpush.bf16.msra.mxu3 %v1987_v2 }
 0x5f2   :  { %504 = vmatpush.bf16.msra.mxu3 %v1994_v3 }
 0x5f6   :  { %505 = vmatpush.bf16.msra.mxu3 %v2002_v4 }
 0x5fa   :  { %506 = vmatpush.bf16.msra.mxu3 %v2008_v5 }
 0x670   :  { %v341_v39 = vpop.f32.mrf.mxu3 }
 0x671   :  { %v342_v40 = vadd.f32 %v2074_v15, %v341_v39 }
 0x673   :  { %v345_v41 = vmax.f32 %v342_v40, 0.0 }
 0x675   :  { %v346_v42 = vpack.c.bf16 %v345_v41, %v345_v41  ;;  %v441_v53 = vmul.f32 2.0, %v345_v41 }
 0x677   :  { %1860 = vmatmul.msk.bf16.vlgmr.msrb.gmra.mxu0 %vm98_vm2, %v346_v42  ;;  %v442_v56 = vadd.f32 %v441_v53, %v306_v28 }
 0x678   :  { %v343_v43 = vpop.f32.mrf.mxu3  ;;  %521 = vmatpush.bf16.msrb.mxu0 %v2018_v6 }
 0x67c   :  { %522 = vmatpush.bf16.msrb.mxu0 %v2024_v7 }
 0x680   :  { %523 = vmatpush.bf16.msrb.mxu0 %v2052_v13 }
 0x684   :  { %524 = vmatpush.bf16.msrb.mxu0 %v2059_v14 }
 0x6f4   :  { %v359_v44 = vpop.f32.mrf.mxu0 }
 0x6f5   :  { %v360_v45 = vadd.f32 %v2085_v21, %v359_v44 }
 0x6f7   :  { %v363_v46 = vmul.f32 0.05, %v360_v45  ;;  %v447_v61 = vmul.f32 2.0, %v360_v45 }
 0x6f9   :  { %v364_v47 = vadd.f32 %v363_v46, %v2133_v22  ;;  %v448_v0 = vadd.f32 %v447_v61, %v321_v32 }
 0x6fb   :  { %v365_v48 = vadd.f32 %v2038_v8, %v364_v47 }
 0x6fc   :  { %v361_v49 = vpop.f32.mrf.mxu0 }
 0x6fd   :  { %v366_v50 = vmax.f32 %v365_v48, 0.0 }
 0x6ff   :  { %v367_v51 = vpack.c.bf16 %v366_v50, %v366_v50 }
 0x701   :  { %1861 = vmatmul.msk.bf16.vlgmr.msrb.gmra.mxu1 %vm98_vm2, %v367_v51 }
 0x702   :  { %542 = vmatpush.bf16.msrb.mxu1 %v1987_v2 }
 0x706   :  { %543 = vmatpush.bf16.msrb.mxu1 %v1994_v3 }
 0x70a   :  { %544 = vmatpush.bf16.msrb.mxu1 %v2002_v4 }
 0x70e   :  { %545 = vmatpush.bf16.msrb.mxu1 %v2008_v5 }
 0x77e   :  { %v380_v52 = vpop.f32.mrf.mxu1 }
 0x77f   :  { %v381_v54 = vadd.f32 %v2074_v15, %v380_v52 }
 0x781   :  { %v384_v55 = vmax.f32 %v381_v54, 0.0 }
 0x783   :  { %v385_v57 = vpack.c.bf16 %v384_v55, %v384_v55  ;;  %v443_v58 = vmul.f32 2.0, %v384_v55 }
 0x785   :  { %1862 = vmatmul.msk.bf16.vlgmr.msrb.gmra.mxu2 %vm98_vm2, %v385_v57  ;;  %v444_v59 = vadd.f32 %v443_v58, %v442_v56 }
 0x786   :  { %v382_v60 = vpop.f32.mrf.mxu1  ;;  %560 = vmatpush.bf16.msrb.mxu2 %v2018_v6 }
 0x78a   :  { %561 = vmatpush.bf16.msrb.mxu2 %v2024_v7 }
 0x78e   :  { %562 = vmatpush.bf16.msrb.mxu2 %v2052_v13 }
 0x792   :  { %563 = vmatpush.bf16.msrb.mxu2 %v2059_v14 }
 0x808   :  { %v398_v62 = vpop.f32.mrf.mxu2 }
 0x809   :  { %v399_v63 = vadd.f32 %v2085_v21, %v398_v62 }
 0x80b   :  { %v402_v1 = vmul.f32 0.1, %v399_v63  ;;  %v449_v10 = vmul.f32 2.0, %v399_v63 }
 0x80d   :  { %v403_v11 = vadd.f32 %v402_v1, %v2133_v22  ;;  %v450_v16 = vadd.f32 %v449_v10, %v448_v0 }
 0x80f   :  { %v404_v17 = vadd.f32 %v2038_v8, %v403_v11 }
 0x810   :  { %v400_v18 = vpop.f32.mrf.mxu2 }
 0x811   :  { %v405_v19 = vmax.f32 %v404_v17, 0.0 }
 0x813   :  { %v406_v20 = vpack.c.bf16 %v405_v19, %v405_v19 }
 0x815   :  { %1863 = vmatmul.msk.bf16.vlgmr.msrb.gmra.mxu3 %vm98_vm2, %v406_v20 }
 0x816   :  { %581 = vmatpush.bf16.msrb.mxu3 %v1987_v2 }
 0x81a   :  { %582 = vmatpush.bf16.msrb.mxu3 %v1994_v3 }
 0x81e   :  { %583 = vmatpush.bf16.msrb.mxu3 %v2002_v4 }
 0x822   :  { %584 = vmatpush.bf16.msrb.mxu3 %v2008_v5 }
 0x898   :  { %v419_v23 = vpop.f32.mrf.mxu3 }
 0x899   :  { %v420_v24 = vadd.f32 %v2074_v15, %v419_v23 }
 0x89b   :  { %v423_v25 = vmax.f32 %v420_v24, 0.0 }
 0x89d   :  { %v424_v26 = vpack.c.bf16 %v423_v25, %v423_v25  ;;  %v445_v27 = vadd.f32 %v444_v59, %v423_v25 }
 0x89f   :  { %v2186_v9 = vadd.f32 %v445_v27, %v2124_v12  ;;  %1864 = vmatmul.msk.bf16.vlgmr.msra.gmra.mxu0 %vm98_vm2, %v424_v26 }
 0x8a0   :  { %v421_v28 = vpop.f32.mrf.mxu3  ;;  %599 = vmatpush.bf16.msra.mxu0 %v2018_v6 }
 0x8a4   :  { %600 = vmatpush.bf16.msra.mxu0 %v2024_v7 }
 0x8a8   :  { %601 = vmatpush.bf16.msra.mxu0 %v2052_v13 }
 0x8ac   :  { %602 = vmatpush.bf16.msra.mxu0 %v2059_v14 }
 0x91c   :  { %v437_v29 = vpop.f32.mrf.mxu0 }
 0x91d   :  { %v438_v30 = vadd.f32 %v2085_v21, %v437_v29 }
 0x91f   :  { %v451_v31 = vadd.f32 %v450_v16, %v438_v30 }
 0x921   :  { %v452_v32 = vmul.f32 0.016666668, %v451_v31 }
 0x923   :  { %v2195_v33 = vadd.f32 %v452_v32, %v2133_v22 }
 0x924   :  { %v439_v12 = vpop.f32.mrf.mxu0 }
 0x925   :  { %v454_v34 = vadd.f32 %v2038_v8, %v2195_v33 }
 0x927   :  { %v455_v35 = vmax.f32 %v454_v34, 0.0 }
 0x929   :  { %v456_v36 = vpack.c.bf16 %v455_v35, %v455_v35 }
 0x92b   :  { %1865 = vmatmul.msk.bf16.vlgmr.msra.gmra.mxu1 %vm98_vm2, %v456_v36 }
 0x92c   :  { %631 = vmatpush.bf16.msra.mxu1 %v1987_v2 }
 0x930   :  { %632 = vmatpush.bf16.msra.mxu1 %v1994_v3 }
 0x934   :  { %633 = vmatpush.bf16.msra.mxu1 %v2002_v4 }
 0x938   :  { %634 = vmatpush.bf16.msra.mxu1 %v2008_v5 }
 0x9a8   :  { %v469_v37 = vpop.f32.mrf.mxu1 }
 0x9a9   :  { %v470_v22 = vadd.f32 %v2074_v15, %v469_v37 }
 0x9ab   :  { %v473_v38 = vmax.f32 %v470_v22, 0.0 }
 0x9ad   :  { %v474_v39 = vpack.c.bf16 %v473_v38, %v473_v38 }
 0x9af   :  { %1866 = vmatmul.msk.bf16.vlgmr.msra.gmra.mxu2 %vm98_vm2, %v474_v39 }
 0x9b0   :  { %v471_v40 = vpop.f32.mrf.mxu1  ;;  %649 = vmatpush.bf16.msra.mxu2 %v2018_v6 }
 0x9b4   :  { %650 = vmatpush.bf16.msra.mxu2 %v2024_v7 }
 0x9b8   :  { %651 = vmatpush.bf16.msra.mxu2 %v2052_v13 }
 0x9bc   :  { %652 = vmatpush.bf16.msra.mxu2 %v2059_v14 }
 0xa32   :  { %v487_v41 = vpop.f32.mrf.mxu2 }
 0xa33   :  { %v488_v42 = vadd.f32 %v2085_v21, %v487_v41 }
 0xa35   :  { %v491_v43 = vmul.f32 0.05, %v488_v42 }
 0xa37   :  { %v492_v44 = vadd.f32 %v491_v43, %v2195_v33 }
 0xa39   :  { %v493_v45 = vadd.f32 %v2038_v8, %v492_v44 }
 0xa3a   :  { %v489_v46 = vpop.f32.mrf.mxu2 }
 0xa3b   :  { %v494_v47 = vmax.f32 %v493_v45, 0.0 }
 0xa3d   :  { %v495_v48 = vpack.c.bf16 %v494_v47, %v494_v47 }
 0xa3f   :  { %1867 = vmatmul.msk.bf16.vlgmr.msra.gmra.mxu3 %vm98_vm2, %v495_v48 }
 0xa40   :  { %670 = vmatpush.bf16.msra.mxu3 %v1987_v2 }
 0xa44   :  { %671 = vmatpush.bf16.msra.mxu3 %v1994_v3 }
 0xa48   :  { %672 = vmatpush.bf16.msra.mxu3 %v2002_v4 }
 0xa4c   :  { %673 = vmatpush.bf16.msra.mxu3 %v2008_v5 }
 0xac2   :  { %v508_v49 = vpop.f32.mrf.mxu3 }
 0xac3   :  { %v509_v50 = vadd.f32 %v2074_v15, %v508_v49 }
 0xac5   :  { %v512_v51 = vmax.f32 %v509_v50, 0.0 }
 0xac7   :  { %v513_v52 = vpack.c.bf16 %v512_v51, %v512_v51  ;;  %v608_v63 = vmul.f32 2.0, %v512_v51 }
 0xac9   :  { %1868 = vmatmul.msk.bf16.vlgmr.msrb.gmra.mxu0 %vm98_vm2, %v513_v52  ;;  %v609_v10 = vadd.f32 %v608_v63, %v473_v38 }
 0xaca   :  { %v510_v53 = vpop.f32.mrf.mxu3  ;;  %688 = vmatpush.bf16.msrb.mxu0 %v2018_v6 }
 0xace   :  { %689 = vmatpush.bf16.msrb.mxu0 %v2024_v7 }
 0xad2   :  { %690 = vmatpush.bf16.msrb.mxu0 %v2052_v13 }
 0xad6   :  { %691 = vmatpush.bf16.msrb.mxu0 %v2059_v14 }
 0xb46   :  { %v526_v54 = vpop.f32.mrf.mxu0 }
 0xb47   :  { %v527_v55 = vadd.f32 %v2085_v21, %v526_v54 }
 0xb49   :  { %v530_v56 = vmul.f32 0.05, %v527_v55  ;;  %v614_v19 = vmul.f32 2.0, %v527_v55 }
 0xb4b   :  { %v531_v57 = vadd.f32 %v530_v56, %v2195_v33  ;;  %v615_v24 = vadd.f32 %v614_v19, %v488_v42 }
 0xb4d   :  { %v532_v58 = vadd.f32 %v2038_v8, %v531_v57 }
 0xb4e   :  { %v528_v59 = vpop.f32.mrf.mxu0 }
 0xb4f   :  { %v533_v60 = vmax.f32 %v532_v58, 0.0 }
 0xb51   :  { %v534_v61 = vpack.c.bf16 %v533_v60, %v533_v60 }
 0xb53   :  { %1869 = vmatmul.msk.bf16.vlgmr.msrb.gmra.mxu1 %vm98_vm2, %v534_v61 }
 0xb54   :  { %709 = vmatpush.bf16.msrb.mxu1 %v1987_v2 }
 0xb58   :  { %710 = vmatpush.bf16.msrb.mxu1 %v1994_v3 }
 0xb5c   :  { %711 = vmatpush.bf16.msrb.mxu1 %v2002_v4 }
 0xb60   :  { %712 = vmatpush.bf16.msrb.mxu1 %v2008_v5 }
 0xbd0   :  { %v547_v62 = vpop.f32.mrf.mxu1 }
 0xbd1   :  { %v548_v0 = vadd.f32 %v2074_v15, %v547_v62 }
 0xbd3   :  { %v551_v1 = vmax.f32 %v548_v0, 0.0 }
 0xbd5   :  { %v552_v11 = vpack.c.bf16 %v551_v1, %v551_v1  ;;  %v610_v16 = vmul.f32 2.0, %v551_v1 }
 0xbd7   :  { %1870 = vmatmul.msk.bf16.vlgmr.msrb.gmra.mxu2 %vm98_vm2, %v552_v11  ;;  %v611_v17 = vadd.f32 %v610_v16, %v609_v10 }
 0xbd8   :  { %v549_v18 = vpop.f32.mrf.mxu1  ;;  %727 = vmatpush.bf16.msrb.mxu2 %v2018_v6 }
 0xbdc   :  { %728 = vmatpush.bf16.msrb.mxu2 %v2024_v7 }
 0xbe0   :  { %729 = vmatpush.bf16.msrb.mxu2 %v2052_v13 }
 0xbe4   :  { %730 = vmatpush.bf16.msrb.mxu2 %v2059_v14 }
 0xc5a   :  { %v565_v20 = vpop.f32.mrf.mxu2 }
 0xc5b   :  { %v566_v23 = vadd.f32 %v2085_v21, %v565_v20 }
 0xc5d   :  { %v569_v25 = vmul.f32 0.1, %v566_v23  ;;  %v616_v26 = vmul.f32 2.0, %v566_v23 }
 0xc5f   :  { %v570_v27 = vadd.f32 %v569_v25, %v2195_v33  ;;  %v617_v28 = vadd.f32 %v616_v26, %v615_v24 }
 0xc61   :  { %v571_v29 = vadd.f32 %v2038_v8, %v570_v27 }
 0xc62   :  { %v567_v30 = vpop.f32.mrf.mxu2 }
 0xc63   :  { %v572_v31 = vmax.f32 %v571_v29, 0.0 }
 0xc65   :  { %v573_v32 = vpack.c.bf16 %v572_v31, %v572_v31 }
 0xc67   :  { %1871 = vmatmul.msk.bf16.vlgmr.msrb.gmra.mxu3 %vm98_vm2, %v573_v32 }
 0xc68   :  { %748 = vmatpush.bf16.msrb.mxu3 %v1987_v2 }
 0xc6c   :  { %749 = vmatpush.bf16.msrb.mxu3 %v1994_v3 }
 0xc70   :  { %750 = vmatpush.bf16.msrb.mxu3 %v2002_v4 }
 0xc74   :  { %751 = vmatpush.bf16.msrb.mxu3 %v2008_v5 }
 0xcea   :  { %v586_v12 = vpop.f32.mrf.mxu3 }
 0xceb   :  { %v587_v34 = vadd.f32 %v2074_v15, %v586_v12 }
 0xced   :  { %v590_v35 = vmax.f32 %v587_v34, 0.0 }
 0xcef   :  { %v591_v36 = vpack.c.bf16 %v590_v35, %v590_v35  ;;  %v612_v37 = vadd.f32 %v611_v17, %v590_v35 }
 0xcf1   :  { %v2248_v22 = vadd.f32 %v612_v37, %v2186_v9  ;;  %1872 = vmatmul.msk.bf16.vlgmr.msra.gmra.mxu0 %vm98_vm2, %v591_v36 }
 0xcf2   :  { %v588_v38 = vpop.f32.mrf.mxu3  ;;  %766 = vmatpush.bf16.msra.mxu0 %v2018_v6 }
 0xcf6   :  { %767 = vmatpush.bf16.msra.mxu0 %v2024_v7 }
 0xcfa   :  { %768 = vmatpush.bf16.msra.mxu0 %v2052_v13 }
 0xcfe   :  { %769 = vmatpush.bf16.msra.mxu0 %v2059_v14 }
 0xd6e   :  { %v604_v39 = vpop.f32.mrf.mxu0 }
 0xd6f   :  { %v605_v40 = vadd.f32 %v2085_v21, %v604_v39 }
 0xd71   :  { %v618_v41 = vadd.f32 %v617_v28, %v605_v40 }
 0xd73   :  { %v619_v42 = vmul.f32 0.016666668, %v618_v41 }
 0xd75   :  { %v2257_v43 = vadd.f32 %v619_v42, %v2195_v33 }
 0xd76   :  { %v606_v9 = vpop.f32.mrf.mxu0 }
 0xd77   :  { %v621_v44 = vadd.f32 %v2038_v8, %v2257_v43 }
 0xd79   :  { %v622_v45 = vmax.f32 %v621_v44, 0.0 }
 0xd7b   :  { %v623_v46 = vpack.c.bf16 %v622_v45, %v622_v45 }
 0xd7d   :  { %1873 = vmatmul.msk.bf16.vlgmr.msra.gmra.mxu1 %vm98_vm2, %v623_v46 }
 0xd7e   :  { %798 = vmatpush.bf16.msra.mxu1 %v1987_v2 }
 0xd82   :  { %799 = vmatpush.bf16.msra.mxu1 %v1994_v3 }
 0xd86   :  { %800 = vmatpush.bf16.msra.mxu1 %v2002_v4 }
 0xd8a   :  { %801 = vmatpush.bf16.msra.mxu1 %v2008_v5 }
 0xdfa   :  { %v636_v47 = vpop.f32.mrf.mxu1 }
 0xdfb   :  { %v637_v33 = vadd.f32 %v2074_v15, %v636_v47 }
 0xdfd   :  { %v640_v48 = vmax.f32 %v637_v33, 0.0 }
 0xdff   :  { %v641_v49 = vpack.c.bf16 %v640_v48, %v640_v48 }
 0xe01   :  { %1874 = vmatmul.msk.bf16.vlgmr.msra.gmra.mxu2 %vm98_vm2, %v641_v49 }
 0xe02   :  { %v638_v50 = vpop.f32.mrf.mxu1  ;;  %816 = vmatpush.bf16.msra.mxu2 %v2018_v6 }
 0xe06   :  { %817 = vmatpush.bf16.msra.mxu2 %v2024_v7 }
 0xe0a   :  { %818 = vmatpush.bf16.msra.mxu2 %v2052_v13 }
 0xe0e   :  { %819 = vmatpush.bf16.msra.mxu2 %v2059_v14 }
 0xe84   :  { %v654_v51 = vpop.f32.mrf.mxu2 }
 0xe85   :  { %v655_v52 = vadd.f32 %v2085_v21, %v654_v51 }
 0xe87   :  { %v658_v53 = vmul.f32 0.05, %v655_v52 }
 0xe89   :  { %v659_v54 = vadd.f32 %v658_v53, %v2257_v43 }
 0xe8b   :  { %v660_v55 = vadd.f32 %v2038_v8, %v659_v54 }
 0xe8c   :  { %v656_v56 = vpop.f32.mrf.mxu2 }
 0xe8d   :  { %v661_v57 = vmax.f32 %v660_v55, 0.0 }
 0xe8f   :  { %v662_v58 = vpack.c.bf16 %v661_v57, %v661_v57 }
 0xe91   :  { %1875 = vmatmul.msk.bf16.vlgmr.msra.gmra.mxu3 %vm98_vm2, %v662_v58 }
 0xe92   :  { %837 = vmatpush.bf16.msra.mxu3 %v1987_v2 }
 0xe96   :  { %838 = vmatpush.bf16.msra.mxu3 %v1994_v3 }
 0xe9a   :  { %839 = vmatpush.bf16.msra.mxu3 %v2002_v4 }
 0xe9e   :  { %840 = vmatpush.bf16.msra.mxu3 %v2008_v5 }
 0xf14   :  { %v675_v59 = vpop.f32.mrf.mxu3 }
 0xf15   :  { %v676_v60 = vadd.f32 %v2074_v15, %v675_v59 }
 0xf17   :  { %v679_v61 = vmax.f32 %v676_v60, 0.0 }
 0xf19   :  { %v680_v62 = vpack.c.bf16 %v679_v61, %v679_v61  ;;  %v775_v23 = vmul.f32 2.0, %v679_v61 }
 0xf1b   :  { %1876 = vmatmul.msk.bf16.vlgmr.msrb.gmra.mxu0 %vm98_vm2, %v680_v62  ;;  %v776_v26 = vadd.f32 %v775_v23, %v640_v48 }
 0xf1c   :  { %v677_v63 = vpop.f32.mrf.mxu3  ;;  %855 = vmatpush.bf16.msrb.mxu0 %v2018_v6 }
 0xf20   :  { %856 = vmatpush.bf16.msrb.mxu0 %v2024_v7 }
 0xf24   :  { %857 = vmatpush.bf16.msrb.mxu0 %v2052_v13 }
 0xf28   :  { %858 = vmatpush.bf16.msrb.mxu0 %v2059_v14 }
 0xf98   :  { %v693_v0 = vpop.f32.mrf.mxu0 }
 0xf99   :  { %v694_v1 = vadd.f32 %v2085_v21, %v693_v0 }
 0xf9b   :  { %v697_v10 = vmul.f32 0.05, %v694_v1  ;;  %v781_v31 = vmul.f32 2.0, %v694_v1 }
 0xf9d   :  { %v698_v11 = vadd.f32 %v697_v10, %v2257_v43  ;;  %v782_v34 = vadd.f32 %v781_v31, %v655_v52 }
 0xf9f   :  { %v699_v16 = vadd.f32 %v2038_v8, %v698_v11 }
 0xfa0   :  { %v695_v17 = vpop.f32.mrf.mxu0 }
 0xfa1   :  { %v700_v18 = vmax.f32 %v699_v16, 0.0 }
 0xfa3   :  { %v701_v19 = vpack.c.bf16 %v700_v18, %v700_v18 }
 0xfa5   :  { %1877 = vmatmul.msk.bf16.vlgmr.msrb.gmra.mxu1 %vm98_vm2, %v701_v19 }
 0xfa6   :  { %876 = vmatpush.bf16.msrb.mxu1 %v1987_v2 }
 0xfaa   :  { %877 = vmatpush.bf16.msrb.mxu1 %v1994_v3 }
 0xfae   :  { %878 = vmatpush.bf16.msrb.mxu1 %v2002_v4 }
 0xfb2   :  { %879 = vmatpush.bf16.msrb.mxu1 %v2008_v5 }
0x1022   :  { %v714_v20 = vpop.f32.mrf.mxu1 }
0x1023   :  { %v715_v24 = vadd.f32 %v2074_v15, %v714_v20 }
0x1025   :  { %v718_v25 = vmax.f32 %v715_v24, 0.0 }
0x1027   :  { %v719_v27 = vpack.c.bf16 %v718_v25, %v718_v25  ;;  %v777_v28 = vmul.f32 2.0, %v718_v25 }
0x1029   :  { %1878 = vmatmul.msk.bf16.vlgmr.msrb.gmra.mxu2 %vm98_vm2, %v719_v27  ;;  %v778_v29 = vadd.f32 %v777_v28, %v776_v26 }
0x102a   :  { %v716_v30 = vpop.f32.mrf.mxu1  ;;  %894 = vmatpush.bf16.msrb.mxu2 %v2018_v6 }
0x102e   :  { %895 = vmatpush.bf16.msrb.mxu2 %v2024_v7 }
0x1032   :  { %896 = vmatpush.bf16.msrb.mxu2 %v2052_v13 }
0x1036   :  { %897 = vmatpush.bf16.msrb.mxu2 %v2059_v14 }
0x10ac   :  { %v732_v32 = vpop.f32.mrf.mxu2 }
0x10ad   :  { %v733_v12 = vadd.f32 %v2085_v21, %v732_v32 }
0x10af   :  { %v736_v35 = vmul.f32 0.1, %v733_v12  ;;  %v783_v36 = vmul.f32 2.0, %v733_v12 }
0x10b1   :  { %v737_v37 = vadd.f32 %v736_v35, %v2257_v43  ;;  %v784_v38 = vadd.f32 %v783_v36, %v782_v34 }
0x10b3   :  { %v738_v39 = vadd.f32 %v2038_v8, %v737_v37 }
0x10b4   :  { %v734_v40 = vpop.f32.mrf.mxu2 }
0x10b5   :  { %v739_v41 = vmax.f32 %v738_v39, 0.0 }
0x10b7   :  { %v740_v42 = vpack.c.bf16 %v739_v41, %v739_v41 }
0x10b9   :  { %1879 = vmatmul.msk.bf16.vlgmr.msrb.gmra.mxu3 %vm98_vm2, %v740_v42 }
0x10ba   :  { %915 = vmatpush.bf16.msrb.mxu3 %v1987_v2 }
0x10be   :  { %916 = vmatpush.bf16.msrb.mxu3 %v1994_v3 }
0x10c2   :  { %917 = vmatpush.bf16.msrb.mxu3 %v2002_v4 }
0x10c6   :  { %918 = vmatpush.bf16.msrb.mxu3 %v2008_v5 }
0x113c   :  { %v753_v9 = vpop.f32.mrf.mxu3 }
0x113d   :  { %v754_v44 = vadd.f32 %v2074_v15, %v753_v9 }
0x113f   :  { %v757_v45 = vmax.f32 %v754_v44, 0.0 }
0x1141   :  { %v758_v46 = vpack.c.bf16 %v757_v45, %v757_v45  ;;  %v779_v47 = vadd.f32 %v778_v29, %v757_v45 }
0x1143   :  { %v2310_v33 = vadd.f32 %v779_v47, %v2248_v22  ;;  %1880 = vmatmul.msk.bf16.vlgmr.msra.gmra.mxu0 %vm98_vm2, %v758_v46 }
0x1144   :  { %v755_v48 = vpop.f32.mrf.mxu3  ;;  %933 = vmatpush.bf16.msra.mxu0 %v2018_v6 }
0x1148   :  { %934 = vmatpush.bf16.msra.mxu0 %v2024_v7 }
0x114c   :  { %935 = vmatpush.bf16.msra.mxu0 %v2052_v13 }
0x1150   :  { %936 = vmatpush.bf16.msra.mxu0 %v2059_v14 }
0x11c0   :  { %v771_v49 = vpop.f32.mrf.mxu0 }
0x11c1   :  { %v772_v50 = vadd.f32 %v2085_v21, %v771_v49 }
0x11c3   :  { %v785_v51 = vadd.f32 %v784_v38, %v772_v50 }
0x11c5   :  { %v786_v52 = vmul.f32 0.016666668, %v785_v51 }
0x11c7   :  { %v2319_v53 = vadd.f32 %v786_v52, %v2257_v43 }
0x11c8   :  { %v773_v22 = vpop.f32.mrf.mxu0 }
0x11c9   :  { %v788_v54 = vadd.f32 %v2038_v8, %v2319_v53 }
0x11cb   :  { %v789_v55 = vmax.f32 %v788_v54, 0.0 }
0x11cd   :  { %v790_v56 = vpack.c.bf16 %v789_v55, %v789_v55  ;;  %v2398_v55 = vld [vmem:[%s2736_s1 + $0x38] sm:$0xff] }
0x11cf   :  { %1881 = vmatmul.msk.bf16.vlgmr.msra.gmra.mxu1 %vm98_vm2, %v790_v56  ;;  %v2416_v56 = vld [vmem:[%s2736_s1 + $0x20] sm:$0xff] }
0x11d0   :  { %965 = vmatpush.bf16.msra.mxu1 %v1987_v2 }
0x11d4   :  { %966 = vmatpush.bf16.msra.mxu1 %v1994_v3 }
0x11d8   :  { %967 = vmatpush.bf16.msra.mxu1 %v2002_v4 }
0x11dc   :  { %968 = vmatpush.bf16.msra.mxu1 %v2008_v5 }
0x124c   :  { %v803_v57 = vpop.f32.mrf.mxu1 }
0x124d   :  { %v804_v43 = vadd.f32 %v2074_v15, %v803_v57 }
0x124f   :  { %v807_v58 = vmax.f32 %v804_v43, 0.0 }
0x1251   :  { %v808_v59 = vpack.c.bf16 %v807_v58, %v807_v58 }
0x1253   :  { %1882 = vmatmul.msk.bf16.vlgmr.msra.gmra.mxu2 %vm98_vm2, %v808_v59 }
0x1254   :  { %v805_v60 = vpop.f32.mrf.mxu1  ;;  %983 = vmatpush.bf16.msra.mxu2 %v2018_v6 }
0x1258   :  { %984 = vmatpush.bf16.msra.mxu2 %v2024_v7 }
0x125c   :  { %985 = vmatpush.bf16.msra.mxu2 %v2052_v13 }
0x1260   :  { %986 = vmatpush.bf16.msra.mxu2 %v2059_v14 }
0x12d6   :  { %v821_v61 = vpop.f32.mrf.mxu2 }
0x12d7   :  { %v822_v62 = vadd.f32 %v2085_v21, %v821_v61 }
0x12d9   :  { %v825_v63 = vmul.f32 0.05, %v822_v62 }
0x12db   :  { %v826_v0 = vadd.f32 %v825_v63, %v2319_v53 }
0x12dd   :  { %v827_v1 = vadd.f32 %v2038_v8, %v826_v0 }
0x12de   :  { %v823_v10 = vpop.f32.mrf.mxu2 }
0x12df   :  { %v828_v11 = vmax.f32 %v827_v1, 0.0 }
0x12e1   :  { %v829_v16 = vpack.c.bf16 %v828_v11, %v828_v11 }
0x12e3   :  { %1883 = vmatmul.msk.bf16.vlgmr.msra.gmra.mxu3 %vm98_vm2, %v829_v16 }
0x12e4   :  { %1004 = vmatpush.bf16.msra.mxu3 %v1987_v2 }
0x12e8   :  { %1005 = vmatpush.bf16.msra.mxu3 %v1994_v3 }
0x12ec   :  { %1006 = vmatpush.bf16.msra.mxu3 %v2002_v4 }
0x12f0   :  { %1007 = vmatpush.bf16.msra.mxu3 %v2008_v5 }
0x1366   :  { %v842_v17 = vpop.f32.mrf.mxu3 }
0x1367   :  { %v843_v18 = vadd.f32 %v2074_v15, %v842_v17 }
0x1369   :  { %v846_v19 = vmax.f32 %v843_v18, 0.0 }
0x136b   :  { %v847_v20 = vpack.c.bf16 %v846_v19, %v846_v19  ;;  %v942_v12 = vmul.f32 2.0, %v846_v19  ;;  %v2449_v19 = vld [vmem:[%s2734_s2 + $0x6] ss:$0 sm:$0xff] }
0x136d   :  { %1884 = vmatmul.msk.bf16.vlgmr.msrb.gmra.mxu0 %vm98_vm2, %v847_v20  ;;  %v943_v36 = vadd.f32 %v942_v12, %v807_v58 }
0x136e   :  { %v844_v23 = vpop.f32.mrf.mxu3  ;;  %1022 = vmatpush.bf16.msrb.mxu0 %v2018_v6 }
0x1372   :  { %1023 = vmatpush.bf16.msrb.mxu0 %v2024_v7 }
0x1376   :  { %1024 = vmatpush.bf16.msrb.mxu0 %v2052_v13 }
0x137a   :  { %1025 = vmatpush.bf16.msrb.mxu0 %v2059_v14 }
0x13ea   :  { %v860_v24 = vpop.f32.mrf.mxu0 }
0x13eb   :  { %v861_v25 = vadd.f32 %v2085_v21, %v860_v24 }
0x13ed   :  { %v864_v26 = vmul.f32 0.05, %v861_v25 }
0x13ef   :  { %v865_v27 = vadd.f32 %v864_v26, %v2319_v53 }
0x13f1   :  { %v866_v28 = vadd.f32 %v2038_v8, %v865_v27 }
0x13f2   :  { %v862_v29 = vpop.f32.mrf.mxu0 }
0x13f3   :  { %v867_v30 = vmax.f32 %v866_v28, 0.0 }
0x13f5   :  { %v868_v31 = vpack.c.bf16 %v867_v30, %v867_v30 }
0x13f7   :  { %1885 = vmatmul.msk.bf16.vlgmr.msrb.gmra.mxu1 %vm98_vm2, %v868_v31 }
0x13f8   :  { %1043 = vmatpush.bf16.msrb.mxu1 %v1987_v2  ;;  %v948_v2 = vmul.f32 2.0, %v861_v25 }
0x13fc   :  { %1044 = vmatpush.bf16.msrb.mxu1 %v1994_v3 }
0x1400   :  { %1045 = vmatpush.bf16.msrb.mxu1 %v2002_v4 }
0x1404   :  { %1046 = vmatpush.bf16.msrb.mxu1 %v2008_v5  ;;  %v949_v5 = vadd.f32 %v948_v2, %v822_v62  ;;  %v2426_v62 = vld [vmem:[%s2734_s2 + $0x4] ss:$0 sm:$0xff] }
0x1474   :  { %v881_v32 = vpop.f32.mrf.mxu1 }
0x1475   :  { %v882_v34 = vadd.f32 %v2074_v15, %v881_v32 }
0x1477   :  { %v885_v35 = vmax.f32 %v882_v34, 0.0 }
0x1479   :  { %v886_v37 = vpack.c.bf16 %v885_v35, %v885_v35  ;;  %v944_v38 = vmul.f32 2.0, %v885_v35 }
0x147b   :  { %1886 = vmatmul.msk.bf16.vlgmr.msrb.gmra.mxu2 %vm98_vm2, %v886_v37  ;;  %v945_v39 = vadd.f32 %v944_v38, %v943_v36 }
0x147c   :  { %v883_v40 = vpop.f32.mrf.mxu1  ;;  %1061 = vmatpush.bf16.msrb.mxu2 %v2018_v6 }
0x1480   :  { %1062 = vmatpush.bf16.msrb.mxu2 %v2024_v7  ;;  %v2369_v7 = vld [vmem:[%s2736_s1 + $0x18] sm:$0xff] }
0x1484   :  { %1063 = vmatpush.bf16.msrb.mxu2 %v2052_v13  ;;  %v2375_v13 = vld [vmem:[%s2736_s1 + $0x10] sm:$0xff] }
0x1488   :  { %1064 = vmatpush.bf16.msrb.mxu2 %v2059_v14  ;;  %v2387_v14 = vld [vmem:[%s2736_s1] sm:$0xff] }
0x14fe   :  { %v899_v3 = vpop.f32.mrf.mxu2 }
0x14ff   :  { %v900_v4 = vadd.f32 %v2085_v21, %v899_v3 }
0x1501   :  { %v903_v41 = vmul.f32 0.1, %v900_v4  ;;  %v950_v42 = vmul.f32 2.0, %v900_v4 }
0x1503   :  { %v904_v9 = vadd.f32 %v903_v41, %v2319_v53  ;;  %v951_v44 = vadd.f32 %v950_v42, %v949_v5 }
0x1505   :  { %v905_v45 = vadd.f32 %v2038_v8, %v904_v9  ;;  %v2381_v8 = vld [vmem:[%s2736_s1 + $0x8] sm:$0xff] }
0x1506   :  { %v901_v46 = vpop.f32.mrf.mxu2 }
0x1507   :  { %v906_v6 = vmax.f32 %v905_v45, 0.0 }
0x1509   :  { %v907_v47 = vpack.c.bf16 %v906_v6, %v906_v6 }
0x150b   :  { %1887 = vmatmul.msk.bf16.vlgmr.msrb.gmra.mxu3 %vm98_vm2, %v907_v47 }
0x150c   :  { %1082 = vmatpush.bf16.msrb.mxu3 %v2369_v7 }
0x1510   :  { %1083 = vmatpush.bf16.msrb.mxu3 %v2375_v13 }
0x1514   :  { %1084 = vmatpush.bf16.msrb.mxu3 %v2381_v8 }
0x1518   :  { %1085 = vmatpush.bf16.msrb.mxu3 %v2387_v14 }
0x158e   :  { %v920_v48 = vpop.f32.mrf.mxu3 }
0x158f   :  { %v921_v49 = vadd.f32 %v2074_v15, %v920_v48  ;;  %v2404_v15 = vld [vmem:[%s2736_s1 + $0x30] sm:$0xff] }
0x1591   :  { %v924_v50 = vmax.f32 %v921_v49, 0.0 }
0x1593   :  { %v925_v51 = vpack.c.bf16 %v924_v50, %v924_v50  ;;  %v946_v52 = vadd.f32 %v945_v39, %v924_v50 }
0x1595   :  { %v2392_v22 = vadd.f32 %v946_v52, %v2310_v33  ;;  %1888 = vmatmul.msk.bf16.vlgmr.msra.gmra.mxu0 %vm98_vm2, %v925_v51  ;;  %v2410_v33 = vld [vmem:[%s2736_s1 + $0x28] sm:$0xff] }
0x1596   :  { %v922_v54 = vpop.f32.mrf.mxu3  ;;  %1100 = vmatpush.bf16.msra.mxu0 %v2398_v55 }
0x159a   :  { %1101 = vmatpush.bf16.msra.mxu0 %v2404_v15 }
0x159e   :  { %1102 = vmatpush.bf16.msra.mxu0 %v2410_v33 }
0x15a2   :  { %1103 = vmatpush.bf16.msra.mxu0 %v2416_v56 }
0x1612   :  { %v938_v57 = vpop.f32.mrf.mxu0 }
0x1613   :  { %v939_v43 = vadd.f32 %v2085_v21, %v938_v57 }
0x1615   :  { %v952_v58 = vadd.f32 %v951_v44, %v939_v43 }
0x1617   :  { %v953_v59 = vmul.f32 0.016666668, %v952_v58 }
0x1619   :  { %v2421_v60 = vadd.f32 %v953_v59, %v2319_v53  ;;  %v2438_v53 = vld [vmem:[%s2734_s2 + $0x5] ss:$0 sm:$0xff] }
0x161a   :  { %v940_v61 = vpop.f32.mrf.mxu0 }
0x161b   :  { %v955_v63 = vadd.f32 %v2426_v62, %v2421_v60 }
0x161d   :  { %v956_v0 = vmax.f32 %v955_v63, 0.0 }
0x161f   :  { %v957_v1 = vpack.c.bf16 %v956_v0, %v956_v0 }
0x1621   :  { %1889 = vmatmul.msk.bf16.vlgmr.msra.gmra.mxu1 %vm98_vm2, %v957_v1 }
0x1622   :  { %1132 = vmatpush.bf16.msra.mxu1 %v2369_v7 }
0x1626   :  { %1133 = vmatpush.bf16.msra.mxu1 %v2375_v13 }
0x162a   :  { %1134 = vmatpush.bf16.msra.mxu1 %v2381_v8 }
0x162e   :  { %1135 = vmatpush.bf16.msra.mxu1 %v2387_v14 }
0x169e   :  { %v970_v21 = vpop.f32.mrf.mxu1 }
0x169f   :  { %v971_v10 = vadd.f32 %v2438_v53, %v970_v21 }
0x16a1   :  { %v974_v11 = vmax.f32 %v971_v10, 0.0 }
0x16a3   :  { %v975_v16 = vpack.c.bf16 %v974_v11, %v974_v11 }
0x16a5   :  { %1890 = vmatmul.msk.bf16.vlgmr.msra.gmra.mxu2 %vm98_vm2, %v975_v16 }
0x16a6   :  { %v972_v17 = vpop.f32.mrf.mxu1  ;;  %1150 = vmatpush.bf16.msra.mxu2 %v2398_v55 }
0x16aa   :  { %1151 = vmatpush.bf16.msra.mxu2 %v2404_v15 }
0x16ae   :  { %1152 = vmatpush.bf16.msra.mxu2 %v2410_v33 }
0x16b2   :  { %1153 = vmatpush.bf16.msra.mxu2 %v2416_v56 }
0x1728   :  { %v988_v18 = vpop.f32.mrf.mxu2 }
0x1729   :  { %v989_v20 = vadd.f32 %v2449_v19, %v988_v18 }
0x172b   :  { %v992_v23 = vmul.f32 0.05, %v989_v20 }
0x172d   :  { %v993_v24 = vadd.f32 %v992_v23, %v2421_v60 }
0x172f   :  { %v994_v25 = vadd.f32 %v2426_v62, %v993_v24 }
0x1730   :  { %v990_v26 = vpop.f32.mrf.mxu2 }
0x1731   :  { %v995_v27 = vmax.f32 %v994_v25, 0.0 }
0x1733   :  { %v996_v28 = vpack.c.bf16 %v995_v27, %v995_v27 }
0x1735   :  { %1891 = vmatmul.msk.bf16.vlgmr.msra.gmra.mxu3 %vm98_vm2, %v996_v28 }
0x1736   :  { %1171 = vmatpush.bf16.msra.mxu3 %v2369_v7 }
0x173a   :  { %1172 = vmatpush.bf16.msra.mxu3 %v2375_v13 }
0x173e   :  { %1173 = vmatpush.bf16.msra.mxu3 %v2381_v8 }
0x1742   :  { %1174 = vmatpush.bf16.msra.mxu3 %v2387_v14 }
0x17b8   :  { %v1009_v29 = vpop.f32.mrf.mxu3 }
0x17b9   :  { %v1010_v30 = vadd.f32 %v2438_v53, %v1009_v29 }
0x17bb   :  { %v1013_v31 = vmax.f32 %v1010_v30, 0.0 }
0x17bd   :  { %v1014_v32 = vpack.c.bf16 %v1013_v31, %v1013_v31  ;;  %v1109_v4 = vmul.f32 2.0, %v1013_v31 }
0x17bf   :  { %1892 = vmatmul.msk.bf16.vlgmr.msrb.gmra.mxu0 %vm98_vm2, %v1014_v32  ;;  %v1110_v42 = vadd.f32 %v1109_v4, %v974_v11 }
0x17c0   :  { %v1011_v12 = vpop.f32.mrf.mxu3  ;;  %1189 = vmatpush.bf16.msrb.mxu0 %v2398_v55 }
0x17c4   :  { %1190 = vmatpush.bf16.msrb.mxu0 %v2404_v15 }
0x17c8   :  { %1191 = vmatpush.bf16.msrb.mxu0 %v2410_v33 }
0x17cc   :  { %1192 = vmatpush.bf16.msrb.mxu0 %v2416_v56 }
0x183c   :  { %v1027_v34 = vpop.f32.mrf.mxu0 }
0x183d   :  { %v1028_v35 = vadd.f32 %v2449_v19, %v1027_v34 }
0x183f   :  { %v1031_v36 = vmul.f32 0.05, %v1028_v35  ;;  %v1115_v6 = vmul.f32 2.0, %v1028_v35 }
0x1841   :  { %v1032_v37 = vadd.f32 %v1031_v36, %v2421_v60  ;;  %v1116_v49 = vadd.f32 %v1115_v6, %v989_v20 }
0x1843   :  { %v1033_v38 = vadd.f32 %v2426_v62, %v1032_v37 }
0x1844   :  { %v1029_v39 = vpop.f32.mrf.mxu0 }
0x1845   :  { %v1034_v40 = vmax.f32 %v1033_v38, 0.0 }
0x1847   :  { %v1035_v2 = vpack.c.bf16 %v1034_v40, %v1034_v40 }
0x1849   :  { %1893 = vmatmul.msk.bf16.vlgmr.msrb.gmra.mxu1 %vm98_vm2, %v1035_v2 }
0x184a   :  { %1210 = vmatpush.bf16.msrb.mxu1 %v2369_v7 }
0x184e   :  { %1211 = vmatpush.bf16.msrb.mxu1 %v2375_v13 }
0x1852   :  { %1212 = vmatpush.bf16.msrb.mxu1 %v2381_v8 }
0x1856   :  { %1213 = vmatpush.bf16.msrb.mxu1 %v2387_v14 }
0x18c6   :  { %v1048_v3 = vpop.f32.mrf.mxu1 }
0x18c7   :  { %v1049_v5 = vadd.f32 %v2438_v53, %v1048_v3 }
0x18c9   :  { %v1052_v41 = vmax.f32 %v1049_v5, 0.0 }
0x18cb   :  { %v1053_v9 = vpack.c.bf16 %v1052_v41, %v1052_v41  ;;  %v1111_v44 = vmul.f32 2.0, %v1052_v41 }
0x18cd   :  { %1894 = vmatmul.msk.bf16.vlgmr.msrb.gmra.mxu2 %vm98_vm2, %v1053_v9  ;;  %v1112_v45 = vadd.f32 %v1111_v44, %v1110_v42 }
0x18ce   :  { %v1050_v46 = vpop.f32.mrf.mxu1  ;;  %1228 = vmatpush.bf16.msrb.mxu2 %v2398_v55 }
0x18d2   :  { %1229 = vmatpush.bf16.msrb.mxu2 %v2404_v15 }
0x18d6   :  { %1230 = vmatpush.bf16.msrb.mxu2 %v2410_v33 }
0x18da   :  { %1231 = vmatpush.bf16.msrb.mxu2 %v2416_v56 }
0x1950   :  { %v1066_v47 = vpop.f32.mrf.mxu2 }
0x1951   :  { %v1067_v48 = vadd.f32 %v2449_v19, %v1066_v47 }
0x1953   :  { %v1070_v50 = vmul.f32 0.1, %v1067_v48  ;;  %v1117_v51 = vmul.f32 2.0, %v1067_v48 }
0x1955   :  { %v1071_v52 = vadd.f32 %v1070_v50, %v2421_v60  ;;  %v1118_v54 = vadd.f32 %v1117_v51, %v1116_v49 }
0x1957   :  { %v1072_v57 = vadd.f32 %v2426_v62, %v1071_v52 }
0x1958   :  { %v1068_v43 = vpop.f32.mrf.mxu2 }
0x1959   :  { %v1073_v58 = vmax.f32 %v1072_v57, 0.0 }
0x195b   :  { %v1074_v59 = vpack.c.bf16 %v1073_v58, %v1073_v58 }
0x195d   :  { %1895 = vmatmul.msk.bf16.vlgmr.msrb.gmra.mxu3 %vm98_vm2, %v1074_v59 }
0x195e   :  { %1249 = vmatpush.bf16.msrb.mxu3 %v2369_v7 }
0x1962   :  { %1250 = vmatpush.bf16.msrb.mxu3 %v2375_v13 }
0x1966   :  { %1251 = vmatpush.bf16.msrb.mxu3 %v2381_v8 }
0x196a   :  { %1252 = vmatpush.bf16.msrb.mxu3 %v2387_v14 }
0x19e0   :  { %v1087_v61 = vpop.f32.mrf.mxu3 }
0x19e1   :  { %v1088_v63 = vadd.f32 %v2438_v53, %v1087_v61 }
0x19e3   :  { %v1091_v0 = vmax.f32 %v1088_v63, 0.0 }
0x19e5   :  { %v1092_v1 = vpack.c.bf16 %v1091_v0, %v1091_v0  ;;  %v1113_v21 = vadd.f32 %v1112_v45, %v1091_v0 }
0x19e7   :  { %v2489_v10 = vadd.f32 %v1113_v21, %v2392_v22  ;;  %1896 = vmatmul.msk.bf16.vlgmr.msra.gmra.mxu0 %vm98_vm2, %v1092_v1 }
0x19e8   :  { %v1089_v11 = vpop.f32.mrf.mxu3  ;;  %1267 = vmatpush.bf16.msra.mxu0 %v2398_v55 }
0x19ec   :  { %1268 = vmatpush.bf16.msra.mxu0 %v2404_v15 }
0x19f0   :  { %1269 = vmatpush.bf16.msra.mxu0 %v2410_v33 }
0x19f4   :  { %1270 = vmatpush.bf16.msra.mxu0 %v2416_v56 }
0x1a64   :  { %v1105_v16 = vpop.f32.mrf.mxu0 }
0x1a65   :  { %v1106_v17 = vadd.f32 %v2449_v19, %v1105_v16 }
0x1a67   :  { %v1119_v18 = vadd.f32 %v1118_v54, %v1106_v17 }
0x1a69   :  { %v1120_v20 = vmul.f32 0.016666668, %v1119_v18 }
0x1a6b   :  { %v2498_v23 = vadd.f32 %v1120_v20, %v2421_v60 }
0x1a6c   :  { %v1107_v22 = vpop.f32.mrf.mxu0 }
0x1a6d   :  { %v1122_v24 = vadd.f32 %v2426_v62, %v2498_v23 }
0x1a6f   :  { %v1123_v25 = vmax.f32 %v1122_v24, 0.0 }
0x1a71   :  { %v1124_v26 = vpack.c.bf16 %v1123_v25, %v1123_v25 }
0x1a73   :  { %1897 = vmatmul.msk.bf16.vlgmr.msra.gmra.mxu1 %vm98_vm2, %v1124_v26 }
0x1a74   :  { %1299 = vmatpush.bf16.msra.mxu1 %v2369_v7 }
0x1a78   :  { %1300 = vmatpush.bf16.msra.mxu1 %v2375_v13 }
0x1a7c   :  { %1301 = vmatpush.bf16.msra.mxu1 %v2381_v8 }
0x1a80   :  { %1302 = vmatpush.bf16.msra.mxu1 %v2387_v14 }
0x1af0   :  { %v1137_v27 = vpop.f32.mrf.mxu1 }
0x1af1   :  { %v1138_v60 = vadd.f32 %v2438_v53, %v1137_v27 }
0x1af3   :  { %v1141_v28 = vmax.f32 %v1138_v60, 0.0 }
0x1af5   :  { %v1142_v29 = vpack.c.bf16 %v1141_v28, %v1141_v28 }
0x1af7   :  { %1898 = vmatmul.msk.bf16.vlgmr.msra.gmra.mxu2 %vm98_vm2, %v1142_v29 }
0x1af8   :  { %v1139_v30 = vpop.f32.mrf.mxu1  ;;  %1317 = vmatpush.bf16.msra.mxu2 %v2398_v55 }
0x1afc   :  { %1318 = vmatpush.bf16.msra.mxu2 %v2404_v15 }
0x1b00   :  { %1319 = vmatpush.bf16.msra.mxu2 %v2410_v33 }
0x1b04   :  { %1320 = vmatpush.bf16.msra.mxu2 %v2416_v56 }
0x1b7a   :  { %v1155_v31 = vpop.f32.mrf.mxu2 }
0x1b7b   :  { %v1156_v32 = vadd.f32 %v2449_v19, %v1155_v31 }
0x1b7d   :  { %v1159_v12 = vmul.f32 0.05, %v1156_v32 }
0x1b7f   :  { %v1160_v34 = vadd.f32 %v1159_v12, %v2498_v23 }
0x1b81   :  { %v1161_v35 = vadd.f32 %v2426_v62, %v1160_v34 }
0x1b82   :  { %v1157_v36 = vpop.f32.mrf.mxu2 }
0x1b83   :  { %v1162_v37 = vmax.f32 %v1161_v35, 0.0 }
0x1b85   :  { %v1163_v38 = vpack.c.bf16 %v1162_v37, %v1162_v37 }
0x1b87   :  { %1899 = vmatmul.msk.bf16.vlgmr.msra.gmra.mxu3 %vm98_vm2, %v1163_v38 }
0x1b88   :  { %1338 = vmatpush.bf16.msra.mxu3 %v2369_v7 }
0x1b8c   :  { %1339 = vmatpush.bf16.msra.mxu3 %v2375_v13 }
0x1b90   :  { %1340 = vmatpush.bf16.msra.mxu3 %v2381_v8 }
0x1b94   :  { %1341 = vmatpush.bf16.msra.mxu3 %v2387_v14 }
0x1c0a   :  { %v1176_v39 = vpop.f32.mrf.mxu3 }
0x1c0b   :  { %v1177_v40 = vadd.f32 %v2438_v53, %v1176_v39 }
0x1c0d   :  { %v1180_v2 = vmax.f32 %v1177_v40, 0.0 }
0x1c0f   :  { %v1181_v3 = vpack.c.bf16 %v1180_v2, %v1180_v2  ;;  %v1276_v48 = vmul.f32 2.0, %v1180_v2 }
0x1c11   :  { %1900 = vmatmul.msk.bf16.vlgmr.msrb.gmra.mxu0 %vm98_vm2, %v1181_v3  ;;  %v1277_v51 = vadd.f32 %v1276_v48, %v1141_v28 }
0x1c12   :  { %v1178_v4 = vpop.f32.mrf.mxu3  ;;  %1356 = vmatpush.bf16.msrb.mxu0 %v2398_v55 }
0x1c16   :  { %1357 = vmatpush.bf16.msrb.mxu0 %v2404_v15 }
0x1c1a   :  { %1358 = vmatpush.bf16.msrb.mxu0 %v2410_v33 }
0x1c1e   :  { %1359 = vmatpush.bf16.msrb.mxu0 %v2416_v56 }
0x1c8e   :  { %v1194_v5 = vpop.f32.mrf.mxu0 }
0x1c8f   :  { %v1195_v41 = vadd.f32 %v2449_v19, %v1194_v5 }
0x1c91   :  { %v1198_v42 = vmul.f32 0.05, %v1195_v41  ;;  %v1282_v58 = vmul.f32 2.0, %v1195_v41 }
0x1c93   :  { %v1199_v9 = vadd.f32 %v1198_v42, %v2498_v23  ;;  %v1283_v63 = vadd.f32 %v1282_v58, %v1156_v32 }
0x1c95   :  { %v1200_v44 = vadd.f32 %v2426_v62, %v1199_v9 }
0x1c96   :  { %v1196_v45 = vpop.f32.mrf.mxu0 }
0x1c97   :  { %v1201_v46 = vmax.f32 %v1200_v44, 0.0 }
0x1c99   :  { %v1202_v6 = vpack.c.bf16 %v1201_v46, %v1201_v46 }
0x1c9b   :  { %1901 = vmatmul.msk.bf16.vlgmr.msrb.gmra.mxu1 %vm98_vm2, %v1202_v6 }
0x1c9c   :  { %1377 = vmatpush.bf16.msrb.mxu1 %v2369_v7 }
0x1ca0   :  { %1378 = vmatpush.bf16.msrb.mxu1 %v2375_v13 }
0x1ca4   :  { %1379 = vmatpush.bf16.msrb.mxu1 %v2381_v8 }
0x1ca8   :  { %1380 = vmatpush.bf16.msrb.mxu1 %v2387_v14 }
0x1d18   :  { %v1215_v47 = vpop.f32.mrf.mxu1 }
0x1d19   :  { %v1216_v49 = vadd.f32 %v2438_v53, %v1215_v47 }
0x1d1b   :  { %v1219_v50 = vmax.f32 %v1216_v49, 0.0 }
0x1d1d   :  { %v1220_v52 = vpack.c.bf16 %v1219_v50, %v1219_v50  ;;  %v1278_v54 = vmul.f32 2.0, %v1219_v50 }
0x1d1f   :  { %1902 = vmatmul.msk.bf16.vlgmr.msrb.gmra.mxu2 %vm98_vm2, %v1220_v52  ;;  %v1279_v57 = vadd.f32 %v1278_v54, %v1277_v51 }
0x1d20   :  { %v1217_v43 = vpop.f32.mrf.mxu1  ;;  %1395 = vmatpush.bf16.msrb.mxu2 %v2398_v55 }
0x1d24   :  { %1396 = vmatpush.bf16.msrb.mxu2 %v2404_v15 }
0x1d28   :  { %1397 = vmatpush.bf16.msrb.mxu2 %v2410_v33 }
0x1d2c   :  { %1398 = vmatpush.bf16.msrb.mxu2 %v2416_v56 }
0x1da2   :  { %v1233_v59 = vpop.f32.mrf.mxu2 }
0x1da3   :  { %v1234_v61 = vadd.f32 %v2449_v19, %v1233_v59 }
0x1da5   :  { %v1237_v0 = vmul.f32 0.1, %v1234_v61  ;;  %v1284_v1 = vmul.f32 2.0, %v1234_v61 }
0x1da7   :  { %v1238_v21 = vadd.f32 %v1237_v0, %v2498_v23  ;;  %v1285_v11 = vadd.f32 %v1284_v1, %v1283_v63 }
0x1da9   :  { %v1239_v16 = vadd.f32 %v2426_v62, %v1238_v21 }
0x1daa   :  { %v1235_v17 = vpop.f32.mrf.mxu2 }
0x1dab   :  { %v1240_v18 = vmax.f32 %v1239_v16, 0.0 }
0x1dad   :  { %v1241_v20 = vpack.c.bf16 %v1240_v18, %v1240_v18 }
0x1daf   :  { %1903 = vmatmul.msk.bf16.vlgmr.msrb.gmra.mxu3 %vm98_vm2, %v1241_v20 }
0x1db0   :  { %1416 = vmatpush.bf16.msrb.mxu3 %v2369_v7 }
0x1db4   :  { %1417 = vmatpush.bf16.msrb.mxu3 %v2375_v13 }
0x1db8   :  { %1418 = vmatpush.bf16.msrb.mxu3 %v2381_v8 }
0x1dbc   :  { %1419 = vmatpush.bf16.msrb.mxu3 %v2387_v14 }
0x1e32   :  { %v1254_v22 = vpop.f32.mrf.mxu3 }
0x1e33   :  { %v1255_v24 = vadd.f32 %v2438_v53, %v1254_v22 }
0x1e35   :  { %v1258_v25 = vmax.f32 %v1255_v24, 0.0 }
0x1e37   :  { %v1259_v26 = vpack.c.bf16 %v1258_v25, %v1258_v25  ;;  %v1280_v27 = vadd.f32 %v1279_v57, %v1258_v25 }
0x1e39   :  { %v2551_v60 = vadd.f32 %v1280_v27, %v2489_v10  ;;  %1904 = vmatmul.msk.bf16.vlgmr.msra.gmra.mxu0 %vm98_vm2, %v1259_v26 }
0x1e3a   :  { %v1256_v28 = vpop.f32.mrf.mxu3  ;;  %1434 = vmatpush.bf16.msra.mxu0 %v2398_v55 }
0x1e3e   :  { %1435 = vmatpush.bf16.msra.mxu0 %v2404_v15 }
0x1e42   :  { %1436 = vmatpush.bf16.msra.mxu0 %v2410_v33 }
0x1e46   :  { %1437 = vmatpush.bf16.msra.mxu0 %v2416_v56 }
0x1eb6   :  { %v1272_v29 = vpop.f32.mrf.mxu0 }
0x1eb7   :  { %v1273_v30 = vadd.f32 %v2449_v19, %v1272_v29 }
0x1eb9   :  { %v1286_v31 = vadd.f32 %v1285_v11, %v1273_v30 }
0x1ebb   :  { %v1287_v32 = vmul.f32 0.016666668, %v1286_v31 }
0x1ebd   :  { %v2560_v12 = vadd.f32 %v1287_v32, %v2498_v23 }
0x1ebe   :  { %v1274_v10 = vpop.f32.mrf.mxu0 }
0x1ebf   :  { %v1289_v34 = vadd.f32 %v2426_v62, %v2560_v12 }
0x1ec1   :  { %v1290_v35 = vmax.f32 %v1289_v34, 0.0 }
0x1ec3   :  { %v1291_v36 = vpack.c.bf16 %v1290_v35, %v1290_v35 }
0x1ec5   :  { %1905 = vmatmul.msk.bf16.vlgmr.msra.gmra.mxu1 %vm98_vm2, %v1291_v36 }
0x1ec6   :  { %1466 = vmatpush.bf16.msra.mxu1 %v2369_v7 }
0x1eca   :  { %1467 = vmatpush.bf16.msra.mxu1 %v2375_v13 }
0x1ece   :  { %1468 = vmatpush.bf16.msra.mxu1 %v2381_v8 }
0x1ed2   :  { %1469 = vmatpush.bf16.msra.mxu1 %v2387_v14 }
0x1f42   :  { %v1304_v37 = vpop.f32.mrf.mxu1 }
0x1f43   :  { %v1305_v23 = vadd.f32 %v2438_v53, %v1304_v37 }
0x1f45   :  { %v1308_v38 = vmax.f32 %v1305_v23, 0.0 }
0x1f47   :  { %v1309_v39 = vpack.c.bf16 %v1308_v38, %v1308_v38 }
0x1f49   :  { %1906 = vmatmul.msk.bf16.vlgmr.msra.gmra.mxu2 %vm98_vm2, %v1309_v39 }
0x1f4a   :  { %v1306_v40 = vpop.f32.mrf.mxu1  ;;  %1484 = vmatpush.bf16.msra.mxu2 %v2398_v55 }
0x1f4e   :  { %1485 = vmatpush.bf16.msra.mxu2 %v2404_v15 }
0x1f52   :  { %1486 = vmatpush.bf16.msra.mxu2 %v2410_v33 }
0x1f56   :  { %1487 = vmatpush.bf16.msra.mxu2 %v2416_v56 }
0x1fcc   :  { %v1322_v2 = vpop.f32.mrf.mxu2 }
0x1fcd   :  { %v1323_v3 = vadd.f32 %v2449_v19, %v1322_v2 }
0x1fcf   :  { %v1326_v4 = vmul.f32 0.05, %v1323_v3 }
0x1fd1   :  { %v1327_v5 = vadd.f32 %v1326_v4, %v2560_v12 }
0x1fd3   :  { %v1328_v41 = vadd.f32 %v2426_v62, %v1327_v5 }
0x1fd4   :  { %v1324_v42 = vpop.f32.mrf.mxu2 }
0x1fd5   :  { %v1329_v9 = vmax.f32 %v1328_v41, 0.0 }
0x1fd7   :  { %v1330_v44 = vpack.c.bf16 %v1329_v9, %v1329_v9 }
0x1fd9   :  { %1907 = vmatmul.msk.bf16.vlgmr.msra.gmra.mxu3 %vm98_vm2, %v1330_v44 }
0x1fda   :  { %1505 = vmatpush.bf16.msra.mxu3 %v2369_v7 }
0x1fde   :  { %1506 = vmatpush.bf16.msra.mxu3 %v2375_v13 }
0x1fe2   :  { %1507 = vmatpush.bf16.msra.mxu3 %v2381_v8 }
0x1fe6   :  { %1508 = vmatpush.bf16.msra.mxu3 %v2387_v14 }
0x205c   :  { %v1343_v45 = vpop.f32.mrf.mxu3 }
0x205d   :  { %v1344_v46 = vadd.f32 %v2438_v53, %v1343_v45 }
0x205f   :  { %v1347_v6 = vmax.f32 %v1344_v46, 0.0 }
0x2061   :  { %v1348_v47 = vpack.c.bf16 %v1347_v6, %v1347_v6  ;;  %v1443_v61 = vmul.f32 2.0, %v1347_v6 }
0x2063   :  { %1908 = vmatmul.msk.bf16.vlgmr.msrb.gmra.mxu0 %vm98_vm2, %v1348_v47  ;;  %v1444_v1 = vadd.f32 %v1443_v61, %v1308_v38 }
0x2064   :  { %v1345_v48 = vpop.f32.mrf.mxu3  ;;  %1523 = vmatpush.bf16.msrb.mxu0 %v2398_v55 }
0x2068   :  { %1524 = vmatpush.bf16.msrb.mxu0 %v2404_v15 }
0x206c   :  { %1525 = vmatpush.bf16.msrb.mxu0 %v2410_v33 }
0x2070   :  { %1526 = vmatpush.bf16.msrb.mxu0 %v2416_v56 }
0x20e0   :  { %v1361_v49 = vpop.f32.mrf.mxu0 }
0x20e1   :  { %v1362_v50 = vadd.f32 %v2449_v19, %v1361_v49 }
0x20e3   :  { %v1365_v51 = vmul.f32 0.05, %v1362_v50  ;;  %v1449_v18 = vmul.f32 2.0, %v1362_v50 }
0x20e5   :  { %v1366_v52 = vadd.f32 %v1365_v51, %v2560_v12  ;;  %v1450_v24 = vadd.f32 %v1449_v18, %v1323_v3 }
0x20e7   :  { %v1367_v54 = vadd.f32 %v2426_v62, %v1366_v52 }
0x20e8   :  { %v1363_v57 = vpop.f32.mrf.mxu0 }
0x20e9   :  { %v1368_v43 = vmax.f32 %v1367_v54, 0.0 }
0x20eb   :  { %v1369_v58 = vpack.c.bf16 %v1368_v43, %v1368_v43 }
0x20ed   :  { %1909 = vmatmul.msk.bf16.vlgmr.msrb.gmra.mxu1 %vm98_vm2, %v1369_v58 }
0x20ee   :  { %1544 = vmatpush.bf16.msrb.mxu1 %v2369_v7 }
0x20f2   :  { %1545 = vmatpush.bf16.msrb.mxu1 %v2375_v13 }
0x20f6   :  { %1546 = vmatpush.bf16.msrb.mxu1 %v2381_v8 }
0x20fa   :  { %1547 = vmatpush.bf16.msrb.mxu1 %v2387_v14 }
0x216a   :  { %v1382_v59 = vpop.f32.mrf.mxu1 }
0x216b   :  { %v1383_v63 = vadd.f32 %v2438_v53, %v1382_v59 }
0x216d   :  { %v1386_v0 = vmax.f32 %v1383_v63, 0.0 }
0x216f   :  { %v1387_v21 = vpack.c.bf16 %v1386_v0, %v1386_v0  ;;  %v1445_v11 = vmul.f32 2.0, %v1386_v0 }
0x2171   :  { %1910 = vmatmul.msk.bf16.vlgmr.msrb.gmra.mxu2 %vm98_vm2, %v1387_v21  ;;  %v1446_v16 = vadd.f32 %v1445_v11, %v1444_v1 }
0x2172   :  { %v1384_v17 = vpop.f32.mrf.mxu1  ;;  %1562 = vmatpush.bf16.msrb.mxu2 %v2398_v55 }
0x2176   :  { %1563 = vmatpush.bf16.msrb.mxu2 %v2404_v15 }
0x217a   :  { %1564 = vmatpush.bf16.msrb.mxu2 %v2410_v33 }
0x217e   :  { %1565 = vmatpush.bf16.msrb.mxu2 %v2416_v56 }
0x21f4   :  { %v1400_v20 = vpop.f32.mrf.mxu2 }
0x21f5   :  { %v1401_v22 = vadd.f32 %v2449_v19, %v1400_v20 }
0x21f7   :  { %v1404_v25 = vmul.f32 0.1, %v1401_v22  ;;  %v1451_v26 = vmul.f32 2.0, %v1401_v22 }
0x21f9   :  { %v1405_v27 = vadd.f32 %v1404_v25, %v2560_v12  ;;  %v1452_v28 = vadd.f32 %v1451_v26, %v1450_v24 }
0x21fb   :  { %v1406_v29 = vadd.f32 %v2426_v62, %v1405_v27 }
0x21fc   :  { %v1402_v30 = vpop.f32.mrf.mxu2 }
0x21fd   :  { %v1407_v31 = vmax.f32 %v1406_v29, 0.0 }
0x21ff   :  { %v1408_v32 = vpack.c.bf16 %v1407_v31, %v1407_v31 }
0x2201   :  { %1911 = vmatmul.msk.bf16.vlgmr.msrb.gmra.mxu3 %vm98_vm2, %v1408_v32 }
0x2202   :  { %1583 = vmatpush.bf16.msrb.mxu3 %v2369_v7 }
0x2206   :  { %1584 = vmatpush.bf16.msrb.mxu3 %v2375_v13 }
0x220a   :  { %1585 = vmatpush.bf16.msrb.mxu3 %v2381_v8 }
0x220e   :  { %1586 = vmatpush.bf16.msrb.mxu3 %v2387_v14 }
0x2284   :  { %v1421_v10 = vpop.f32.mrf.mxu3 }
0x2285   :  { %v1422_v34 = vadd.f32 %v2438_v53, %v1421_v10 }
0x2287   :  { %v1425_v35 = vmax.f32 %v1422_v34, 0.0 }
0x2289   :  { %v1426_v36 = vpack.c.bf16 %v1425_v35, %v1425_v35  ;;  %v1447_v37 = vadd.f32 %v1446_v16, %v1425_v35 }
0x228b   :  { %v2613_v23 = vadd.f32 %v1447_v37, %v2551_v60  ;;  %1912 = vmatmul.msk.bf16.vlgmr.msra.gmra.mxu0 %vm98_vm2, %v1426_v36 }
0x228c   :  { %v1423_v38 = vpop.f32.mrf.mxu3  ;;  %1601 = vmatpush.bf16.msra.mxu0 %v2398_v55 }
0x2290   :  { %1602 = vmatpush.bf16.msra.mxu0 %v2404_v15 }
0x2294   :  { %1603 = vmatpush.bf16.msra.mxu0 %v2410_v33 }
0x2298   :  { %1604 = vmatpush.bf16.msra.mxu0 %v2416_v56 }
0x2308   :  { %v1439_v39 = vpop.f32.mrf.mxu0 }
0x2309   :  { %v1440_v40 = vadd.f32 %v2449_v19, %v1439_v39 }
0x230b   :  { %v1453_v2 = vadd.f32 %v1452_v28, %v1440_v40 }
0x230d   :  { %v1454_v3 = vmul.f32 0.016666668, %v1453_v2 }
0x230f   :  { %v2622_v4 = vadd.f32 %v1454_v3, %v2560_v12 }
0x2310   :  { %v1441_v60 = vpop.f32.mrf.mxu0 }
0x2311   :  { %v1456_v5 = vadd.f32 %v2426_v62, %v2622_v4 }
0x2313   :  { %v1457_v41 = vmax.f32 %v1456_v5, 0.0 }
0x2315   :  { %v1458_v42 = vpack.c.bf16 %v1457_v41, %v1457_v41 }
0x2317   :  { %1913 = vmatmul.msk.bf16.vlgmr.msra.gmra.mxu1 %vm98_vm2, %v1458_v42 }
0x2318   :  { %1633 = vmatpush.bf16.msra.mxu1 %v2369_v7 }
0x231c   :  { %1634 = vmatpush.bf16.msra.mxu1 %v2375_v13 }
0x2320   :  { %1635 = vmatpush.bf16.msra.mxu1 %v2381_v8 }
0x2324   :  { %1636 = vmatpush.bf16.msra.mxu1 %v2387_v14 }
0x2394   :  { %v1471_v9 = vpop.f32.mrf.mxu1 }
0x2395   :  { %v1472_v12 = vadd.f32 %v2438_v53, %v1471_v9 }
0x2397   :  { %v1475_v44 = vmax.f32 %v1472_v12, 0.0 }
0x2399   :  { %v1476_v45 = vpack.c.bf16 %v1475_v44, %v1475_v44 }
0x239b   :  { %1914 = vmatmul.msk.bf16.vlgmr.msra.gmra.mxu2 %vm98_vm2, %v1476_v45 }
0x239c   :  { %v1473_v46 = vpop.f32.mrf.mxu1  ;;  %1651 = vmatpush.bf16.msra.mxu2 %v2398_v55 }
0x23a0   :  { %1652 = vmatpush.bf16.msra.mxu2 %v2404_v15 }
0x23a4   :  { %1653 = vmatpush.bf16.msra.mxu2 %v2410_v33 }
0x23a8   :  { %1654 = vmatpush.bf16.msra.mxu2 %v2416_v56 }
0x241e   :  { %v1489_v6 = vpop.f32.mrf.mxu2 }
0x241f   :  { %v1490_v47 = vadd.f32 %v2449_v19, %v1489_v6 }
0x2421   :  { %v1493_v48 = vmul.f32 0.05, %v1490_v47 }
0x2423   :  { %v1494_v49 = vadd.f32 %v1493_v48, %v2622_v4 }
0x2425   :  { %v1495_v50 = vadd.f32 %v2426_v62, %v1494_v49 }
0x2426   :  { %v1491_v51 = vpop.f32.mrf.mxu2 }
0x2427   :  { %v1496_v52 = vmax.f32 %v1495_v50, 0.0 }
0x2429   :  { %v1497_v54 = vpack.c.bf16 %v1496_v52, %v1496_v52 }
0x242b   :  { %1915 = vmatmul.msk.bf16.vlgmr.msra.gmra.mxu3 %vm98_vm2, %v1497_v54 }
0x242c   :  { %1672 = vmatpush.bf16.msra.mxu3 %v2369_v7 }
0x2430   :  { %1673 = vmatpush.bf16.msra.mxu3 %v2375_v13 }
0x2434   :  { %1674 = vmatpush.bf16.msra.mxu3 %v2381_v8 }
0x2438   :  { %1675 = vmatpush.bf16.msra.mxu3 %v2387_v14 }
0x24ae   :  { %v1510_v57 = vpop.f32.mrf.mxu3 }
0x24af   :  { %v1511_v43 = vadd.f32 %v2438_v53, %v1510_v57 }
0x24b1   :  { %v1514_v58 = vmax.f32 %v1511_v43, 0.0 }
0x24b3   :  { %v1515_v59 = vpack.c.bf16 %v1514_v58, %v1514_v58  ;;  %v1610_v22 = vmul.f32 2.0, %v1514_v58 }
0x24b5   :  { %1916 = vmatmul.msk.bf16.vlgmr.msrb.gmra.mxu0 %vm98_vm2, %v1515_v59  ;;  %v1611_v26 = vadd.f32 %v1610_v22, %v1475_v44 }
0x24b6   :  { %v1512_v61 = vpop.f32.mrf.mxu3  ;;  %1690 = vmatpush.bf16.msrb.mxu0 %v2398_v55 }
0x24ba   :  { %1691 = vmatpush.bf16.msrb.mxu0 %v2404_v15 }
0x24be   :  { %1692 = vmatpush.bf16.msrb.mxu0 %v2410_v33 }
0x24c2   :  { %1693 = vmatpush.bf16.msrb.mxu0 %v2416_v56 }
0x2532   :  { %v1528_v63 = vpop.f32.mrf.mxu0 }
0x2533   :  { %v1529_v0 = vadd.f32 %v2449_v19, %v1528_v63 }
0x2535   :  { %v1532_v1 = vmul.f32 0.05, %v1529_v0  ;;  %v1616_v31 = vmul.f32 2.0, %v1529_v0 }
0x2537   :  { %v1533_v21 = vadd.f32 %v1532_v1, %v2622_v4  ;;  %v1617_v34 = vadd.f32 %v1616_v31, %v1490_v47 }
0x2539   :  { %v1534_v11 = vadd.f32 %v2426_v62, %v1533_v21 }
0x253a   :  { %v1530_v16 = vpop.f32.mrf.mxu0 }
0x253b   :  { %v1535_v17 = vmax.f32 %v1534_v11, 0.0 }
0x253d   :  { %v1536_v18 = vpack.c.bf16 %v1535_v17, %v1535_v17 }
0x253f   :  { %1917 = vmatmul.msk.bf16.vlgmr.msrb.gmra.mxu1 %vm98_vm2, %v1536_v18 }
0x2540   :  { %1711 = vmatpush.bf16.msrb.mxu1 %v2369_v7 }
0x2544   :  { %1712 = vmatpush.bf16.msrb.mxu1 %v2375_v13 }
0x2548   :  { %1713 = vmatpush.bf16.msrb.mxu1 %v2381_v8 }
0x254c   :  { %1714 = vmatpush.bf16.msrb.mxu1 %v2387_v14 }
0x25bc   :  { %v1549_v20 = vpop.f32.mrf.mxu1 }
0x25bd   :  { %v1550_v24 = vadd.f32 %v2438_v53, %v1549_v20 }
0x25bf   :  { %v1553_v25 = vmax.f32 %v1550_v24, 0.0 }
0x25c1   :  { %v1554_v27 = vpack.c.bf16 %v1553_v25, %v1553_v25  ;;  %v1612_v28 = vmul.f32 2.0, %v1553_v25 }
0x25c3   :  { %1918 = vmatmul.msk.bf16.vlgmr.msrb.gmra.mxu2 %vm98_vm2, %v1554_v27  ;;  %v1613_v29 = vadd.f32 %v1612_v28, %v1611_v26 }
0x25c4   :  { %v1551_v30 = vpop.f32.mrf.mxu1  ;;  %1729 = vmatpush.bf16.msrb.mxu2 %v2398_v55 }
0x25c8   :  { %1730 = vmatpush.bf16.msrb.mxu2 %v2404_v15 }
0x25cc   :  { %1731 = vmatpush.bf16.msrb.mxu2 %v2410_v33 }
0x25d0   :  { %1732 = vmatpush.bf16.msrb.mxu2 %v2416_v56 }
0x2646   :  { %v1567_v32 = vpop.f32.mrf.mxu2 }
0x2647   :  { %v1568_v10 = vadd.f32 %v2449_v19, %v1567_v32 }
0x2649   :  { %v1571_v35 = vmul.f32 0.1, %v1568_v10  ;;  %v1618_v36 = vmul.f32 2.0, %v1568_v10  ;;  %v1773_v10 = vld [vmem:[%s2737_s3 + $0x38] sm:$0xff] }
0x264b   :  { %v1572_v37 = vadd.f32 %v1571_v35, %v2622_v4  ;;  %v1619_v38 = vadd.f32 %v1618_v36, %v1617_v34  ;;  %v1772_v34 = vld [vmem:[%s2737_s3 + $0x30] sm:$0xff]  ;;  %v1771_v35 = vld [vmem:[%s2737_s3 + $0x28] sm:$0xff]  ;;  %v1770_v36 = vld [vmem:[%s2737_s3 + $0x20] sm:$0xff] }
0x264d   :  { %v1573_v39 = vadd.f32 %v2426_v62, %v1572_v37 }
0x264e   :  { %v1569_v40 = vpop.f32.mrf.mxu2 }
0x264f   :  { %v1574_v55 = vmax.f32 %v1573_v39, 0.0 }
0x2651   :  { %v1575_v2 = vpack.c.bf16 %v1574_v55, %v1574_v55 }
0x2653   :  { %1919 = vmatmul.msk.bf16.vlgmr.msrb.gmra.mxu3 %vm98_vm2, %v1575_v2 }
0x2654   :  { %1750 = vmatpush.bf16.msrb.mxu3 %v2369_v7 }
0x2658   :  { %1751 = vmatpush.bf16.msrb.mxu3 %v2375_v13 }
0x265c   :  { %1752 = vmatpush.bf16.msrb.mxu3 %v2381_v8 }
0x2660   :  { %1753 = vmatpush.bf16.msrb.mxu3 %v2387_v14 }
0x26d6   :  { %v1588_v15 = vpop.f32.mrf.mxu3 }
0x26d7   :  { %v1589_v33 = vadd.f32 %v2438_v53, %v1588_v15 }
0x26d9   :  { %v1592_v56 = vmax.f32 %v1589_v33, 0.0 }
0x26db   :  { %v1593_v3 = vpack.c.bf16 %v1592_v56, %v1592_v56  ;;  %v1614_v60 = vadd.f32 %v1613_v29, %v1592_v56  ;;  %v1769_v56 = vld [vmem:[%s2737_s3 + $0x18] sm:$0xff] }
0x26dd   :  { %v2675_v5 = vadd.f32 %v1614_v60, %v2613_v23  ;;  %1920 = vmatmul.msk.bf16.vlgmr.msra.gmra.mxu0 %vm98_vm2, %v1593_v3  ;;  %v1768_v3 = vld [vmem:[%s2737_s3 + $0x10] sm:$0xff] }
0x26de   :  { %v1590_v41 = vpop.f32.mrf.mxu3  ;;  %1787 = vmatpush.msra.mxu0 %v1773_v10 }
0x26e0   :  { %1788 = vmatpush.msra.mxu0 %v1772_v34 }
0x26e2   :  { %1789 = vmatpush.msra.mxu0 %v1771_v35 }
0x26e4   :  { %1790 = vmatpush.msra.mxu0 %v1770_v36 }
0x26e6   :  { %1791 = vmatpush.msra.mxu0 %v1769_v56 }
0x26e8   :  { %1792 = vmatpush.msra.mxu0 %v1768_v3 }
0x275a   :  { %v1606_v42 = vpop.f32.mrf.mxu0 }
0x275b   :  { %v1607_v7 = vadd.f32 %v2449_v19, %v1606_v42 }
0x275d   :  { %v1620_v13 = vadd.f32 %v1619_v38, %v1607_v7 }
0x275f   :  { %v1621_v9 = vmul.f32 0.016666668, %v1620_v13 }
0x2761   :  { %v1622_v8 = vadd.f32 %v1621_v9, %v2622_v4 }
0x2762   :  { %v1608_v14 = vpop.f32.mrf.mxu0 }
0x2763   :  { %v1623_v12 = vadd.f32 %v2426_v62, %v1622_v8  ;;  %v1940_v14 = vld [vmem:[%s2737_s3 + $0x40] ss:$0 sm:$0xff] }
0x2765   :  { %v1624_v44 = vmax.f32 %v1623_v12, 0.0 }
0x2767   :  { %v1625_v45 = vpack.c.bf16 %v1624_v44, %v1624_v44  ;;  %v1952_v44 = vld [vmem:[%s2735_s0] sm:$0xff] }
0x2769   :  { %1921 = vmatmul.msk.bf16.vlgmr.msra.gmra.mxu1 %vm98_vm2, %v1625_v45 }
0x27e6   :  { %v1638_v46 = vpop.f32.mrf.mxu1 }
0x27e7   :  { %v1639_v23 = vadd.f32 %v2438_v53, %v1638_v46 }
0x27e9   :  { %v1642_v6 = vmax.f32 %v1639_v23, 0.0 }
0x27eb   :  { %v1643_v47 = vpack.c.bf16 %v1642_v6, %v1642_v6 }
0x27ed   :  { %1922 = vmatmul.msk.bf16.vlgmr.msra.gmra.mxu2 %vm98_vm2, %v1643_v47 }
0x27ee   :  { %v1640_v48 = vpop.f32.mrf.mxu1 }
0x2870   :  { %v1656_v49 = vpop.f32.mrf.mxu2 }
0x2871   :  { %v1657_v50 = vadd.f32 %v2449_v19, %v1656_v49 }
0x2873   :  { %v1660_v51 = vmul.f32 0.05, %v1657_v50 }
0x2875   :  { %v1661_v4 = vadd.f32 %v1660_v51, %v1622_v8 }
0x2877   :  { %v1662_v52 = vadd.f32 %v2426_v62, %v1661_v4 }
0x2878   :  { %v1658_v54 = vpop.f32.mrf.mxu2 }
0x2879   :  { %v1663_v57 = vmax.f32 %v1662_v52, 0.0 }
0x287b   :  { %v1664_v43 = vpack.c.bf16 %v1663_v57, %v1663_v57 }
0x287d   :  { %1923 = vmatmul.msk.bf16.vlgmr.msra.gmra.mxu3 %vm98_vm2, %v1664_v43 }
0x2900   :  { %v1677_v58 = vpop.f32.mrf.mxu3 }
0x2901   :  { %v1678_v59 = vadd.f32 %v2438_v53, %v1677_v58 }
0x2903   :  { %v1681_v61 = vmax.f32 %v1678_v59, 0.0 }
0x2905   :  { %v1682_v63 = vpack.c.bf16 %v1681_v61, %v1681_v61  ;;  %v1760_v25 = vmul.f32 2.0, %v1681_v61 }
0x2907   :  { %1924 = vmatmul.msk.bf16.vlgmr.msrb.gmra.mxu0 %vm98_vm2, %v1682_v63  ;;  %v1761_v28 = vadd.f32 %v1760_v25, %v1642_v6 }
0x2908   :  { %v1679_v0 = vpop.f32.mrf.mxu3 }
0x2984   :  { %v1695_v1 = vpop.f32.mrf.mxu0 }
0x2985   :  { %v1696_v21 = vadd.f32 %v2449_v19, %v1695_v1 }
0x2987   :  { %v1699_v11 = vmul.f32 0.05, %v1696_v21 }
0x2989   :  { %v1700_v16 = vadd.f32 %v1699_v11, %v1622_v8 }
0x298b   :  { %v1701_v17 = vadd.f32 %v2426_v62, %v1700_v16 }
0x298c   :  { %v1697_v18 = vpop.f32.mrf.mxu0 }
0x298d   :  { %v1702_v20 = vmax.f32 %v1701_v17, 0.0 }
0x298f   :  { %v1703_v22 = vpack.c.bf16 %v1702_v20, %v1702_v20 }
0x2991   :  { %1925 = vmatmul.msk.bf16.vlgmr.msrb.gmra.mxu1 %vm98_vm2, %v1703_v22 }
0x2a0e   :  { %v1716_v24 = vpop.f32.mrf.mxu1 }
0x2a0f   :  { %v1717_v26 = vadd.f32 %v2438_v53, %v1716_v24 }
0x2a11   :  { %v1720_v27 = vmax.f32 %v1717_v26, 0.0 }
0x2a13   :  { %v1721_v29 = vpack.c.bf16 %v1720_v27, %v1720_v27  ;;  %v1762_v30 = vmul.f32 2.0, %v1720_v27 }
0x2a15   :  { %1926 = vmatmul.msk.bf16.vlgmr.msrb.gmra.mxu2 %vm98_vm2, %v1721_v29  ;;  %v1763_v31 = vadd.f32 %v1762_v30, %v1761_v28 }
0x2a16   :  { %v1718_v32 = vpop.f32.mrf.mxu1 }
0x2a98   :  { %v1734_v37 = vpop.f32.mrf.mxu2 }
0x2a99   :  { %v1735_v38 = vadd.f32 %v2449_v19, %v1734_v37  ;;  %v1767_v19 = vld [vmem:[%s2737_s3 + $0x8] sm:$0xff] }
0x2a9a   :  { %1793 = vmatpush.msra.mxu0 %v1767_v19 }
0x2a9b   :  { %v1738_v39 = vmul.f32 0.1, %v1735_v38 }
0x2a9d   :  { %v1739_v40 = vadd.f32 %v1738_v39, %v1622_v8 }
0x2a9f   :  { %v1740_v55 = vadd.f32 %v2426_v62, %v1739_v40  ;;  %v1766_v62 = vld [vmem:[%s2737_s3] sm:$0xff] }
0x2aa0   :  { %v1736_v2 = vpop.f32.mrf.mxu2  ;;  %1794 = vmatpush.msra.mxu0 %v1766_v62 }
0x2aa1   :  { %v1741_v15 = vmax.f32 %v1740_v55, 0.0 }
0x2aa3   :  { %v1742_v33 = vpack.c.bf16 %v1741_v15, %v1741_v15 }
0x2aa5   :  { %1927 = vmatmul.msk.bf16.vlgmr.msrb.gmra.mxu3 %vm98_vm2, %v1742_v33 }
0x2b28   :  { %v1755_v60 = vpop.f32.mrf.mxu3 }
0x2b29   :  { %v1756_v41 = vadd.f32 %v2438_v53, %v1755_v60 }
0x2b2b   :  { %v1759_v42 = vmax.f32 %v1756_v41, 0.0 }
0x2b2d   :  { %v1764_v7 = vadd.f32 %v1763_v31, %v1759_v42 }
0x2b2f   :  { %v1765_v13 = vadd.f32 %v1764_v7, %v2675_v5 }
0x2b30   :  { %v1757_v9 = vpop.f32.mrf.mxu3 }
0x2b31   :  { %1928 = vmatmul.msk.f32.vlgmr.msra.gmra.mxu0 %vm98_vm2, %v1765_v13 }
0x2bae   :  { %v1796_v8 = vpop.f32.mrf.mxu0 }
0x2baf   :  { %v1799_v12 = vmul.f32 0.016666668, %v1796_v8 }
0x2bb1   :  { %v1800_v45 = vadd.f32 %v1952_v44, %v1799_v12 }
0x2bb3   :  { %v1801_v46 = vadd.f32 %v1940_v14, %v1800_v45 }
0x2bb5   :  { %1802 = vst.msk [vmem:[%s2738_s4] sm:$0xff] %vm43_vm1, %v1801_v46 }

</bundles_post_ra>
